<compile_context>
chip_gen: v7x
topology: tpu7x:2x2x1
jax: 0.10.0
libtpu: 0.0.40
codegen_flags: <defaults>
</compile_context>

<pallas_src>
import numpy as np
import jax
import jax.numpy as jnp
from jax.experimental import pallas as pl
from jax.experimental.pallas import tpu as pltpu

LATENT_DIM = 32
SEQ_LEN = 184          # required by fc1: 128 * (184 // 8) == 2944
NEG_SLOPE = 0.01       # nn.LeakyReLU default negative_slope
CIN_PAD1 = 8           # layer-1 input channels padded 1 -> 8
CPAD = 128             # lane-dense channel width through the conv stack
N_T = SEQ_LEN // 8     # 23 time steps entering fc1


# ----------------------------------------------------------------------------
# Fused kernel: conv1+pool -> conv2+pool -> conv3+pool -> fc1 -> lrelu -> fc2
#               -> lrelu -> out, one grid step per batch sample.
# ----------------------------------------------------------------------------
def _standard_cnn_kernel(x_ref, w1_ref, b1_ref, w2_ref, b2_ref, w3_ref, b3_ref,
                         fc1w_ref, fc1b_ref, fc2w_ref, fc2b_ref, ow_ref, ob_ref,
                         o_ref):
    f32, bf16 = jnp.float32, jnp.bfloat16

    def leaky(v):
        return jnp.where(v > 0, v, NEG_SLOPE * v)

    def conv_circ_pool(x, w_cat, bias):
        # x: (L, Cin_pad) f32, w_cat: (3*Cin_pad, 128) bf16, bias: (1, 128) f32
        L = x.shape[0]
        x_prev = pltpu.roll(x, shift=1, axis=0)        # x[(t-1) mod L]  (XLU)
        x_next = pltpu.roll(x, shift=L - 1, axis=0)    # x[(t+1) mod L]  (XLU)
        # One wide-K MXU matmul for all 3 taps.
        xt = jnp.concatenate([x_prev, x, x_next], axis=-1).astype(bf16)
        y = jnp.dot(xt, w_cat, preferred_element_type=f32) + bias   # (L, 128)
        # MaxPool1d(2): reshape + VPU max (no selection matmuls).
        y = y.reshape(L // 2, 2, y.shape[-1])
        return jnp.max(y, axis=1)                                   # (L//2, 128)

    h = x_ref[0]                                                    # (184, 8) f32
    h = conv_circ_pool(h, w1_ref[...], b1_ref[...])                 # (92, 128)
    h = conv_circ_pool(h, w2_ref[...], b2_ref[...])                 # (46, 128)
    h = conv_circ_pool(h, w3_ref[...], b3_ref[...])                 # (23, 128)

    # fc1 over PyTorch's channel-major flatten:
    #   out[j] = sum_{l,c} h[l, c] * Wk[l, c, j],  Wk[l, c, j] = fc1.weight[j, c*23 + l]
    hb = h.astype(bf16).reshape(h.shape[0], 1, h.shape[1])          # (23, 1, 128)
    p = jnp.einsum('lqc,lcj->lqj', hb, fc1w_ref[...],
                   preferred_element_type=f32)                      # (23, 1, latent)
    z = jnp.sum(p, axis=0)                                          # (1, latent)
    z = leaky(z + fc1b_ref[...])
    z = leaky(jnp.dot(z.astype(bf16), fc2w_ref[...],
                      preferred_element_type=f32) + fc2b_ref[...])
    z = jnp.dot(z.astype(bf16), ow_ref[...],
                preferred_element_type=f32) + ob_ref[...]           # (1, 128)
    o_ref[0] = z            # logits live in lanes 0..1; rest are zero-padded


def standard_cnn_call(x_padded, p):
    B = x_padded.shape[0]
    in_specs = [
        pl.BlockSpec((1, SEQ_LEN, CIN_PAD1), lambda b: (b, 0, 0)),        # x
        pl.BlockSpec((3 * CIN_PAD1, CPAD), lambda b: (0, 0)),             # cnn1 w
        pl.BlockSpec((1, CPAD), lambda b: (0, 0)),                        # cnn1 b
        pl.BlockSpec((3 * CPAD, CPAD), lambda b: (0, 0)),                 # cnn2 w
        pl.BlockSpec((1, CPAD), lambda b: (0, 0)),                        # cnn2 b
        pl.BlockSpec((3 * CPAD, CPAD), lambda b: (0, 0)),                 # cnn3 w
        pl.BlockSpec((1, CPAD), lambda b: (0, 0)),                        # cnn3 b
        pl.BlockSpec((N_T, CPAD, LATENT_DIM), lambda b: (0, 0, 0)),       # fc1 w
        pl.BlockSpec((1, LATENT_DIM), lambda b: (0, 0)),                  # fc1 b
        pl.BlockSpec((LATENT_DIM, LATENT_DIM), lambda b: (0, 0)),         # fc2 w
        pl.BlockSpec((1, LATENT_DIM), lambda b: (0, 0)),                  # fc2 b
        pl.BlockSpec((LATENT_DIM, CPAD), lambda b: (0, 0)),               # out w (N 2->128)
        pl.BlockSpec((1, CPAD), lambda b: (0, 0)),                        # out b
    ]
    return pl.pallas_call(
        _standard_cnn_kernel,
        out_shape=jax.ShapeDtypeStruct((B, 1, CPAD), jnp.float32),
        grid=(B,),
        in_specs=in_specs,
        out_specs=pl.BlockSpec((1, 1, CPAD), lambda b: (b, 0, 0)),
        compiler_params=pltpu.CompilerParams(
            dimension_semantics=("parallel",)),
    )(x_padded, p['cnn1_w'], p['cnn1_b'], p['cnn2_w'], p['cnn2_b'],
      p['cnn3_w'], p['cnn3_b'], p['fc1_w'], p['fc1_b'],
      p['fc2_w'], p['fc2_b'], p['out_w'], p['out_b'])


@jax.jit
def standard_cnn_forward(x, params):
    # x: (B, 1, T) -- PyTorch NCW input layout.
    h = jnp.transpose(x, (0, 2, 1))                          # (B, T, 1)
    h = jnp.pad(h, ((0, 0), (0, 0), (0, CIN_PAD1 - 1)))      # (B, T, 8)
    out = standard_cnn_call(h, params)                       # (B, 1, 128)
    return out[:, 0, :2]                                     # (B, 2) logits


# ----------------------------------------------------------------------------
# Deterministic synthetic parameters (shapes from StandardCNN.__init__),
# in both PyTorch layout (for the reference) and kernel layout.
# ----------------------------------------------------------------------------
def init_params(key, latent_dim=LATENT_DIM):
    ks = jax.random.split(key, 12)

    def uni(k, shape, fan_in):
        bound = 1.0 / np.sqrt(fan_in)
        return jax.random.uniform(k, shape, jnp.float32, -bound, bound)

    # PyTorch-layout tensors (Conv1d weight: (Cout, Cin, K); Linear weight: (out, in)).
    w1 = uni(ks[0], (16, 1, 3), 3);        b1 = uni(ks[1], (16,), 3)
    w2 = uni(ks[2], (64, 16, 3), 48);      b2 = uni(ks[3], (64,), 48)
    w3 = uni(ks[4], (128, 64, 3), 192);    b3 = uni(ks[5], (128,), 192)
    fc1 = uni(ks[6], (latent_dim, 2944), 2944)
    fb1 = uni(ks[7], (latent_dim,), 2944)
    fc2 = uni(ks[8], (latent_dim, latent_dim), latent_dim)
    fb2 = uni(ks[9], (latent_dim,), latent_dim)
    ow = uni(ks[10], (2, latent_dim), latent_dim)
    ob = uni(ks[11], (2,), latent_dim)

    torch_params = dict(w1=w1, b1=b1, w2=w2, b2=b2, w3=w3, b3=b3,
                        fc1=fc1, fb1=fb1, fc2=fc2, fb2=fb2, ow=ow, ob=ob)

    def conv_w_cat(w, cin_pad):
        # (Cout, Cin, 3) -> (3*cin_pad, 128) bf16; row k*cin_pad + c holds w[:, c, k].
        cout, cin, _ = w.shape
        wk = jnp.transpose(w, (2, 1, 0))                             # (3, Cin, Cout)
        wk = jnp.pad(wk, ((0, 0), (0, cin_pad - cin), (0, CPAD - cout)))
        return wk.reshape(3 * cin_pad, CPAD).astype(jnp.bfloat16)

    def conv_b_pad(b):
        return jnp.pad(b, (0, CPAD - b.shape[0])).reshape(1, CPAD)

    # fc1 weight rearranged for the in-kernel (L=23, C=128) activation layout:
    #   Wk[l, c, j] = fc1[j, c*23 + l]   (PyTorch channel-major flatten).
    fc1_wk = jnp.transpose(fc1.reshape(latent_dim, CPAD, N_T),
                           (2, 1, 0)).astype(jnp.bfloat16)

    kernel_params = {
        'cnn1_w': conv_w_cat(w1, CIN_PAD1), 'cnn1_b': conv_b_pad(b1),
        'cnn2_w': conv_w_cat(w2, CPAD),     'cnn2_b': conv_b_pad(b2),
        'cnn3_w': conv_w_cat(w3, CPAD),     'cnn3_b': conv_b_pad(b3),
        'fc1_w': fc1_wk,                     'fc1_b': fb1.reshape(1, -1),
        'fc2_w': fc2.T.astype(jnp.bfloat16), 'fc2_b': fb2.reshape(1, -1),
        'out_w': jnp.pad(ow.T, ((0, 0), (0, CPAD - 2))).astype(jnp.bfloat16),
        'out_b': jnp.pad(ob, (0, CPAD - 2)).reshape(1, CPAD),
    }
    return kernel_params, torch_params


# ----------------------------------------------------------------------------
# Pure-JAX f32 reference (PyTorch semantics: circular Conv1d + MaxPool1d + MLP).
# ----------------------------------------------------------------------------
def reference_forward(x, tp):
    def conv_circ(h, w, b):
        y = b[None, :, None]
        for k in range(3):
            hs = jnp.roll(h, shift=1 - k, axis=-1)      # x[(t + k - 1) mod L]
            y = y + jnp.einsum('oi,bil->bol', w[:, :, k], hs, precision='highest')
        return y

    def pool(h):
        B, C, L = h.shape
        return h.reshape(B, C, L // 2, 2).max(axis=-1)

    def leaky(v):
        return jnp.where(v > 0, v, NEG_SLOPE * v)

    h = pool(conv_circ(x, tp['w1'], tp['b1']))
    h = pool(conv_circ(h, tp['w2'], tp['b2']))
    h = pool(conv_circ(h, tp['w3'], tp['b3']))
    hf = h.reshape(h.shape[0], -1)
    h = leaky(jnp.matmul(hf, tp['fc1'].T, precision='highest') + tp['fb1'])
    h = leaky(jnp.matmul(h, tp['fc2'].T, precision='highest') + tp['fb2'])
    return jnp.matmul(h, tp['ow'].T, precision='highest') + tp['ob']


if __name__ == "__main__":
    key = jax.random.PRNGKey(0)
    pkey, xkey = jax.random.split(key)
    kernel_params, torch_params = init_params(pkey)

    x = jax.random.normal(xkey, (2, 1, SEQ_LEN), jnp.float32)   # (B=2, C=1, T=184)

    out = jax.block_until_ready(standard_cnn_forward(x, kernel_params))
    assert out.shape == (2, 2)

    # Tolerance accounts for bf16 MXU operands (f32 accumulation) vs f32 reference.
    ref = reference_forward(x, torch_params)
    np.testing.assert_allclose(np.asarray(out), np.asarray(ref), rtol=6e-2, atol=3e-2)

    # TODO(synk): training utilities (fit/train_epoch/test_epoch, CrossEntropyLoss,
    # checkpoint save/load) are host-side loops, out of scope for the forward kernel.
    print("KERNEL_OK")
</pallas_src>

<mosaic_0001>
module attributes {stable_mosaic.version = 11 : i64} {
  func.func @_standard_cnn_kernel(%arg0: i32, %arg1: memref<1x184x8xf32, #tpu.memory_space<vmem>>, %arg2: memref<24x128xbf16, #tpu.memory_space<vmem>>, %arg3: memref<1x128xf32, #tpu.memory_space<vmem>>, %arg4: memref<384x128xbf16, #tpu.memory_space<vmem>>, %arg5: memref<1x128xf32, #tpu.memory_space<vmem>>, %arg6: memref<384x128xbf16, #tpu.memory_space<vmem>>, %arg7: memref<1x128xf32, #tpu.memory_space<vmem>>, %arg8: memref<23x128x32xbf16, #tpu.memory_space<vmem>>, %arg9: memref<1x32xf32, #tpu.memory_space<vmem>>, %arg10: memref<32x32xbf16, #tpu.memory_space<vmem>>, %arg11: memref<1x32xf32, #tpu.memory_space<vmem>>, %arg12: memref<32x128xbf16, #tpu.memory_space<vmem>>, %arg13: memref<1x128xf32, #tpu.memory_space<vmem>>, %arg14: memref<1x1x128xf32, #tpu.memory_space<vmem>>) attributes {dimension_semantics = [#tpu.dimension_semantics<parallel>], iteration_bounds = array<i64: 2>, scalar_prefetch = 0 : i64, scratch_operands = 0 : i64, tpu.core_type = #tpu.core_type<tc>, window_params = [{transform_indices = @transform_0, window_bounds = array<i64: 1, 184, 8>}, {pipeline_mode = #tpu.pipeline_mode<synchronous>, transform_indices = @transform_1, window_bounds = array<i64: 24, 128>}, {pipeline_mode = #tpu.pipeline_mode<synchronous>, transform_indices = @transform_2, window_bounds = array<i64: 1, 128>}, {pipeline_mode = #tpu.pipeline_mode<synchronous>, transform_indices = @transform_3, window_bounds = array<i64: 384, 128>}, {pipeline_mode = #tpu.pipeline_mode<synchronous>, transform_indices = @transform_4, window_bounds = array<i64: 1, 128>}, {pipeline_mode = #tpu.pipeline_mode<synchronous>, transform_indices = @transform_5, window_bounds = array<i64: 384, 128>}, {pipeline_mode = #tpu.pipeline_mode<synchronous>, transform_indices = @transform_6, window_bounds = array<i64: 1, 128>}, {pipeline_mode = #tpu.pipeline_mode<synchronous>, transform_indices = @transform_7, window_bounds = array<i64: 23, 128, 32>}, {pipeline_mode = #tpu.pipeline_mode<synchronous>, transform_indices = @transform_8, window_bounds = array<i64: 1, 32>}, {pipeline_mode = #tpu.pipeline_mode<synchronous>, transform_indices = @transform_9, window_bounds = array<i64: 32, 32>}, {pipeline_mode = #tpu.pipeline_mode<synchronous>, transform_indices = @transform_10, window_bounds = array<i64: 1, 32>}, {pipeline_mode = #tpu.pipeline_mode<synchronous>, transform_indices = @transform_11, window_bounds = array<i64: 32, 128>}, {pipeline_mode = #tpu.pipeline_mode<synchronous>, transform_indices = @transform_12, window_bounds = array<i64: 1, 128>}, {transform_indices = @transform_13, window_bounds = array<i64: 1, 1, 128>}]} {
    %c0 = arith.constant 0 : index
    %c0_0 = arith.constant 0 : index
    %c0_1 = arith.constant 0 : index
    %0 = vector.load %arg1[%c0, %c0_0, %c0_1] : memref<1x184x8xf32, #tpu.memory_space<vmem>>, vector<1x184x8xf32>
    %1 = vector.shape_cast %0 : vector<1x184x8xf32> to vector<184x8xf32>
    %c0_2 = arith.constant 0 : index
    %c0_3 = arith.constant 0 : index
    %2 = vector.load %arg2[%c0_2, %c0_3] : memref<24x128xbf16, #tpu.memory_space<vmem>>, vector<24x128xbf16>
    %c0_4 = arith.constant 0 : index
    %c0_5 = arith.constant 0 : index
    %3 = vector.load %arg3[%c0_4, %c0_5] : memref<1x128xf32, #tpu.memory_space<vmem>>, vector<1x128xf32>
    %c1_i32 = arith.constant 1 : i32
    %4 = tpu.dynamic_rotate %1 by %c1_i32 dim 0 : vector<184x8xf32>, i32 -> vector<184x8xf32>
    %c183_i32 = arith.constant 183 : i32
    %5 = tpu.dynamic_rotate %1 by %c183_i32 dim 0 : vector<184x8xf32>, i32 -> vector<184x8xf32>
    %6 = tpu.concatenate %4, %1, %5 in 1 : vector<184x8xf32>, vector<184x8xf32>, vector<184x8xf32> -> vector<184x24xf32>
    %7 = arith.truncf %6 : vector<184x24xf32> to vector<184x24xbf16>
    %cst = arith.constant dense<0.000000e+00> : vector<184x128xf32>
    %8 = tpu.matmul %7, %2, %cst {dimension_numbers = #tpu.dot_dimension_numbers<[1], [0], [0], [1], [0, 0, 1, 1], [], []>} : vector<184x24xbf16>, vector<24x128xbf16>, vector<184x128xf32> -> vector<184x128xf32>
    %9 = vector.broadcast %3 : vector<1x128xf32> to vector<184x128xf32>
    %10 = arith.addf %8, %9 : vector<184x128xf32>
    %11 = vector.shape_cast %10 : vector<184x128xf32> to vector<92x2x128xf32>
    %cst_6 = arith.constant dense<0xFF800000> : vector<92x128xf32>
    %12 = vector.multi_reduction <maximumf>, %11, %cst_6 [1] : vector<92x2x128xf32> to vector<92x128xf32>
    %c0_7 = arith.constant 0 : index
    %c0_8 = arith.constant 0 : index
    %13 = vector.load %arg4[%c0_7, %c0_8] : memref<384x128xbf16, #tpu.memory_space<vmem>>, vector<384x128xbf16>
    %c0_9 = arith.constant 0 : index
    %c0_10 = arith.constant 0 : index
    %14 = vector.load %arg5[%c0_9, %c0_10] : memref<1x128xf32, #tpu.memory_space<vmem>>, vector<1x128xf32>
    %c1_i32_11 = arith.constant 1 : i32
    %15 = tpu.dynamic_rotate %12 by %c1_i32_11 dim 0 : vector<92x128xf32>, i32 -> vector<92x128xf32>
    %c91_i32 = arith.constant 91 : i32
    %16 = tpu.dynamic_rotate %12 by %c91_i32 dim 0 : vector<92x128xf32>, i32 -> vector<92x128xf32>
    %17 = tpu.concatenate %15, %12, %16 in 1 : vector<92x128xf32>, vector<92x128xf32>, vector<92x128xf32> -> vector<92x384xf32>
    %18 = arith.truncf %17 : vector<92x384xf32> to vector<92x384xbf16>
    %cst_12 = arith.constant dense<0.000000e+00> : vector<92x128xf32>
    %19 = tpu.matmul %18, %13, %cst_12 {dimension_numbers = #tpu.dot_dimension_numbers<[1], [0], [0], [1], [0, 0, 1, 1], [], []>} : vector<92x384xbf16>, vector<384x128xbf16>, vector<92x128xf32> -> vector<92x128xf32>
    %20 = vector.broadcast %14 : vector<1x128xf32> to vector<92x128xf32>
    %21 = arith.addf %19, %20 : vector<92x128xf32>
    %22 = vector.shape_cast %21 : vector<92x128xf32> to vector<46x2x128xf32>
    %cst_13 = arith.constant dense<0xFF800000> : vector<46x128xf32>
    %23 = vector.multi_reduction <maximumf>, %22, %cst_13 [1] : vector<46x2x128xf32> to vector<46x128xf32>
    %c0_14 = arith.constant 0 : index
    %c0_15 = arith.constant 0 : index
    %24 = vector.load %arg6[%c0_14, %c0_15] : memref<384x128xbf16, #tpu.memory_space<vmem>>, vector<384x128xbf16>
    %c0_16 = arith.constant 0 : index
    %c0_17 = arith.constant 0 : index
    %25 = vector.load %arg7[%c0_16, %c0_17] : memref<1x128xf32, #tpu.memory_space<vmem>>, vector<1x128xf32>
    %c1_i32_18 = arith.constant 1 : i32
    %26 = tpu.dynamic_rotate %23 by %c1_i32_18 dim 0 : vector<46x128xf32>, i32 -> vector<46x128xf32>
    %c45_i32 = arith.constant 45 : i32
    %27 = tpu.dynamic_rotate %23 by %c45_i32 dim 0 : vector<46x128xf32>, i32 -> vector<46x128xf32>
    %28 = tpu.concatenate %26, %23, %27 in 1 : vector<46x128xf32>, vector<46x128xf32>, vector<46x128xf32> -> vector<46x384xf32>
    %29 = arith.truncf %28 : vector<46x384xf32> to vector<46x384xbf16>
    %cst_19 = arith.constant dense<0.000000e+00> : vector<46x128xf32>
    %30 = tpu.matmul %29, %24, %cst_19 {dimension_numbers = #tpu.dot_dimension_numbers<[1], [0], [0], [1], [0, 0, 1, 1], [], []>} : vector<46x384xbf16>, vector<384x128xbf16>, vector<46x128xf32> -> vector<46x128xf32>
    %31 = vector.broadcast %25 : vector<1x128xf32> to vector<46x128xf32>
    %32 = arith.addf %30, %31 : vector<46x128xf32>
    %33 = vector.shape_cast %32 : vector<46x128xf32> to vector<23x2x128xf32>
    %cst_20 = arith.constant dense<0xFF800000> : vector<23x128xf32>
    %34 = vector.multi_reduction <maximumf>, %33, %cst_20 [1] : vector<23x2x128xf32> to vector<23x128xf32>
    %35 = arith.truncf %34 : vector<23x128xf32> to vector<23x128xbf16>
    %36 = vector.shape_cast %35 : vector<23x128xbf16> to vector<23x1x128xbf16>
    %c0_21 = arith.constant 0 : index
    %c0_22 = arith.constant 0 : index
    %c0_23 = arith.constant 0 : index
    %37 = vector.load %arg8[%c0_21, %c0_22, %c0_23] : memref<23x128x32xbf16, #tpu.memory_space<vmem>>, vector<23x128x32xbf16>
    "tpu.trace_start"() <{level = 10 : i32, message = "lqc,lcj->lqj"}> : () -> ()
    %cst_24 = arith.constant dense<0.000000e+00> : vector<23x1x32xf32>
    %38 = tpu.matmul %36, %37, %cst_24 {dimension_numbers = #tpu.dot_dimension_numbers<[2], [1], [1], [2], [0, 0, 0, 1, 1, 2], [0], [0]>} : vector<23x1x128xbf16>, vector<23x128x32xbf16>, vector<23x1x32xf32> -> vector<23x1x32xf32>
    "tpu.trace_stop"() : () -> ()
    %cst_25 = arith.constant dense<0.000000e+00> : vector<1x32xf32>
    %39 = vector.multi_reduction <add>, %38, %cst_25 [0] : vector<23x1x32xf32> to vector<1x32xf32>
    %c0_26 = arith.constant 0 : index
    %c0_27 = arith.constant 0 : index
    %40 = vector.load %arg9[%c0_26, %c0_27] : memref<1x32xf32, #tpu.memory_space<vmem>>, vector<1x32xf32>
    %41 = arith.addf %39, %40 : vector<1x32xf32>
    %cst_28 = arith.constant 0.000000e+00 : f32
    %42 = vector.broadcast %cst_28 : f32 to vector<1x32xf32>
    %43 = arith.cmpf ogt, %41, %42 : vector<1x32xf32>
    %cst_29 = arith.constant 0.00999999977 : f32
    %44 = vector.broadcast %cst_29 : f32 to vector<1x32xf32>
    %45 = arith.mulf %44, %41 : vector<1x32xf32>
    %46 = arith.select %43, %41, %45 : vector<1x32xi1>, vector<1x32xf32>
    %47 = arith.truncf %46 : vector<1x32xf32> to vector<1x32xbf16>
    %c0_30 = arith.constant 0 : index
    %c0_31 = arith.constant 0 : index
    %48 = vector.load %arg10[%c0_30, %c0_31] : memref<32x32xbf16, #tpu.memory_space<vmem>>, vector<32x32xbf16>
    %cst_32 = arith.constant dense<0.000000e+00> : vector<1x32xf32>
    %49 = tpu.matmul %47, %48, %cst_32 {dimension_numbers = #tpu.dot_dimension_numbers<[1], [0], [0], [1], [0, 0, 1, 1], [], []>} : vector<1x32xbf16>, vector<32x32xbf16>, vector<1x32xf32> -> vector<1x32xf32>
    %c0_33 = arith.constant 0 : index
    %c0_34 = arith.constant 0 : index
    %50 = vector.load %arg11[%c0_33, %c0_34] : memref<1x32xf32, #tpu.memory_space<vmem>>, vector<1x32xf32>
    %51 = arith.addf %49, %50 : vector<1x32xf32>
    %cst_35 = arith.constant 0.000000e+00 : f32
    %52 = vector.broadcast %cst_35 : f32 to vector<1x32xf32>
    %53 = arith.cmpf ogt, %51, %52 : vector<1x32xf32>
    %cst_36 = arith.constant 0.00999999977 : f32
    %54 = vector.broadcast %cst_36 : f32 to vector<1x32xf32>
    %55 = arith.mulf %54, %51 : vector<1x32xf32>
    %56 = arith.select %53, %51, %55 : vector<1x32xi1>, vector<1x32xf32>
    %57 = arith.truncf %56 : vector<1x32xf32> to vector<1x32xbf16>
    %c0_37 = arith.constant 0 : index
    %c0_38 = arith.constant 0 : index
    %58 = vector.load %arg12[%c0_37, %c0_38] : memref<32x128xbf16, #tpu.memory_space<vmem>>, vector<32x128xbf16>
    %cst_39 = arith.constant dense<0.000000e+00> : vector<1x128xf32>
    %59 = tpu.matmul %57, %58, %cst_39 {dimension_numbers = #tpu.dot_dimension_numbers<[1], [0], [0], [1], [0, 0, 1, 1], [], []>} : vector<1x32xbf16>, vector<32x128xbf16>, vector<1x128xf32> -> vector<1x128xf32>
    %c0_40 = arith.constant 0 : index
    %c0_41 = arith.constant 0 : index
    %60 = vector.load %arg13[%c0_40, %c0_41] : memref<1x128xf32, #tpu.memory_space<vmem>>, vector<1x128xf32>
    %61 = arith.addf %59, %60 : vector<1x128xf32>
    %c0_42 = arith.constant 0 : index
    %c0_43 = arith.constant 0 : index
    %c0_44 = arith.constant 0 : index
    %62 = vector.load %arg14[%c0_42, %c0_43, %c0_44] : memref<1x1x128xf32, #tpu.memory_space<vmem>>, vector<1x1x128xf32>
    %63 = vector.shape_cast %62 : vector<1x1x128xf32> to vector<1x128xf32>
    %64 = vector.shape_cast %61 : vector<1x128xf32> to vector<1x1x128xf32>
    tpu.vector_store %arg14[%c0_42, %c0_43, %c0_44], %64 {strides = array<i32>} : memref<1x1x128xf32, #tpu.memory_space<vmem>>, vector<1x1x128xf32>,
    return
  }
  func.func @transform_0(%arg0: i32) -> (i32, i32, i32) {
    %c0_i32 = arith.constant 0 : i32
    %c0_i32_0 = arith.constant 0 : i32
    %c0_i32_1 = arith.constant 0 : i32
    return %arg0, %c0_i32, %c0_i32_0 : i32, i32, i32
  }
  func.func @transform_1(%arg0: i32) -> (i32, i32) {
    %c0_i32 = arith.constant 0 : i32
    %c0_i32_0 = arith.constant 0 : i32
    %c0_i32_1 = arith.constant 0 : i32
    return %c0_i32, %c0_i32_0 : i32, i32
  }
  func.func @transform_2(%arg0: i32) -> (i32, i32) {
    %c0_i32 = arith.constant 0 : i32
    %c0_i32_0 = arith.constant 0 : i32
    %c0_i32_1 = arith.constant 0 : i32
    return %c0_i32, %c0_i32_0 : i32, i32
  }
  func.func @transform_3(%arg0: i32) -> (i32, i32) {
    %c0_i32 = arith.constant 0 : i32
    %c0_i32_0 = arith.constant 0 : i32
    %c0_i32_1 = arith.constant 0 : i32
    return %c0_i32, %c0_i32_0 : i32, i32
  }
  func.func @transform_4(%arg0: i32) -> (i32, i32) {
    %c0_i32 = arith.constant 0 : i32
    %c0_i32_0 = arith.constant 0 : i32
    %c0_i32_1 = arith.constant 0 : i32
    return %c0_i32, %c0_i32_0 : i32, i32
  }
  func.func @transform_5(%arg0: i32) -> (i32, i32) {
    %c0_i32 = arith.constant 0 : i32
    %c0_i32_0 = arith.constant 0 : i32
    %c0_i32_1 = arith.constant 0 : i32
    return %c0_i32, %c0_i32_0 : i32, i32
  }
  func.func @transform_6(%arg0: i32) -> (i32, i32) {
    %c0_i32 = arith.constant 0 : i32
    %c0_i32_0 = arith.constant 0 : i32
    %c0_i32_1 = arith.constant 0 : i32
    return %c0_i32, %c0_i32_0 : i32, i32
  }
  func.func @transform_7(%arg0: i32) -> (i32, i32, i32) {
    %c0_i32 = arith.constant 0 : i32
    %c0_i32_0 = arith.constant 0 : i32
    %c0_i32_1 = arith.constant 0 : i32
    %c0_i32_2 = arith.constant 0 : i32
    return %c0_i32, %c0_i32_0, %c0_i32_1 : i32, i32, i32
  }
  func.func @transform_8(%arg0: i32) -> (i32, i32) {
    %c0_i32 = arith.constant 0 : i32
    %c0_i32_0 = arith.constant 0 : i32
    %c0_i32_1 = arith.constant 0 : i32
    return %c0_i32, %c0_i32_0 : i32, i32
  }
  func.func @transform_9(%arg0: i32) -> (i32, i32) {
    %c0_i32 = arith.constant 0 : i32
    %c0_i32_0 = arith.constant 0 : i32
    %c0_i32_1 = arith.constant 0 : i32
    return %c0_i32, %c0_i32_0 : i32, i32
  }
  func.func @transform_10(%arg0: i32) -> (i32, i32) {
    %c0_i32 = arith.constant 0 : i32
    %c0_i32_0 = arith.constant 0 : i32
    %c0_i32_1 = arith.constant 0 : i32
    return %c0_i32, %c0_i32_0 : i32, i32
  }
  func.func @transform_11(%arg0: i32) -> (i32, i32) {
    %c0_i32 = arith.constant 0 : i32
    %c0_i32_0 = arith.constant 0 : i32
    %c0_i32_1 = arith.constant 0 : i32
    return %c0_i32, %c0_i32_0 : i32, i32
  }
  func.func @transform_12(%arg0: i32) -> (i32, i32) {
    %c0_i32 = arith.constant 0 : i32
    %c0_i32_0 = arith.constant 0 : i32
    %c0_i32_1 = arith.constant 0 : i32
    return %c0_i32, %c0_i32_0 : i32, i32
  }
  func.func @transform_13(%arg0: i32) -> (i32, i32, i32) {
    %c0_i32 = arith.constant 0 : i32
    %c0_i32_0 = arith.constant 0 : i32
    %c0_i32_1 = arith.constant 0 : i32
    return %arg0, %c0_i32, %c0_i32_0 : i32, i32, i32
  }
}

</mosaic_0001>

<bundles_post_ra>
// kernel: standard_cnn_forward.1
= control target key start
LH: loop header
LB: loop body
LE: loop exit
PB: predicated region body
PF: predicated region fallthrough
CT: control target
= control target key end

     0   :  { %s11742_s0 = inlined_call_operand.vmem [shape: f32[2,184,8], index: 0, kind: input, shape index: {}]   ;;  %s11743_s1 = inlined_call_operand.vmem [shape: bf16[24,128], index: 1, kind: input, shape index: {}]   ;;  %s11744_s2 = inlined_call_operand.vmem [shape: f32[1,128], index: 2, kind: input, shape index: {}]   ;;  %s11745_s3 = inlined_call_operand.vmem [shape: bf16[384,128], index: 3, kind: input, shape index: {}]   ;;  %s11746_s4 = inlined_call_operand.vmem [shape: f32[1,128], index: 4, kind: input, shape index: {}]   ;;  %s11747_s5 = inlined_call_operand.vmem [shape: bf16[384,128], index: 5, kind: input, shape index: {}]   ;;  %s11748_s6 = inlined_call_operand.vmem [shape: f32[1,128], index: 6, kind: input, shape index: {}]   ;;  %s11749_s7 = inlined_call_operand.vmem [shape: bf16[23,128,32], index: 7, kind: input, shape index: {}]   ;;  %s11750_s8 = inlined_call_operand.vmem [shape: f32[1,32], index: 8, kind: input, shape index: {}]   ;;  %s11751_s9 = inlined_call_operand.vmem [shape: bf16[32,32], index: 9, kind: input, shape index: {}]   ;;  %s11752_s10 = inlined_call_operand.vmem [shape: f32[1,32], index: 10, kind: input, shape index: {}]   ;;  %s11753_s11 = inlined_call_operand.vmem [shape: bf16[32,128], index: 11, kind: input, shape index: {}]   ;;  %s11754_s12 = inlined_call_operand.vmem [shape: f32[1,128], index: 12, kind: input, shape index: {}]   ;;  %s11755_s13 = inlined_call_operand.hbm [shape: f32[2,1,128], index: 13, kind: output, shape index: {}]  }
   0x1   :  { %11788 = sst [smem:[#allocation44_spill]] %s11742_s0 }
   0x2   :  { %18 = vsyncpa [#allocation3], 0 }
   0x3   :  { %20 = vsyncpa [#allocation3 + $0x1], 0  ;;  %s8875_s25 = smov 0   ;;  %s8877_s26 = smov 0  }
   0x4   :  { %s8879_s27 = smov 0   ;;  %s8881_s28 = smov 0  }
   0x5 LB: > { %s8896_s29 = sadd.s32 4294967295, %s8797_s28   ;;  %s7179_s30 = sadd.s32 4294967294, %s8797_s28   ;;  %s8797_s28 = sphi %s8881_s28, %s11880_s28   ;;  %s8793_s27 = sphi %s8879_s27, %s11879_s27   ;;  %s8789_s26 = sphi %s8877_s26, %s11878_s26   ;;  %s8785_s25 = sphi %s8875_s25, %s11877_s25  }
   0x6   : > { %s8900_s14 = sadd.s32 1, %s8797_s28   ;;  %s311_s15 = sadd.s32 1, %s8793_s27 }
   0x7   : > { %s308_s16 = ssub.s32 %s8797_s28, %s8900_s14  ;;  %p321_p0 = scmp.ne.s32.totalorder %s8793_s27, %s8789_s26 }
   0x8   : > { %p309_p1 = scmp.eq.s32.totalorder %s308_s16, 0  ;;  %p322_p2 = scmp.eq.s32.totalorder %s8896_s29, 1 }
   0x9   : > { %p327_p3 = scmp.ne.s32.totalorder %s8789_s26, %s8785_s25  ;;  %p328_p4 = scmp.eq.s32.totalorder %s7179_s30, 1 }
   0xa   : > { %s8911_s17 = scalar_select %p309_p1, %s8793_s27, %s311_s15  }
   0xb   : > { %p8913_p5 = por %p322_p2, %p321_p0  ;;  %p8917_p6 = por %p328_p4, %p327_p3 }
   0xc   : > { %11789 = sst [smem:[#allocation5_spill]] %s8911_s17  ;;  %p7182_p7 = scmp.ge.s32.totalorder %s8797_s28, 1 }
   0xd   : > { %p390_p8 = scmp.lt.s32.totalorder %s8797_s28, 3 }
   0xf   : > { %p391_p9 = pnand %p7182_p7, %p390_p8 }
  0x11   : > { %394 = sbr.rel (%p391_p9) target bundleno = 2248 (0x8c8), region = 72 }
  0x18   : > { %p433_p10 = scmp.lt.s32.totalorder %s8896_s29, 1  ;;  %v489_v0 = vlaneseq  ;;  %v8496_v1 = vld [vmem:[%s11743_s1] sm:$0xff]   ;;  %v8497_v3 = vld [vmem:[%s11743_s1 + $0x8] ss:$0 sps:$4 sm:$0xff]   ;;  %vm858_vm0 = vcmask 1043456   ;;  %s11792_s0 = sld [smem:[#allocation44_spill]] }
  0x19   : > { %7780 = vmatprep.subr.bf16.mxu0 %v8496_v1  ;;  %v860_v4 = vsel %vm858_vm0, %v8497_v3, 0  ;;  %s8799_s20 = smov 8   ;;  %s8800_s21 = smov 16   ;;  %vm746_vm3 = vcmask 64512   ;;  %vm770_vm4 = vcmask 130048   ;;  %vm821_vm5 = vcmask 195584  }
  0x1a   : > { %s434_s22 = scalar_select %p433_p10, %s8896_s29, 1  ;;  %v8928_v2 = vshrl.u32 %v489_v0, 7  ;;  %7781 = vmatpush3.bf16.msra.mxu0 %v8496_v1  ;;  %vm1496_vm6 = vcmask 1041408   ;;  %vm2282_vm7 = vcmask 1041409   ;;  %vm2284_vm8 = vcmask 1042434  }
  0x1b   : > { %8340 = vmatprep.subr.msk.bf16.mxu0 %vm858_vm0, %v8497_v3  ;;  %vm2288_vm9 = vcmask 1044484   ;;  %vm2286_vm10 = vcmask 1043459   ;;  %vm2290_vm11 = vcmask 1045509   ;;  %vm2292_vm12 = vcmask 1046534  }
  0x1c   : > { %s8341_s23 = smul.u32 184, %s434_s22  ;;  %vm538_vm1 = vcmp.lt.s32.totalorder %v8928_v2, 7  ;;  %vm491_vm2 = vcmp.lt.s32.totalorder %v8928_v2, 1  ;;  %vm2294_vm13 = vcmask 1047559   ;;  %vm2558_vm14 = vsmask.f32 6400 }
  0x1d   : > { %vm2381_vm15 = vcmask 1047556   ;;  %s7439_s22 = sshll.u32 %s8896_s29, 4 }
  0x1e   : > { %s8936_s17 = scalar_lea.vmem %s11792_s0, %s8341_s23  ;;  %7783 = vmatpush3.bf16.msra.mxu0 %v860_v4  ;;  %s11700_s16 = scalar_lea.hbm %s11755_s13, %s7439_s22 }
  0x1f   : > { %v8941_v5 = vld [vmem:[%s8936_s17] sm:$0xff]  ;;  %v8944_v6 = vld [vmem:[%s8936_s17 + $0x8] sm:$0xff]  ;;  %v8947_v7 = vld [vmem:[%s8936_s17 + $0x10] sm:$0xff] }
  0x20   : > { %v516_v8 = vrot.slane %v8944_v6, 1  ;;  %v8386_v9 = vpack.i.bf16 %v8944_v6, %v8941_v5  ;;  %v8954_v10 = vld [vmem:[%s8936_s17 + $0x18] sm:$0xff]  ;;  %v8957_v11 = vld [vmem:[%s8936_s17 + $0x20] sm:$0xff]  ;;  %v8960_v12 = vld [vmem:[%s8936_s17 + $0x28] sm:$0xff]  ;;  %v515_v13 = vrot.slane %v8941_v5, 1  ;;  %v517_v14 = vrot.slane %v8947_v7, 1 }
  0x21   : > { %v518_v15 = vrot.slane %v8954_v10, 1  ;;  %v8391_v16 = vpack.i.bf16 %v8954_v10, %v8947_v7  ;;  %v519_v17 = vrot.slane %v8957_v11, 1  ;;  %v520_v20 = vrot.slane %v8960_v12, 1  ;;  %v8977_v21 = vld [vmem:[%s8936_s17 + $0x30] sm:$0xff]  ;;  %v8980_v22 = vld [vmem:[%s8936_s17 + $0x38] sm:$0xff]  ;;  %v8983_v23 = vld [vmem:[%s8936_s17 + $0x40] sm:$0xff] }
  0x22   : > { %8387 = vrot.lane.b32.xlu0 %v8386_v9, %s8799_s20  ;;  %v559_v18 = vsel %vm538_vm1, %v516_v8, %v517_v14  ;;  %v560_v19 = vsel %vm538_vm1, %v515_v13, %v516_v8  ;;  %v467_v27 = vrot.slane %v8944_v6, 7  ;;  %v466_v28 = vrot.slane %v8941_v5, 7  ;;  %v9000_v35 = vld [vmem:[%s8936_s17 + $0x48] sm:$0xff]  ;;  %v9007_v39 = vld [vmem:[%s8936_s17 + $0x50] sm:$0xff]  ;;  %v9010_v40 = vld [vmem:[%s8936_s17 + $0x58] sm:$0xff] }
  0x23   : > { %v8401_v24 = vpack.i.bf16 %v559_v18, %v560_v19  ;;  %v557_v25 = vsel %vm538_vm1, %v518_v15, %v519_v17  ;;  %v558_v26 = vsel %vm538_vm1, %v517_v14, %v518_v15  ;;  %v468_v29 = vrot.slane %v8947_v7, 7  ;;  %v9015_v42 = vld [vmem:[%s8936_s17 + $0x60] sm:$0xff]  ;;  %v9022_v46 = vld [vmem:[%s8936_s17 + $0x68] sm:$0xff]  ;;  %v9032_v51 = vld [vmem:[%s8936_s17 + $0x70] sm:$0xff] }
  0x24   : > { %v8396_v30 = vpack.i.bf16 %v8960_v12, %v8957_v11  ;;  %v8406_v31 = vpack.i.bf16 %v557_v25, %v558_v26  ;;  %v522_v32 = vrot.slane %v8980_v22, 1  ;;  %v521_v33 = vrot.slane %v8977_v21, 1  ;;  %v9036_v53 = vld [vmem:[%s8936_s17 + $0x78] sm:$0xff]  ;;  %v9042_v56 = vld [vmem:[%s8936_s17 + $0x80] sm:$0xff]  ;;  %v9057_v1 = vld [vmem:[%s8936_s17 + $0x88] sm:$0xff] }
  0x25   : > { %8402 = vrot.lane.b32.xlu1 %v8401_v24, %s8800_s21  ;;  %v523_v34 = vrot.slane %v8983_v23, 1  ;;  %v469_v36 = vrot.slane %v8954_v10, 7  ;;  %v471_v37 = vrot.slane %v8960_v12, 7  ;;  %v556_v38 = vsel %vm538_vm1, %v519_v17, %v520_v20  ;;  %v9062_v8 = vld [vmem:[%s8936_s17 + $0xb0] sm:$0xff]  ;;  %v9082_v26 = vld [vmem:[%s8936_s17 + $0x98] sm:$0xff] }
  0x26   : > { %8392 = vrot.lane.b32.xlu0 %v8391_v16, %s8799_s20  ;;  %v555_v41 = vsel %vm538_vm1, %v520_v20, %v521_v33  ;;  %v473_v43 = vrot.slane %v8980_v22, 7  ;;  %v8411_v44 = vpack.i.bf16 %v8980_v22, %v8977_v21  ;;  %v524_v45 = vrot.slane %v9000_v35, 1 }
  0x27   : > { %v8416_v47 = vpack.i.bf16 %v555_v41, %v556_v38  ;;  %v553_v48 = vsel %vm538_vm1, %v522_v32, %v523_v34  ;;  %v554_v49 = vsel %vm538_vm1, %v521_v33, %v522_v32  ;;  %v525_v50 = vrot.slane %v9007_v39, 1 }
  0x28   : > { %v472_v52 = vrot.slane %v8977_v21, 7  ;;  %v475_v54 = vrot.slane %v9000_v35, 7  ;;  %v526_v55 = vrot.slane %v9010_v40, 1  ;;  %v8421_v57 = vpack.i.bf16 %v553_v48, %v554_v49  ;;  %v460_v49 = vld [vmem:[%s8936_s17 + $0xa8] sm:$0xff] }
  0x29   : > { %8407 = vrot.lane.b32.xlu1 %v8406_v31, %s8800_s21  ;;  %v8426_v58 = vpack.i.bf16 %v9000_v35, %v8983_v23  ;;  %v477_v59 = vrot.slane %v9010_v40, 7  ;;  %v527_v60 = vrot.slane %v9015_v42, 1  ;;  %v551_v61 = vsel %vm538_vm1, %v524_v45, %v525_v50 }
  0x2a   : > { %8397 = vrot.lane.b32.xlu0 %v8396_v30, %s8799_s20  ;;  %v552_v62 = vsel %vm538_vm1, %v523_v34, %v524_v45  ;;  %v528_v63 = vrot.slane %v9022_v46, 1  ;;  %v529_v0 = vrot.slane %v9032_v51, 1  ;;  %v476_v3 = vrot.slane %v9007_v39, 7  ;;  %v457_v45 = vld [vmem:[%s8936_s17 + $0x90] sm:$0xff] }
  0x2b   : > { %v479_v4 = vrot.slane %v9022_v46, 7  ;;  %v8431_v9 = vpack.i.bf16 %v9010_v40, %v9007_v39  ;;  %v550_v14 = vsel %vm538_vm1, %v525_v50, %v526_v55  ;;  %v481_v15 = vrot.slane %v9036_v53, 7 }
  0x2c   : > { %v530_v16 = vrot.slane %v9036_v53, 1  ;;  %v8436_v17 = vpack.i.bf16 %v551_v61, %v552_v62  ;;  %v549_v18 = vsel %vm538_vm1, %v526_v55, %v527_v60  ;;  %v480_v19 = vrot.slane %v9032_v51, 7 }
  0x2d   : > { %8412 = vrot.lane.b32.xlu1 %v8411_v44, %s8799_s20  ;;  %v531_v20 = vrot.slane %v9042_v56, 1  ;;  %v547_v21 = vsel %vm538_vm1, %v528_v63, %v529_v0  ;;  %v548_v24 = vsel %vm538_vm1, %v527_v60, %v528_v63  ;;  %v483_v25 = vrot.slane %v9057_v1, 7 }
  0x2e   : > { %8417 = vrot.lane.b32.xlu0 %v8416_v47, %s8800_s21  ;;  %v488_v30 = vrot.slane %v9062_v8, 7  ;;  %v8446_v31 = vpack.i.bf16 %v9022_v46, %v9015_v42  ;;  %v532_v32 = vrot.slane %v9057_v1, 1  ;;  %v485_v33 = vrot.slane %v9082_v26, 7 }
  0x2f   : > { %v8441_v34 = vpack.i.bf16 %v549_v18, %v550_v14  ;;  %v8451_v35 = vpack.i.bf16 %v9036_v53, %v9032_v51  ;;  %v546_v38 = vsel %vm538_vm1, %v529_v0, %v530_v16  ;;  %v9099_v39 = vsel %vm491_vm2, %v468_v29, %v469_v36  ;;  %v459_v53 = vld [vmem:[%s8936_s17 + $0xa0] sm:$0xff]  ;;  %s8804_s17 = smov [#allocation2]  }
  0x30   : > { %v8456_v41 = vpack.i.bf16 %v547_v21, %v548_v24  ;;  %v545_v44 = vsel %vm538_vm1, %v530_v16, %v531_v20  ;;  %v9110_v46 = vsel %vm491_vm2, %v467_v27, %v468_v29  ;;  %v470_v47 = vrot.slane %v8957_v11, 7  ;;  %s8739_s0 = sshll.u32 %s8804_s17, 4  ;;  %s8740_s0 = int_to_ptr.vmem [resolvable:$false] %s8739_s0 }
  0x31   : > { %8422 = vrot.lane.b32.xlu1 %v8421_v57, %s8800_s21  ;;  %v484_v48 = vrot.slane %v457_v45, 7  ;;  %v9121_v7 = vsel %vm491_vm2, %v466_v28, %v467_v27  ;;  %v9127_v29 = vsel %vm491_vm2, %v488_v30, %v466_v28  ;;  %v474_v11 = vrot.slane %v8983_v23, 7  ;;  %s8741_s30 = scalar_lea.vmem %s8740_s0, 32 }
  0x32   : > { %8427 = vrot.lane.b32.xlu0 %v8426_v58, %s8799_s20  ;;  %v9135_v6 = vsel %vm491_vm2, %v470_v47, %v471_v37  ;;  %v9141_v27 = vsel %vm491_vm2, %v469_v36, %v470_v47  ;;  %v9147_v28 = vsel %vm491_vm2, %v472_v52, %v473_v43  ;;  %v9153_v23 = vsel %vm491_vm2, %v471_v37, %v472_v52 }
  0x33   : > { %v9157_v50 = vsel %vm491_vm2, %v474_v11, %v475_v54  ;;  %v9163_v10 = vsel %vm491_vm2, %v473_v43, %v474_v11  ;;  %v9169_v36 = vsel %vm491_vm2, %v476_v3, %v477_v59  ;;  %v9173_v12 = vsel %vm491_vm2, %v475_v54, %v476_v3 }
  0x34   : > { %v478_v37 = vrot.slane %v9015_v42, 7  ;;  %v9178_v51 = vsel %vm491_vm2, %v480_v19, %v481_v15  ;;  %v9182_v22 = vsel %vm491_vm2, %v479_v4, %v480_v19  ;;  %v482_v43 = vrot.slane %v9042_v56, 7 }
  0x35   : > { %8432 = vrot.lane.b32.xlu1 %v8431_v9, %s8799_s20  ;;  %v533_v52 = vrot.slane %v457_v45, 1  ;;  %v487_v54 = vrot.slane %v460_v49, 7  ;;  %v9190_v42 = vsel %vm491_vm2, %v484_v48, %v485_v33  ;;  %v9194_v55 = vsel %vm491_vm2, %v483_v25, %v484_v48 }
  0x36   : > { %8437 = vrot.lane.b32.xlu0 %v8436_v17, %s8800_s21  ;;  %v9198_v57 = vsel %vm491_vm2, %v478_v37, %v479_v4  ;;  %v9204_v58 = vsel %vm491_vm2, %v477_v59, %v478_v37  ;;  %v9208_v60 = vsel %vm491_vm2, %v482_v43, %v483_v25  ;;  %v9212_v61 = vsel %vm491_vm2, %v481_v15, %v482_v43 }
  0x37   : > { %v8461_v62 = vpack.i.bf16 %v545_v44, %v546_v38  ;;  %v8466_v40 = vpack.i.bf16 %v9057_v1, %v9042_v56  ;;  %v534_v63 = vrot.slane %v9082_v26, 1  ;;  %v543_v59 = vsel %vm538_vm1, %v532_v32, %v533_v52 }
  0x38   : > { %v544_v0 = vsel %vm538_vm1, %v531_v20, %v532_v32  ;;  %v535_v3 = vrot.slane %v459_v53, 1  ;;  %v486_v4 = vrot.slane %v459_v53, 7  ;;  %v9225_v9 = vsel %vm491_vm2, %v487_v54, %v488_v30 }
  0x39   : > { %8442 = vrot.lane.b32.xlu1 %v8441_v34, %s8800_s21  ;;  %v8471_v1 = vpack.i.bf16 %v9082_v26, %v457_v45  ;;  %v8476_v15 = vpack.i.bf16 %v543_v59, %v544_v0  ;;  %v536_v16 = vrot.slane %v460_v49, 1  ;;  %v537_v17 = vrot.slane %v9062_v8, 1 }
  0x3a   : > { %8447 = vrot.lane.b32.xlu0 %v8446_v31, %s8799_s20  ;;  %v9229_v14 = vsel %vm491_vm2, %v486_v4, %v487_v54  ;;  %v9233_v56 = vsel %vm491_vm2, %v485_v33, %v486_v4  ;;  %v541_v18 = vsel %vm538_vm1, %v534_v63, %v535_v3  ;;  %v542_v19 = vsel %vm538_vm1, %v533_v52, %v534_v63 }
  0x3b   : > { %v8481_v20 = vpack.i.bf16 %v541_v18, %v542_v19  ;;  %v8486_v21 = vpack.i.bf16 %v460_v49, %v459_v53  ;;  %v539_v24 = vsel %vm538_vm1, %v536_v16, %v537_v17  ;;  %v540_v25 = vsel %vm538_vm1, %v535_v3, %v536_v16 }
  0x3c   : > { %v8491_v26 = vpack.i.bf16 %v539_v24, %v540_v25  ;;  %v561_v30 = vsel %vm538_vm1, %v537_v17, %v515_v13  ;;  %vm8803_vm1 = vmmov 0   ;;  %vm3854_vm2 = vsmask.f32 5376 }
  0x3d   : > { %8452 = vrot.lane.b32.xlu1 %v8451_v35, %s8799_s20 }
  0x3e   : > { %8457 = vrot.lane.b32.xlu0 %v8456_v41, %s8800_s21 }
  0x41   : > { %8462 = vrot.lane.b32.xlu1 %v8461_v62, %s8800_s21 }
  0x42   : > { %8467 = vrot.lane.b32.xlu0 %v8466_v40, %s8799_s20 }
  0x45   : > { %8472 = vrot.lane.b32.xlu1 %v8471_v1, %s8799_s20 }
  0x46   : > { %8477 = vrot.lane.b32.xlu0 %v8476_v15, %s8800_s21 }
  0x49   : > { %8482 = vrot.lane.b32.xlu1 %v8481_v20, %s8800_s21 }
  0x4a   : > { %8487 = vrot.lane.b32.xlu0 %v8486_v21, %s8799_s20 }
  0x4d   : > { %629 = vrot.lane.b32.xlu1 %v9062_v8, %s8799_s20  ;;  %s431_s20 = sand.u32 1, %s8789_s26  }
  0x4e   : > { %8492 = vrot.lane.b32.xlu0 %v8491_v26, %s8800_s21  ;;  %s432_s23 = scalar_lea.vmem [#allocation2], %s431_s20 }
  0x4f   : > { %s7124_s24 = sshll.u32 %s432_s23, 4  ;;  %s11702_s24 = int_to_ptr.vmem [resolvable:$true] %s7124_s24 }
  0x50   : > { %s8735_s29 = scalar_lea.vmem %s11702_s24, 16  ;;  %p8742_p0 = scmp.lt.s32.totalorder %s11702_s24, %s8740_s0 }
  0x51   : > { %721 = vrot.lane.b32.xlu1 %v561_v30, %s8800_s21  ;;  %s7112_s21 = scalar_lea.sflag [#allocation3], %s431_s20  ;;  %p8736_p11 = scmp.ne.s32.totalorder %s11702_s24, %s8735_s29 }
  0x52   : > { %p8743_p1 = scmp.lt.s32.totalorder %s8741_s30, %s8735_s29 }
  0x53   : > { %p8737_p12 = pnand %p8736_p11, %p8913_p5 }
  0x54   : > { %p8744_p2 = por %p8743_p1, %p8742_p0 }
  0x55   : > { %p8738_p13 = pneg %p8737_p12 }
  0x57   : > { %p8745_p3 = pnand %p8744_p2, %p8738_p13 }
  0x94   : > { %v8388_v31 = vpop.permute.xlu0 %8387 }
  0x95   : > { %v8390_v32 = vunpack.i.h.bf16 %v8388_v31  ;;  %v8389_v33 = vunpack.i.l.bf16 %v8388_v31 }
  0x97   : > { %v8403_v34 = vpop.permute.xlu1 %8402  ;;  %v747_v8 = vsel %vm746_vm3, %v9127_v29, %v8389_v33  ;;  %v748_v38 = vsel %vm746_vm3, %v9121_v7, %v8390_v32 }
  0x98   : > { %v8393_v35 = vpop.permute.xlu0 %8392  ;;  %v8405_v5 = vunpack.i.h.bf16 %v8403_v34  ;;  %v8404_v41 = vunpack.i.l.bf16 %v8403_v34 }
  0x99   : > { %v8395_v44 = vunpack.i.h.bf16 %v8393_v35  ;;  %v8394_v13 = vunpack.i.l.bf16 %v8393_v35 }
  0x9a   : > { %v771_v45 = vsel %vm770_vm4, %v747_v8, %v8404_v41  ;;  %v772_v47 = vsel %vm770_vm4, %v748_v38, %v8405_v5 }
  0x9b   : > { %v750_v48 = vsel %vm746_vm3, %v9099_v39, %v8395_v44  ;;  %v749_v11 = vsel %vm746_vm3, %v9110_v46, %v8394_v13  ;;  %v8408_v49 = vpop.permute.xlu1 %8407  ;;  %v794_v29 = vpack.c.bf16 %v772_v47, %v771_v45 }
  0x9c   : > { %v8398_v37 = vpop.permute.xlu0 %8397  ;;  %v8410_v43 = vunpack.i.h.bf16 %v8408_v49  ;;  %v8409_v52 = vunpack.i.l.bf16 %v8408_v49 }
  0x9d   : > { %v8400_v7 = vunpack.i.h.bf16 %v8398_v37  ;;  %v8399_v53 = vunpack.i.l.bf16 %v8398_v37  ;;  %7784 = vmatprep.mubr.msk.bf16.mxu0 %vm821_vm5, %v794_v29 }
  0x9e   : > { %v774_v54 = vsel %vm770_vm4, %v750_v48, %v8410_v43  ;;  %v773_v62 = vsel %vm770_vm4, %v749_v11, %v8409_v52 }
  0x9f   : > { %v795_v40 = vpack.c.bf16 %v774_v54, %v773_v62  ;;  %v752_v39 = vsel %vm746_vm3, %v9135_v6, %v8400_v7  ;;  %v751_v46 = vsel %vm746_vm3, %v9141_v27, %v8399_v53  ;;  %v8413_v63 = vpop.permute.xlu1 %8412 }
  0xa0   : > { %v8418_v59 = vpop.permute.xlu0 %8417  ;;  %v8415_v4 = vunpack.i.h.bf16 %v8413_v63  ;;  %v8414_v1 = vunpack.i.l.bf16 %v8413_v63 }
  0xa1   : > { %v8420_v0 = vunpack.i.h.bf16 %v8418_v59  ;;  %v8419_v3 = vunpack.i.l.bf16 %v8418_v59  ;;  %7785 = vmatmul.mubr.msk.bf16.vlgmr.msra.gmra.mrb[0].mxu0 %vm821_vm5, %v795_v40 }
  0xa2   : > { %v754_v27 = vsel %vm746_vm3, %v9147_v28, %v8415_v4  ;;  %v753_v25 = vsel %vm746_vm3, %v9153_v23, %v8414_v1 }
  0xa3   : > { %v775_v15 = vsel %vm770_vm4, %v751_v46, %v8419_v3  ;;  %v776_v16 = vsel %vm770_vm4, %v752_v39, %v8420_v0  ;;  %v8423_v18 = vpop.permute.xlu1 %8422 }
  0xa4   : > { %v796_v17 = vpack.c.bf16 %v776_v16, %v775_v15  ;;  %v8428_v19 = vpop.permute.xlu0 %8427  ;;  %v8425_v20 = vunpack.i.h.bf16 %v8423_v18  ;;  %v8424_v6 = vunpack.i.l.bf16 %v8423_v18 }
  0xa5   : > { %v8430_v21 = vunpack.i.h.bf16 %v8428_v19  ;;  %v8429_v24 = vunpack.i.l.bf16 %v8428_v19 }
  0xa6   : > { %7788 = vmatprep.mubr.msk.bf16.mxu0 %vm821_vm5, %v796_v17  ;;  %v777_v26 = vsel %vm770_vm4, %v753_v25, %v8424_v6  ;;  %v778_v30 = vsel %vm770_vm4, %v754_v27, %v8425_v20 }
  0xa7   : > { %v797_v31 = vpack.c.bf16 %v778_v30, %v777_v26  ;;  %v756_v32 = vsel %vm746_vm3, %v9157_v50, %v8430_v21  ;;  %v755_v33 = vsel %vm746_vm3, %v9163_v10, %v8429_v24  ;;  %v8433_v34 = vpop.permute.xlu1 %8432 }
  0xa8   : > { %v8438_v35 = vpop.permute.xlu0 %8437  ;;  %v8435_v38 = vunpack.i.h.bf16 %v8433_v34  ;;  %v8434_v5 = vunpack.i.l.bf16 %v8433_v34 }
  0xa9   : > { %v8440_v8 = vunpack.i.h.bf16 %v8438_v35  ;;  %v8439_v28 = vunpack.i.l.bf16 %v8438_v35  ;;  %7789 = vmatmul.mubr.msk.bf16.gmra.mrb[4].mxu0 %vm821_vm5, %v797_v31 }
  0xaa   : > { %v758_v10 = vsel %vm746_vm3, %v9169_v36, %v8435_v38  ;;  %v757_v49 = vsel %vm746_vm3, %v9173_v12, %v8434_v5 }
  0xab   : > { %v779_v23 = vsel %vm770_vm4, %v755_v33, %v8439_v28  ;;  %v780_v41 = vsel %vm770_vm4, %v756_v32, %v8440_v8  ;;  %v8443_v13 = vpop.permute.xlu1 %8442 }
  0xac   : > { %v798_v44 = vpack.c.bf16 %v780_v41, %v779_v23  ;;  %v8448_v45 = vpop.permute.xlu0 %8447  ;;  %v8445_v47 = vunpack.i.h.bf16 %v8443_v13  ;;  %v8444_v50 = vunpack.i.l.bf16 %v8443_v13 }
  0xad   : > { %v8450_v48 = vunpack.i.h.bf16 %v8448_v45  ;;  %v8449_v11 = vunpack.i.l.bf16 %v8448_v45 }
  0xae   : > { %7792 = vmatprep.mubr.msk.bf16.mxu0 %vm821_vm5, %v798_v44  ;;  %v781_v37 = vsel %vm770_vm4, %v757_v49, %v8444_v50  ;;  %v782_v29 = vsel %vm770_vm4, %v758_v10, %v8445_v47  ;;  %v8498_v10 = vld [vmem:[%s11745_s3 + $0x80] sm:$0xff]  }
  0xaf   : > { %v799_v43 = vpack.c.bf16 %v782_v29, %v781_v37  ;;  %v760_v52 = vsel %vm746_vm3, %v9198_v57, %v8450_v48  ;;  %v759_v7 = vsel %vm746_vm3, %v9204_v58, %v8449_v11  ;;  %v8453_v53 = vpop.permute.xlu1 %8452  ;;  %7808 = vmatprep.subr.bf16.mxu0 %v8498_v10  ;;  %v9346_v29 = vld [vmem:[%s11744_s2] ss:$0 sm:$0xff] }
  0xb0   : > { %v8458_v54 = vpop.permute.xlu0 %8457  ;;  %v8455_v40 = vunpack.i.h.bf16 %v8453_v53  ;;  %v8454_v39 = vunpack.i.l.bf16 %v8453_v53  ;;  %7809 = vmatpush3.bf16.msra.mxu0 %v8498_v10 }
  0xb1   : > { %v8460_v62 = vunpack.i.h.bf16 %v8458_v54  ;;  %v8459_v36 = vunpack.i.l.bf16 %v8458_v54  ;;  %7793 = vmatmul.mubr.msk.bf16.gmra.mrb[8].mxu0 %vm821_vm5, %v799_v43 }
  0xb2   : > { %v762_v58 = vsel %vm746_vm3, %v9178_v51, %v8455_v40  ;;  %v761_v15 = vsel %vm746_vm3, %v9182_v22, %v8454_v39 }
  0xb3   : > { %v783_v12 = vsel %vm770_vm4, %v759_v7, %v8459_v36  ;;  %v784_v46 = vsel %vm770_vm4, %v760_v52, %v8460_v62  ;;  %v8463_v59 = vpop.permute.xlu1 %8462 }
  0xb4   : > { %v800_v63 = vpack.c.bf16 %v784_v46, %v783_v12  ;;  %v8468_v0 = vpop.permute.xlu0 %8467  ;;  %v8465_v3 = vunpack.i.h.bf16 %v8463_v59  ;;  %v8464_v57 = vunpack.i.l.bf16 %v8463_v59 }
  0xb5   : > { %v8470_v4 = vunpack.i.h.bf16 %v8468_v0  ;;  %v8469_v1 = vunpack.i.l.bf16 %v8468_v0 }
  0xb6   : > { %7796 = vmatprep.mubr.msk.bf16.mxu0 %vm821_vm5, %v800_v63  ;;  %v785_v16 = vsel %vm770_vm4, %v761_v15, %v8464_v57  ;;  %v786_v17 = vsel %vm770_vm4, %v762_v58, %v8465_v3 }
  0xb7   : > { %v801_v18 = vpack.c.bf16 %v786_v17, %v785_v16  ;;  %v764_v19 = vsel %vm746_vm3, %v9208_v60, %v8470_v4  ;;  %v763_v20 = vsel %vm746_vm3, %v9212_v61, %v8469_v1  ;;  %v8473_v6 = vpop.permute.xlu1 %8472 }
  0xb8   : > { %v8478_v21 = vpop.permute.xlu0 %8477  ;;  %v8475_v27 = vunpack.i.h.bf16 %v8473_v6  ;;  %v8474_v25 = vunpack.i.l.bf16 %v8473_v6 }
  0xb9   : > { %v8480_v24 = vunpack.i.h.bf16 %v8478_v21  ;;  %v8479_v51 = vunpack.i.l.bf16 %v8478_v21  ;;  %7797 = vmatmul.mubr.msk.bf16.gmra.mrb[12].mxu0 %vm821_vm5, %v801_v18 }
  0xba   : > { %v766_v61 = vsel %vm746_vm3, %v9190_v42, %v8475_v27  ;;  %v765_v8 = vsel %vm746_vm3, %v9194_v55, %v8474_v25 }
  0xbb   : > { %v787_v22 = vsel %vm770_vm4, %v763_v20, %v8479_v51  ;;  %v788_v26 = vsel %vm770_vm4, %v764_v19, %v8480_v24  ;;  %v8483_v31 = vpop.permute.xlu1 %8482 }
  0xbc   : > { %v802_v30 = vpack.c.bf16 %v788_v26, %v787_v22  ;;  %v8488_v32 = vpop.permute.xlu0 %8487  ;;  %v8485_v33 = vunpack.i.h.bf16 %v8483_v31  ;;  %v8484_v60 = vunpack.i.l.bf16 %v8483_v31 }
  0xbd   : > { %v8490_v34 = vunpack.i.h.bf16 %v8488_v32  ;;  %v8489_v35 = vunpack.i.l.bf16 %v8488_v32 }
  0xbe   : > { %7800 = vmatprep.mubr.msk.bf16.mxu0 %vm821_vm5, %v802_v30  ;;  %v789_v28 = vsel %vm770_vm4, %v765_v8, %v8484_v60  ;;  %v790_v38 = vsel %vm770_vm4, %v766_v61, %v8485_v33 }
  0xbf   : > { %v803_v5 = vpack.c.bf16 %v790_v38, %v789_v28  ;;  %v768_v23 = vsel %vm746_vm3, %v9229_v14, %v8490_v34  ;;  %v767_v41 = vsel %vm746_vm3, %v9233_v56, %v8489_v35  ;;  %v630_v44 = vpop.permute.xlu1 %629 }
  0xc0   : > { %v8493_v13 = vpop.permute.xlu0 %8492  ;;  %v769_v55 = vsel %vm746_vm3, %v9225_v9, %v630_v44  ;;  %v8801_v9 = vmov 1983009808   ;;  %vm3758_vm3 = vcmask 1047558  }
  0xc1   : > { %v8495_v45 = vunpack.i.h.bf16 %v8493_v13  ;;  %v8494_v42 = vunpack.i.l.bf16 %v8493_v13  ;;  %7801 = vmatmul.mubr.msk.bf16.gmra.mrb[16].mxu0 %vm821_vm5, %v803_v5  ;;  %v1015_v49 = vunpack.c.l.s4 %v8801_v9 }
  0xc3   : > { %v791_v47 = vsel %vm770_vm4, %v767_v41, %v8494_v42  ;;  %v792_v50 = vsel %vm770_vm4, %v768_v23, %v8495_v45  ;;  %v722_v11 = vpop.permute.xlu1 %721  ;;  %v1016_v37 = vunpack.c.0.s8 %v1015_v49 }
  0xc4   : > { %v804_v48 = vpack.c.bf16 %v792_v50, %v791_v47  ;;  %v793_v14 = vsel %vm770_vm4, %v769_v55, %v722_v11  ;;  %v8499_v55 = vld [vmem:[%s11745_s3 + $0x88] sm:$0xff]  }
  0xc5   : > { %v805_v56 = vpack.c.bf16 %v793_v14, %v793_v14  ;;  %v9349_v43 = vsub.s32 %v1016_v37, %v8928_v2  ;;  %7810 = vmatprep.subr.bf16.mxu0 %v8499_v55 }
  0xc6   : > { %7804 = vmatprep.mubr.msk.bf16.mxu0 %vm821_vm5, %v804_v48  ;;  %7811 = vmatpush3.bf16.msra.mxu0 %v8499_v55 }
  0xc7   : > { %11793 = vst [vmem:[#allocation6_spill] sm:$0xff] %v9349_v43 }
  0xc9   : > { %7805 = vmatmul.mubr.msk.bf16.gmra.mrb[20].mxu0 %vm821_vm5, %v805_v56  ;;  %vm7002_vm5 = vcmask 261120  }
 0x174   : > { %v7786_v52 = vpop.f32.mrb[0].mxu0 }
 0x175   : > { %v905_v7 = vadd.f32 %v7786_v52, %v9346_v29  ;;  %v896_v53 = vpop.f32.mrb[1].mxu0 }
 0x176   : > { %v897_v54 = vadd.f32 %v9346_v29, %v896_v53  ;;  %v7787_v62 = vpop.f32.mrb[2].mxu0 }
 0x177   : > { %v1047_v36 = vcombine.high %v905_v7, %v905_v7  ;;  %v1054_v40 = vrot.slane %v905_v7, %v9349_v43  ;;  %v899_v39 = vpop.f32.mrb[3].mxu0  ;;  %v9356_v63 = vadd.f32 %v7787_v62, %v9346_v29 }
 0x178   : > { %v1013_v12 = vcombine.high %v897_v54, %v897_v54  ;;  %v1020_v46 = vrot.slane %v897_v54, %v9349_v43  ;;  %v9361_v3 = vadd.f32 %v9346_v29, %v899_v39 }
 0x179   : > { %v1061_v2 = vrot.slane %v1047_v36, %v9349_v43  ;;  %v1062_v59 = vcombine.high %v1054_v40, %v1054_v40  ;;  %v1553_v0 = vsel %vm1496_vm6, %v1054_v40, -inf  ;;  %v1064_v9 = vcombine.high %v9356_v63, %v9356_v63 }
 0x17a   : > { %v1554_v57 = vrot.slane %v1553_v0, 4  ;;  %v1027_v4 = vrot.slane %v1013_v12, %v9349_v43  ;;  %v1028_v1 = vcombine.high %v1020_v46, %v1020_v46  ;;  %v1497_v58 = vsel %vm1496_vm6, %v1020_v46, -inf }
 0x17b   : > { %v1063_v15 = vcombine.high %v1061_v2, %v1061_v2  ;;  %v1560_v16 = vsel %vm1496_vm6, %v1062_v59, -inf  ;;  %v1567_v17 = vsel %vm1496_vm6, %v1061_v2, -inf  ;;  %v1498_v18 = vrot.slane %v1497_v58, 4 }
 0x17c   : > { %v1555_v19 = vmax.f32 %v1553_v0, %v1554_v57  ;;  %v1561_v20 = vrot.slane %v1560_v16, 4  ;;  %v1568_v6 = vrot.slane %v1567_v17, 4  ;;  %v1029_v21 = vcombine.high %v1027_v4, %v1027_v4  ;;  %v9367_v24 = vpop.f32.mrb[4].mxu0 }
 0x17d   : > { %v1574_v51 = vsel %vm1496_vm6, %v1063_v15, -inf  ;;  %v1499_v27 = vmax.f32 %v1497_v58, %v1498_v18  ;;  %v1504_v25 = vsel %vm1496_vm6, %v1028_v1, -inf  ;;  %v1511_v22 = vsel %vm1496_vm6, %v1027_v4, -inf  ;;  %v9372_v26 = vpop.f32.mrb[5].mxu0 }
 0x17e   : > { %v1556_v30 = vrot.slane %v1555_v19, 2  ;;  %v1562_v31 = vmax.f32 %v1560_v16, %v1561_v20  ;;  %v1569_v32 = vmax.f32 %v1567_v17, %v1568_v6  ;;  %v1575_v33 = vrot.slane %v1574_v51, 4  ;;  %v9374_v60 = vpop.f32.mrb[6].mxu0 }
 0x17f   : > { %v1500_v34 = vrot.slane %v1499_v27, 2  ;;  %v1505_v35 = vrot.slane %v1504_v25, 4  ;;  %v1512_v61 = vrot.slane %v1511_v22, 4  ;;  %v1518_v8 = vsel %vm1496_vm6, %v1029_v21, -inf  ;;  %v9377_v28 = vpop.f32.mrb[7].mxu0 }
 0x180   : > { %v1557_v38 = vmax.f32 %v1555_v19, %v1556_v30  ;;  %v1563_v5 = vrot.slane %v1562_v31, 2  ;;  %v1570_v23 = vrot.slane %v1569_v32, 2  ;;  %v1576_v41 = vmax.f32 %v1574_v51, %v1575_v33  ;;  %v8500_v30 = vld [vmem:[%s11745_s3 + $0x90] sm:$0xff]  }
 0x181   : > { %v1501_v44 = vmax.f32 %v1499_v27, %v1500_v34  ;;  %v1506_v13 = vmax.f32 %v1504_v25, %v1505_v35  ;;  %v1513_v45 = vmax.f32 %v1511_v22, %v1512_v61  ;;  %v1519_v42 = vrot.slane %v1518_v8, 4  ;;  %7812 = vmatprep.subr.bf16.mxu0 %v8500_v30 }
 0x182   : > { %v1558_v47 = vrot.slane %v1557_v38, 1  ;;  %v1564_v50 = vmax.f32 %v1562_v31, %v1563_v5  ;;  %v1571_v48 = vmax.f32 %v1569_v32, %v1570_v23  ;;  %v1577_v11 = vrot.slane %v1576_v41, 2  ;;  %7813 = vmatpush3.bf16.msra.mxu0 %v8500_v30 }
 0x183   : > { %v1507_v14 = vrot.slane %v1506_v13, 2  ;;  %v1514_v56 = vrot.slane %v1513_v45, 2  ;;  %v1520_v10 = vmax.f32 %v1518_v8, %v1519_v42  ;;  %v1502_v7 = vrot.slane %v1501_v44, 1 }
 0x184   : > { %v1565_v49 = vrot.slane %v1564_v50, 1  ;;  %v1572_v37 = vrot.slane %v1571_v48, 1  ;;  %v1578_v52 = vmax.f32 %v1576_v41, %v1577_v11  ;;  %v9384_v53 = vpop.f32.mrb[8].mxu0  ;;  %v9386_v54 = vmax.f32 %v1557_v38, %v1558_v47 }
 0x185   : > { %v1508_v62 = vmax.f32 %v1506_v13, %v1507_v14  ;;  %v1515_v36 = vmax.f32 %v1513_v45, %v1514_v56  ;;  %v1521_v40 = vrot.slane %v1520_v10, 2  ;;  %v9388_v39 = vpop.f32.mrb[9].mxu0  ;;  %v1071_v59 = vrot.slane %v9356_v63, %v9349_v43 }
 0x186   : > { %v9390_v12 = vmax.f32 %v1564_v50, %v1565_v49  ;;  %v9392_v46 = vmax.f32 %v1571_v48, %v1572_v37  ;;  %v1579_v2 = vrot.slane %v1578_v52, 1  ;;  %v9396_v0 = vpop.f32.mrb[10].mxu0  ;;  %v1078_v58 = vrot.slane %v1064_v9, %v9349_v43 }
 0x187   : > { %v1509_v57 = vrot.slane %v1508_v62, 1  ;;  %v1516_v4 = vrot.slane %v1515_v36, 1  ;;  %v1522_v1 = vmax.f32 %v1520_v10, %v1521_v40  ;;  %v9399_v15 = vpop.f32.mrb[11].mxu0  ;;  %v1503_v17 = vmax.f32 %v1501_v44, %v1502_v7 }
 0x188   : > { %v2296_v16 = vsel %vm2282_vm7, %v9390_v12, %v9386_v54  ;;  %v1079_v18 = vcombine.high %v1071_v59, %v1071_v59  ;;  %v1581_v19 = vsel %vm1496_vm6, %v1071_v59, -inf  ;;  %v9405_v20 = vmax.f32 %v1578_v52, %v1579_v2 }
 0x189   : > { %v1510_v63 = vmax.f32 %v1508_v62, %v1509_v57  ;;  %v9407_v6 = vmax.f32 %v1515_v36, %v1516_v4  ;;  %v1523_v21 = vrot.slane %v1522_v1, 1  ;;  %v1080_v51 = vcombine.high %v1078_v58, %v1078_v58 }
 0x18a   : > { %v1582_v27 = vrot.slane %v1581_v19, 4  ;;  %v1588_v25 = vsel %vm1496_vm6, %v1079_v18, -inf  ;;  %v1595_v22 = vsel %vm1496_vm6, %v1078_v58, -inf  ;;  %v2297_v31 = vsel %vm2284_vm8, %v9392_v46, %v2296_v16 }
 0x18b   : > { %v9416_v32 = vmax.f32 %v1522_v1, %v1523_v21  ;;  %v2283_v33 = vsel %vm2282_vm7, %v1510_v63, %v1503_v17  ;;  %v1589_v34 = vrot.slane %v1588_v25, 4  ;;  %v9420_v35 = vsel %vm2288_vm9, %v1510_v63, %v1503_v17 }
 0x18c   : > { %v1583_v61 = vmax.f32 %v1581_v19, %v1582_v27  ;;  %v1596_v8 = vrot.slane %v1595_v22, 4  ;;  %v1602_v38 = vsel %vm1496_vm6, %v1080_v51, -inf  ;;  %v9423_v5 = vpop.f32.mrb[12].mxu0  ;;  %v2285_v23 = vsel %vm2284_vm8, %v9407_v6, %v2283_v33 }
 0x18d   : > { %v1590_v41 = vmax.f32 %v1588_v25, %v1589_v34  ;;  %v1603_v44 = vrot.slane %v1602_v38, 4  ;;  %v1030_v13 = vcombine.high %v9361_v3, %v9361_v3  ;;  %v9429_v45 = vpop.f32.mrb[13].mxu0  ;;  %v2298_v47 = vsel %vm2286_vm10, %v9405_v20, %v2297_v31 }
 0x18e   : > { %v1584_v42 = vrot.slane %v1583_v61, 2  ;;  %v1597_v55 = vmax.f32 %v1595_v22, %v1596_v8  ;;  %v1037_v50 = vrot.slane %v9361_v3, %v9349_v43  ;;  %v9435_v48 = vpop.f32.mrb[14].mxu0  ;;  %v921_v10 = vadd.f32 %v9367_v24, %v9346_v29 }
 0x18f   : > { %v1591_v11 = vrot.slane %v1590_v41, 2  ;;  %v1604_v14 = vmax.f32 %v1602_v38, %v1603_v44  ;;  %v1044_v56 = vrot.slane %v1030_v13, %v9349_v43  ;;  %v9440_v9 = vpop.f32.mrb[15].mxu0  ;;  %v2287_v13 = vsel %vm2286_vm10, %v9416_v32, %v2285_v23 }
 0x190   : > { %v1585_v49 = vmax.f32 %v1583_v61, %v1584_v42  ;;  %v1598_v37 = vrot.slane %v1597_v55, 2  ;;  %v1045_v52 = vcombine.high %v1037_v50, %v1037_v50  ;;  %v1525_v7 = vsel %vm1496_vm6, %v1037_v50, -inf }
 0x191   : > { %v1592_v62 = vmax.f32 %v1590_v41, %v1591_v11  ;;  %v1605_v36 = vrot.slane %v1604_v14, 2  ;;  %v1046_v3 = vcombine.high %v1044_v56, %v1044_v56  ;;  %v1526_v40 = vrot.slane %v1525_v7, 4 }
 0x192   : > { %v1586_v2 = vrot.slane %v1585_v49, 1  ;;  %v1599_v59 = vmax.f32 %v1597_v55, %v1598_v37  ;;  %v1532_v57 = vsel %vm1496_vm6, %v1045_v52, -inf  ;;  %v1539_v4 = vsel %vm1496_vm6, %v1044_v56, -inf }
 0x193   : > { %v1593_v1 = vrot.slane %v1592_v62, 1  ;;  %v1606_v58 = vmax.f32 %v1604_v14, %v1605_v36  ;;  %v1527_v24 = vmax.f32 %v1525_v7, %v1526_v40  ;;  %v1533_v16 = vrot.slane %v1532_v57, 4 }
 0x194   : > { %v9445_v17 = vmax.f32 %v1585_v49, %v1586_v2  ;;  %v1600_v18 = vrot.slane %v1599_v59, 1  ;;  %v1540_v19 = vrot.slane %v1539_v4, 4  ;;  %v1546_v63 = vsel %vm1496_vm6, %v1046_v3, -inf  ;;  %v9448_v21 = vpop.f32.mrb[16].mxu0 }
 0x195   : > { %v1594_v51 = vmax.f32 %v1592_v62, %v1593_v1  ;;  %v1607_v27 = vrot.slane %v1606_v58, 1  ;;  %v1528_v25 = vrot.slane %v1527_v24, 2  ;;  %v1534_v22 = vmax.f32 %v1532_v57, %v1533_v16  ;;  %v9450_v30 = vpop.f32.mrb[17].mxu0 }
 0x196   : > { %v1601_v31 = vmax.f32 %v1599_v59, %v1600_v18  ;;  %v2299_v33 = vsel %vm2288_vm9, %v9445_v17, %v2298_v47  ;;  %v1541_v34 = vmax.f32 %v1539_v4, %v1540_v19  ;;  %v1547_v61 = vrot.slane %v1546_v63, 4  ;;  %v9454_v8 = vpop.f32.mrb[18].mxu0 }
 0x197   : > { %v2300_v38 = vsel %vm2290_vm11, %v1594_v51, %v2299_v33  ;;  %v1529_v41 = vmax.f32 %v1527_v24, %v1528_v25  ;;  %v1535_v44 = vrot.slane %v1534_v22, 2  ;;  %v9459_v42 = vmax.f32 %v1606_v58, %v1607_v27 }
 0x198   : > { %v9462_v55 = vsel %vm2292_vm12, %v1601_v31, %v2300_v38  ;;  %v1542_v50 = vrot.slane %v1541_v34, 2  ;;  %v1548_v11 = vmax.f32 %v1546_v63, %v1547_v61  ;;  %v1115_v56 = vcombine.high %v921_v10, %v921_v10 }
 0x199   : > { %11794 = vst [vmem:[#allocation7_spill] sm:$0xff] %v9459_v42  ;;  %11795 = vst [vmem:[#allocation8_spill] sm:$0xff] %v9462_v55  ;;  %v1530_v14 = vrot.slane %v1529_v41, 1  ;;  %v1536_v47 = vmax.f32 %v1534_v22, %v1535_v44  ;;  %v1122_v49 = vrot.slane %v921_v10, %v9349_v43  ;;  %v2417_v37 = vsel %vm2282_vm7, %v1601_v31, %v1594_v51  ;;  %v9481_v22 = vpop.f32.mrb[19].mxu0 }
 0x19a   : > { %v1543_v52 = vmax.f32 %v1541_v34, %v1542_v50  ;;  %v1549_v7 = vrot.slane %v1548_v11, 2  ;;  %v913_v62 = vadd.f32 %v9346_v29, %v9372_v26  ;;  %v1129_v3 = vrot.slane %v1115_v56, %v9349_v43 }
 0x19b   : > { %v9468_v23 = vmax.f32 %v1529_v41, %v1530_v14  ;;  %v1537_v36 = vrot.slane %v1536_v47, 1  ;;  %v1130_v40 = vcombine.high %v1122_v49, %v1122_v49  ;;  %v1665_v57 = vsel %vm1496_vm6, %v1122_v49, -inf }
 0x19c   : > { %v1544_v2 = vrot.slane %v1543_v52, 1  ;;  %v1550_v59 = vmax.f32 %v1548_v11, %v1549_v7  ;;  %v1081_v4 = vcombine.high %v913_v62, %v913_v62  ;;  %v1131_v58 = vcombine.high %v1129_v3, %v1129_v3 }
 0x19d   : > { %v1538_v1 = vmax.f32 %v1536_v47, %v1537_v36  ;;  %v2289_v10 = vsel %vm2288_vm9, %v9468_v23, %v2287_v13  ;;  %v1666_v24 = vrot.slane %v1665_v57, 4  ;;  %v1672_v18 = vsel %vm1496_vm6, %v1130_v40, -inf }
 0x19e   : > { %v9474_v16 = vmax.f32 %v1543_v52, %v1544_v2  ;;  %v1551_v26 = vrot.slane %v1550_v59, 1  ;;  %v1679_v19 = vsel %vm1496_vm6, %v1129_v3, -inf  ;;  %v1673_v27 = vrot.slane %v1672_v18, 4 }
 0x19f   : > { %v9479_v63 = vsel %vm2290_vm11, %v1538_v1, %v2289_v10  ;;  %v1667_v51 = vmax.f32 %v1665_v57, %v1666_v24  ;;  %v1680_v25 = vrot.slane %v1679_v19, 4  ;;  %v1686_v33 = vsel %vm1496_vm6, %v1131_v58, -inf }
 0x1a0   : > { %11796 = vst [vmem:[#allocation9_spill] sm:$0xff] %v9474_v16  ;;  %11797 = vst [vmem:[#allocation10_spill] sm:$0xff] %v9479_v63  ;;  %v9483_v31 = vmax.f32 %v1550_v59, %v1551_v26  ;;  %v1088_v34 = vrot.slane %v913_v62, %v9349_v43  ;;  %v9489_v61 = vsel %vm2284_vm8, %v9459_v42, %v2417_v37  ;;  %v1687_v13 = vrot.slane %v1686_v33, 4 }
 0x1a1   : > { %v1668_v38 = vrot.slane %v1667_v51, 2  ;;  %v1674_v41 = vmax.f32 %v1672_v18, %v1673_v27  ;;  %v1681_v44 = vmax.f32 %v1679_v19, %v1680_v25  ;;  %v9493_v50 = vsel %vm2282_vm7, %v9474_v16, %v1538_v1 }
 0x1a2   : > { %11798 = vst [vmem:[#allocation11_spill] sm:$0xff] %v9483_v31  ;;  %v1095_v11 = vrot.slane %v1081_v4, %v9349_v43  ;;  %v1096_v14 = vcombine.high %v1088_v34, %v1088_v34  ;;  %v1609_v47 = vsel %vm1496_vm6, %v1088_v34, -inf  ;;  %v1688_v7 = vmax.f32 %v1686_v33, %v1687_v13 }
 0x1a3   : > { %v1669_v56 = vmax.f32 %v1667_v51, %v1668_v38  ;;  %v1675_v49 = vrot.slane %v1674_v41, 2  ;;  %v1682_v52 = vrot.slane %v1681_v44, 2  ;;  %v1610_v37 = vrot.slane %v1609_v47, 4 }
 0x1a4   : > { %v1097_v62 = vcombine.high %v1095_v11, %v1095_v11  ;;  %v1616_v36 = vsel %vm1496_vm6, %v1096_v14, -inf  ;;  %v1623_v3 = vsel %vm1496_vm6, %v1095_v11, -inf  ;;  %v1689_v57 = vrot.slane %v1688_v7, 2 }
 0x1a5   : > { %v1670_v40 = vrot.slane %v1669_v56, 1  ;;  %v1676_v2 = vmax.f32 %v1674_v41, %v1675_v49  ;;  %v1683_v59 = vmax.f32 %v1681_v44, %v1682_v52  ;;  %v1611_v1 = vmax.f32 %v1609_v47, %v1610_v37 }
 0x1a6   : > { %v1617_v10 = vrot.slane %v1616_v36, 4  ;;  %v1624_v4 = vrot.slane %v1623_v3, 4  ;;  %v1630_v58 = vsel %vm1496_vm6, %v1097_v62, -inf  ;;  %v1690_v19 = vmax.f32 %v1688_v7, %v1689_v57 }
 0x1a7   : > { %v9500_v24 = vmax.f32 %v1669_v56, %v1670_v40  ;;  %v1677_v26 = vrot.slane %v1676_v2, 1  ;;  %v1684_v18 = vrot.slane %v1683_v59, 1  ;;  %v1612_v51 = vrot.slane %v1611_v1, 2  ;;  %v8501_v56 = vld [vmem:[%s11745_s3 + $0x98] sm:$0xff]  }
 0x1a8   : > { %v1618_v27 = vmax.f32 %v1616_v36, %v1617_v10  ;;  %v1625_v25 = vmax.f32 %v1623_v3, %v1624_v4  ;;  %v1631_v33 = vrot.slane %v1630_v58, 4  ;;  %v1691_v41 = vrot.slane %v1690_v19, 1  ;;  %7814 = vmatprep.subr.bf16.mxu0 %v8501_v56 }
 0x1a9   : > { %v9502_v34 = vmax.f32 %v1676_v2, %v1677_v26  ;;  %v9504_v38 = vmax.f32 %v1683_v59, %v1684_v18  ;;  %v924_v44 = vadd.f32 %v9374_v60, %v9346_v29  ;;  %v1613_v13 = vmax.f32 %v1611_v1, %v1612_v51  ;;  %7815 = vmatpush3.bf16.msra.mxu0 %v8501_v56  ;;  %v8502_v26 = vld [vmem:[%s11745_s3 + $0xa0] sm:$0xff]  }
 0x1aa   : > { %v1619_v11 = vrot.slane %v1618_v27, 2  ;;  %v1626_v14 = vrot.slane %v1625_v25, 2  ;;  %v1632_v47 = vmax.f32 %v1630_v58, %v1631_v33  ;;  %v9511_v49 = vmax.f32 %v1690_v19, %v1691_v41  ;;  %7816 = vmatprep.subr.bf16.mxu0 %v8502_v26 }
 0x1ab   : > { %11799 = vst [vmem:[#allocation12_spill] sm:$0xff] %v9502_v34  ;;  %11800 = vst [vmem:[#allocation13_spill] sm:$0xff] %v9504_v38  ;;  %v2310_v52 = vsel %vm2282_vm7, %v9502_v34, %v9500_v24  ;;  %v1132_v7 = vcombine.high %v924_v44, %v924_v44  ;;  %v1139_v62 = vrot.slane %v924_v44, %v9349_v43  ;;  %v1614_v37 = vrot.slane %v1613_v13, 1 }
 0x1ac   : > { %11801 = vst [vmem:[#allocation14_spill] sm:$0xff] %v9511_v49  ;;  %v2311_v60 = vsel %vm2284_vm8, %v9504_v38, %v2310_v52  ;;  %v1620_v36 = vmax.f32 %v1618_v27, %v1619_v11  ;;  %v1627_v3 = vmax.f32 %v1625_v25, %v1626_v14  ;;  %v1633_v40 = vrot.slane %v1632_v47, 2 }
 0x1ad   : > { %v1146_v2 = vrot.slane %v1132_v7, %v9349_v43  ;;  %v1147_v59 = vcombine.high %v1139_v62, %v1139_v62  ;;  %v1693_v57 = vsel %vm1496_vm6, %v1139_v62, -inf  ;;  %v1615_v1 = vmax.f32 %v1613_v13, %v1614_v37  ;;  %v9530_v13 = vpop.f32.mrb[20].mxu0  ;;  %7817 = vmatpush3.bf16.msra.mxu0 %v8502_v26 }
 0x1ae   : > { %v1621_v10 = vrot.slane %v1620_v36, 1  ;;  %v1628_v4 = vrot.slane %v1627_v3, 1  ;;  %v1694_v58 = vrot.slane %v1693_v57, 4  ;;  %v1634_v18 = vmax.f32 %v1632_v47, %v1633_v40  ;;  %v9533_v52 = vpop.f32.mrb[21].mxu0 }
 0x1af   : > { %v1148_v19 = vcombine.high %v1146_v2, %v1146_v2  ;;  %v1700_v51 = vsel %vm1496_vm6, %v1147_v59, -inf  ;;  %v1707_v27 = vsel %vm1496_vm6, %v1146_v2, -inf  ;;  %v2419_v41 = vsel %vm2286_vm10, %v1615_v1, %v9489_v61  ;;  %v7807_v61 = vpop.f32.mrb[22].mxu0 }
 0x1b0   : > { %v1622_v25 = vmax.f32 %v1620_v36, %v1621_v10  ;;  %v9526_v33 = vmax.f32 %v1627_v3, %v1628_v4  ;;  %v1695_v44 = vmax.f32 %v1693_v57, %v1694_v58  ;;  %v1635_v11 = vrot.slane %v1634_v18, 1  ;;  %v9590_v42 = vpop.f32.mrb[23].mxu0 }
 0x1b1   : > { %v1701_v14 = vrot.slane %v1700_v51, 4  ;;  %v1708_v56 = vrot.slane %v1707_v27, 4  ;;  %v1714_v47 = vsel %vm1496_vm6, %v1148_v19, -inf  ;;  %v9542_v3 = vsel %vm2284_vm8, %v9483_v31, %v9493_v50 }
 0x1b2   : > { %v2303_v7 = vsel %vm2282_vm7, %v1622_v25, %v1615_v1  ;;  %v9537_v62 = vsel %vm2288_vm9, %v1622_v25, %v2419_v41  ;;  %v1696_v37 = vrot.slane %v1695_v44, 2  ;;  %v1715_v36 = vrot.slane %v1714_v47, 4 }
 0x1b3   : > { %v9544_v40 = vmax.f32 %v1634_v18, %v1635_v11  ;;  %v1702_v2 = vmax.f32 %v1700_v51, %v1701_v14  ;;  %v1709_v59 = vmax.f32 %v1707_v27, %v1708_v56  ;;  %v2304_v57 = vsel %vm2284_vm8, %v9526_v33, %v2303_v7 }
 0x1b4   : > { %v1697_v10 = vmax.f32 %v1695_v44, %v1696_v37  ;;  %v1716_v1 = vmax.f32 %v1714_v47, %v1715_v36  ;;  %v916_v4 = vadd.f32 %v9346_v29, %v9377_v28  ;;  %v2312_v19 = vsel %vm2286_vm10, %v9511_v49, %v2311_v60 }
 0x1b5   : > { %v1703_v58 = vrot.slane %v1702_v2, 2  ;;  %v1710_v26 = vrot.slane %v1709_v59, 2  ;;  %v937_v50 = vadd.f32 %v9384_v53, %v9346_v29  ;;  %v9557_v44 = vsel %vm2286_vm10, %v9544_v40, %v2304_v57 }
 0x1b6   : > { %v1698_v18 = vrot.slane %v1697_v10, 1  ;;  %v1717_v25 = vrot.slane %v1716_v1, 2  ;;  %v1098_v51 = vcombine.high %v916_v4, %v916_v4  ;;  %v1105_v27 = vrot.slane %v916_v4, %v9349_v43 }
 0x1b7   : > { %v1704_v41 = vmax.f32 %v1702_v2, %v1703_v58  ;;  %v1711_v11 = vmax.f32 %v1709_v59, %v1710_v26  ;;  %v1183_v28 = vcombine.high %v937_v50, %v937_v50  ;;  %v1190_v36 = vrot.slane %v937_v50, %v9349_v43  ;;  %v8503_v50 = vld [vmem:[%s11745_s3 + $0x40] sm:$0xff]  }
 0x1b8   : > { %v9559_v14 = vmax.f32 %v1697_v10, %v1698_v18  ;;  %v1718_v56 = vmax.f32 %v1716_v1, %v1717_v25  ;;  %v1112_v60 = vrot.slane %v1098_v51, %v9349_v43  ;;  %v1113_v47 = vcombine.high %v1105_v27, %v1105_v27  ;;  %7456 = vmatprep.subr.bf16.mxu1 %v8503_v50 }
 0x1b9   : > { %v1705_v7 = vrot.slane %v1704_v41, 1  ;;  %v1712_v53 = vrot.slane %v1711_v11, 1  ;;  %v1637_v37 = vsel %vm1496_vm6, %v1105_v27, -inf  ;;  %v1197_v58 = vrot.slane %v1183_v28, %v9349_v43 }
 0x1ba   : > { %11802 = vst [vmem:[#allocation15_spill] sm:$0xff] %v9559_v14  ;;  %v1719_v61 = vrot.slane %v1718_v56, 1  ;;  %v2313_v2 = vsel %vm2288_vm9, %v9559_v14, %v2312_v19  ;;  %v1114_v59 = vcombine.high %v1112_v60, %v1112_v60  ;;  %v1638_v57 = vrot.slane %v1637_v37, 4 }
 0x1bb   : > { %v9566_v4 = vmax.f32 %v1704_v41, %v1705_v7  ;;  %v1644_v10 = vsel %vm1496_vm6, %v1113_v47, -inf  ;;  %v1651_v1 = vsel %vm1496_vm6, %v1112_v60, -inf  ;;  %v9571_v26 = vmax.f32 %v1711_v11, %v1712_v53  ;;  %v8504_v11 = vld [vmem:[%s11745_s3] sm:$0xff]  }
 0x1bc   : > { %v1639_v18 = vmax.f32 %v1637_v37, %v1638_v57  ;;  %v1645_v25 = vrot.slane %v1644_v10, 4  ;;  %v1652_v51 = vrot.slane %v1651_v1, 4  ;;  %v9576_v19 = vmax.f32 %v1718_v56, %v1719_v61  ;;  %7457 = vmatpush3.bf16.msra.mxu1 %v8504_v11 }
 0x1bd   : > { %v2314_v27 = vsel %vm2290_vm11, %v9566_v4, %v2313_v2  ;;  %v1658_v41 = vsel %vm1496_vm6, %v1114_v59, -inf  ;;  %v1198_v47 = vcombine.high %v1190_v36, %v1190_v36  ;;  %v1199_v37 = vcombine.high %v1197_v58, %v1197_v58 }
 0x1be   : > { %11803 = vst [vmem:[#allocation16_spill] sm:$0xff] %v9576_v19  ;;  %v9586_v28 = vsel %vm2292_vm12, %v9571_v26, %v2314_v27  ;;  %v1640_v60 = vrot.slane %v1639_v18, 2  ;;  %v1646_v7 = vmax.f32 %v1644_v10, %v1645_v25  ;;  %v1653_v53 = vmax.f32 %v1651_v1, %v1652_v51 }
 0x1bf   : > { %11804 = vst [vmem:[#allocation17_spill] sm:$0xff] %v9586_v28  ;;  %v1659_v56 = vrot.slane %v1658_v41, 4  ;;  %v1777_v61 = vsel %vm1496_vm6, %v1190_v36, -inf  ;;  %v1784_v2 = vsel %vm1496_vm6, %v1198_v47, -inf  ;;  %v1791_v28 = vsel %vm1496_vm6, %v1197_v58, -inf  ;;  %v8506_v58 = vld [vmem:[%s11745_s3 + $0x48] sm:$0xff]  }
 0x1c0   : > { %v1641_v59 = vmax.f32 %v1639_v18, %v1640_v60  ;;  %v1647_v57 = vrot.slane %v1646_v7, 2  ;;  %v1654_v14 = vrot.slane %v1653_v53, 2  ;;  %v1778_v49 = vrot.slane %v1777_v61, 4  ;;  %v8505_v18 = vld [vmem:[%s11745_s3 + $0xa8] sm:$0xff]   ;;  %7458 = vmatprep.subr.bf16.mxu1 %v8506_v58 }
 0x1c1   : > { %v1660_v55 = vmax.f32 %v1658_v41, %v1659_v56  ;;  %v1785_v27 = vrot.slane %v1784_v2, 4  ;;  %v1798_v10 = vsel %vm1496_vm6, %v1199_v37, -inf  ;;  %v1792_v47 = vrot.slane %v1791_v28, 4  ;;  %7818 = vmatprep.subr.bf16.mxu0 %v8505_v18  ;;  %v8507_v37 = vld [vmem:[%s11745_s3 + $0x8] sm:$0xff]  }
 0x1c2   : > { %v1642_v1 = vrot.slane %v1641_v59, 1  ;;  %v1648_v25 = vmax.f32 %v1646_v7, %v1647_v57  ;;  %v1655_v51 = vmax.f32 %v1653_v53, %v1654_v14  ;;  %v1779_v50 = vmax.f32 %v1777_v61, %v1778_v49  ;;  %7819 = vmatpush3.bf16.msra.mxu0 %v8505_v18  ;;  %7459 = vmatpush3.bf16.msra.mxu1 %v8507_v37 }
 0x1c3   : > { %v1661_v36 = vrot.slane %v1660_v55, 2  ;;  %v1786_v31 = vmax.f32 %v1784_v2, %v1785_v27  ;;  %v1799_v11 = vrot.slane %v1798_v10, 4  ;;  %v1793_v49 = vmax.f32 %v1791_v28, %v1792_v47 }
 0x1c4   : > { %v9597_v60 = vmax.f32 %v1641_v59, %v1642_v1  ;;  %v1649_v41 = vrot.slane %v1648_v25, 1  ;;  %v1656_v56 = vrot.slane %v1655_v51, 1  ;;  %v1780_v38 = vrot.slane %v1779_v50, 2 }
 0x1c5   : > { %v1662_v7 = vmax.f32 %v1660_v55, %v1661_v36  ;;  %v1787_v14 = vrot.slane %v1786_v31, 2  ;;  %v1800_v53 = vmax.f32 %v1798_v10, %v1799_v11  ;;  %v1794_v16 = vrot.slane %v1793_v49, 2 }
 0x1c6   : > { %v1650_v61 = vmax.f32 %v1648_v25, %v1649_v41  ;;  %v1657_v2 = vmax.f32 %v1655_v51, %v1656_v56  ;;  %v2306_v59 = vsel %vm2288_vm9, %v9597_v60, %v9557_v44  ;;  %v1781_v57 = vmax.f32 %v1779_v50, %v1780_v38 }
 0x1c7   : > { %v1663_v27 = vrot.slane %v1662_v7, 1  ;;  %v1788_v1 = vmax.f32 %v1786_v31, %v1787_v14  ;;  %v1801_v55 = vrot.slane %v1800_v53, 2  ;;  %v929_v25 = vadd.f32 %v9346_v29, %v9388_v39 }
 0x1c8   : > { %v2307_v28 = vsel %vm2290_vm11, %v1650_v61, %v2306_v59  ;;  %v2424_v10 = vsel %vm2282_vm7, %v1657_v2, %v1650_v61  ;;  %v1782_v36 = vrot.slane %v1781_v57, 1  ;;  %v1795_v50 = vmax.f32 %v1793_v49, %v1794_v16 }
 0x1c9   : > { %v9612_v51 = vmax.f32 %v1662_v7, %v1663_v27  ;;  %v9615_v44 = vsel %vm2292_vm12, %v1657_v2, %v2307_v28  ;;  %v1789_v38 = vrot.slane %v1788_v1, 1  ;;  %v2431_v31 = vsel %vm2282_vm7, %v9571_v26, %v9566_v4 }
 0x1ca   : > { %11806 = vst [vmem:[#allocation19_spill] sm:$0xff] %v9615_v44  ;;  %v1802_v47 = vmax.f32 %v1800_v53, %v1801_v55  ;;  %v1149_v11 = vcombine.high %v929_v25, %v929_v25  ;;  %v1156_v18 = vrot.slane %v929_v25, %v9349_v43  ;;  %v9625_v39 = vmax.f32 %v1781_v57, %v1782_v36 }
 0x1cb   : > { %11805 = vst [vmem:[#allocation18_spill] sm:$0xff] %v9612_v51  ;;  %v9623_v41 = vsel %vm2284_vm8, %v9612_v51, %v2424_v10  ;;  %v9627_v56 = vmax.f32 %v1788_v1, %v1789_v38  ;;  %v1796_v58 = vrot.slane %v1795_v50, 1  ;;  %v940_v37 = vadd.f32 %v9396_v0, %v9346_v29 }
 0x1cc   : > { %v1803_v7 = vrot.slane %v1802_v47, 1  ;;  %v1163_v16 = vrot.slane %v1149_v11, %v9349_v43  ;;  %v1164_v14 = vcombine.high %v1156_v18, %v1156_v18  ;;  %v1721_v49 = vsel %vm1496_vm6, %v1156_v18, -inf }
 0x1cd   : > { %11807 = vst [vmem:[#allocation20_spill] sm:$0xff] %v9627_v56  ;;  %v9631_v4 = vmax.f32 %v1795_v50, %v1796_v58  ;;  %v2324_v26 = vsel %vm2282_vm7, %v9627_v56, %v9625_v39  ;;  %v1722_v53 = vrot.slane %v1721_v49, 4  ;;  %v2432_v57 = vsel %vm2284_vm8, %v9576_v19, %v2431_v31 }
 0x1ce   : > { %v1165_v61 = vcombine.high %v1163_v16, %v1163_v16  ;;  %v1728_v2 = vsel %vm1496_vm6, %v1164_v14, -inf  ;;  %v1735_v59 = vsel %vm1496_vm6, %v1163_v16, -inf  ;;  %v9642_v27 = vmax.f32 %v1802_v47, %v1803_v7 }
 0x1cf   : > { %11808 = vst [vmem:[#allocation21_spill] sm:$0xff] %v9631_v4  ;;  %v1723_v1 = vmax.f32 %v1721_v49, %v1722_v53  ;;  %v1729_v55 = vrot.slane %v1728_v2, 4  ;;  %v1736_v28 = vrot.slane %v1735_v59, 4  ;;  %v2325_v10 = vsel %vm2284_vm8, %v9631_v4, %v2324_v26 }
 0x1d0   : > { %11809 = vst [vmem:[#allocation22_spill] sm:$0xff] %v9642_v27  ;;  %v1742_v36 = vsel %vm1496_vm6, %v1165_v61, -inf  ;;  %v1200_v25 = vcombine.high %v940_v37, %v940_v37  ;;  %v1207_v0 = vrot.slane %v940_v37, %v9349_v43  ;;  %v932_v7 = vadd.f32 %v9346_v29, %v9399_v15 }
 0x1d1   : > { %v1724_v38 = vrot.slane %v1723_v1, 2  ;;  %v1730_v50 = vmax.f32 %v1728_v2, %v1729_v55  ;;  %v1737_v11 = vmax.f32 %v1735_v59, %v1736_v28  ;;  %v1743_v18 = vrot.slane %v1742_v36, 4 }
 0x1d2   : > { %v1214_v58 = vrot.slane %v1200_v25, %v9349_v43  ;;  %v1215_v31 = vcombine.high %v1207_v0, %v1207_v0  ;;  %v1805_v47 = vsel %vm1496_vm6, %v1207_v0, -inf }
 0x1d3   : > { %v1725_v16 = vmax.f32 %v1723_v1, %v1724_v38  ;;  %v1731_v14 = vrot.slane %v1730_v50, 2  ;;  %v1738_v49 = vrot.slane %v1737_v11, 2  ;;  %v1744_v26 = vmax.f32 %v1742_v36, %v1743_v18 }
 0x1d4   : > { %v1216_v53 = vcombine.high %v1214_v58, %v1214_v58  ;;  %v1806_v61 = vrot.slane %v1805_v47, 4  ;;  %v1812_v37 = vsel %vm1496_vm6, %v1215_v31, -inf  ;;  %v1819_v2 = vsel %vm1496_vm6, %v1214_v58, -inf }
 0x1d5   : > { %v1726_v59 = vrot.slane %v1725_v16, 1  ;;  %v1732_v55 = vmax.f32 %v1730_v50, %v1731_v14  ;;  %v1739_v28 = vmax.f32 %v1737_v11, %v1738_v49  ;;  %v1745_v25 = vrot.slane %v1744_v26, 2 }
 0x1d6   : > { %v1807_v4 = vmax.f32 %v1805_v47, %v1806_v61  ;;  %v1813_v56 = vrot.slane %v1812_v37, 4  ;;  %v1820_v0 = vrot.slane %v1819_v2, 4  ;;  %v1826_v19 = vsel %vm1496_vm6, %v1216_v53, -inf }
 0x1d7   : > { %v1727_v15 = vmax.f32 %v1725_v16, %v1726_v59  ;;  %v1733_v1 = vrot.slane %v1732_v55, 1  ;;  %v1740_v38 = vrot.slane %v1739_v28, 1  ;;  %v1746_v51 = vmax.f32 %v1744_v26, %v1745_v25 }
 0x1d8   : > { %v1808_v36 = vrot.slane %v1807_v4, 2  ;;  %v1814_v18 = vmax.f32 %v1812_v37, %v1813_v56  ;;  %v1821_v44 = vmax.f32 %v1819_v2, %v1820_v0  ;;  %v1827_v63 = vrot.slane %v1826_v19, 4 }
 0x1d9   : > { %v1734_v31 = vmax.f32 %v1732_v55, %v1733_v1  ;;  %v1741_v34 = vmax.f32 %v1739_v28, %v1740_v38  ;;  %v1747_v58 = vrot.slane %v1746_v51, 1  ;;  %v2433_v50 = vsel %vm2286_vm10, %v1727_v15, %v2432_v57 }
 0x1da   : > { %v1809_v11 = vmax.f32 %v1807_v4, %v1808_v36  ;;  %v1815_v14 = vrot.slane %v1814_v18, 2  ;;  %v1822_v47 = vrot.slane %v1821_v44, 2  ;;  %v1828_v49 = vmax.f32 %v1826_v19, %v1827_v63 }
 0x1db   : > { %v2317_v61 = vsel %vm2282_vm7, %v1734_v31, %v1727_v15  ;;  %v2434_v16 = vsel %vm2288_vm9, %v1734_v31, %v2433_v50  ;;  %v2326_v26 = vsel %vm2286_vm10, %v9642_v27, %v2325_v10  ;;  %v1166_v53 = vcombine.high %v932_v7, %v932_v7 }
 0x1dc   : > { %v9660_v56 = vmax.f32 %v1746_v51, %v1747_v58  ;;  %v9663_v37 = vsel %vm2290_vm11, %v1741_v34, %v2434_v16  ;;  %v1810_v2 = vrot.slane %v1809_v11, 1  ;;  %v1816_v59 = vmax.f32 %v1814_v18, %v1815_v14 }
 0x1dd   : > { %v1823_v4 = vmax.f32 %v1821_v44, %v1822_v47  ;;  %v1829_v57 = vrot.slane %v1828_v49, 2  ;;  %v1173_v63 = vrot.slane %v932_v7, %v9349_v43  ;;  %v1180_v19 = vrot.slane %v1166_v53, %v9349_v43 }
 0x1de   : > { %v2318_v55 = vsel %vm2284_vm8, %v1741_v34, %v2317_v61  ;;  %v9668_v28 = vmax.f32 %v1809_v11, %v1810_v2  ;;  %v1817_v10 = vrot.slane %v1816_v59, 1  ;;  %v953_v51 = vadd.f32 %v9423_v5, %v9346_v29 }
 0x1df   : > { %v1824_v25 = vrot.slane %v1823_v4, 1  ;;  %v1830_v0 = vmax.f32 %v1828_v49, %v1829_v57  ;;  %v1181_v15 = vcombine.high %v1173_v63, %v1173_v63  ;;  %v1182_v1 = vcombine.high %v1180_v19, %v1180_v19 }
 0x1e0   : > { %11810 = vst [vmem:[#allocation23_spill] sm:$0xff] %v9668_v28  ;;  %v1818_v38 = vmax.f32 %v1816_v59, %v1817_v10  ;;  %v2327_v44 = vsel %vm2288_vm9, %v9668_v28, %v2326_v26  ;;  %v1749_v7 = vsel %vm1496_vm6, %v1173_v63, -inf  ;;  %v1763_v36 = vsel %vm1496_vm6, %v1180_v19, -inf }
 0x1e1   : > { %v1825_v18 = vmax.f32 %v1823_v4, %v1824_v25  ;;  %v1831_v34 = vrot.slane %v1830_v0, 1  ;;  %v1750_v31 = vrot.slane %v1749_v7, 4  ;;  %v1756_v58 = vsel %vm1496_vm6, %v1181_v15, -inf  ;;  %v8508_v15 = vld [vmem:[%s11745_s3 + $0xb0] sm:$0xff]  }
 0x1e2   : > { %v2328_v50 = vsel %vm2290_vm11, %v1818_v38, %v2327_v44  ;;  %v1757_v5 = vrot.slane %v1756_v58, 4  ;;  %v1764_v11 = vrot.slane %v1763_v36, 4  ;;  %v1770_v14 = vsel %vm1496_vm6, %v1182_v1, -inf  ;;  %7820 = vmatprep.subr.bf16.mxu0 %v8508_v15 }
 0x1e3   : > { %v9679_v47 = vmax.f32 %v1830_v0, %v1831_v34  ;;  %v2329_v49 = vsel %vm2292_vm12, %v1825_v18, %v2328_v50  ;;  %v1751_v61 = vmax.f32 %v1749_v7, %v1750_v31  ;;  %v2319_v16 = vsel %vm2286_vm10, %v9660_v56, %v2318_v55  ;;  %7821 = vmatpush3.bf16.msra.mxu0 %v8508_v15 }
 0x1e4   : > { %v1758_v26 = vmax.f32 %v1756_v58, %v1757_v5  ;;  %v1765_v53 = vmax.f32 %v1763_v36, %v1764_v11  ;;  %v1771_v2 = vrot.slane %v1770_v14, 4  ;;  %v1251_v59 = vcombine.high %v953_v51, %v953_v51 }
 0x1e5   : > { %v9686_v4 = vsel %vm2294_vm13, %v9679_v47, %v2329_v49  ;;  %v9689_v57 = vsel %vm2282_vm7, %v1825_v18, %v1818_v38  ;;  %v1752_v63 = vrot.slane %v1751_v61, 2  ;;  %v1258_v19 = vrot.slane %v953_v51, %v9349_v43  ;;  %v8509_v49 = vld [vmem:[%s11745_s3 + $0x50] sm:$0xff]  }
 0x1e6   : > { %v1759_v10 = vrot.slane %v1758_v26, 2  ;;  %v1766_v25 = vrot.slane %v1765_v53, 2  ;;  %v1772_v0 = vmax.f32 %v1770_v14, %v1771_v2  ;;  %v9694_v55 = vadd.f32 %v9346_v29, %v9429_v45  ;;  %7460 = vmatprep.subr.bf16.mxu1 %v8509_v49 }
 0x1e7   : > { %v1753_v1 = vmax.f32 %v1751_v61, %v1752_v63  ;;  %v1265_v44 = vrot.slane %v1251_v59, %v9349_v43  ;;  %v1266_v7 = vcombine.high %v1258_v19, %v1258_v19  ;;  %v1889_v38 = vsel %vm1496_vm6, %v1258_v19, -inf  ;;  %v8510_v61 = vld [vmem:[%s11745_s3 + $0x10] sm:$0xff]   ;;  %v8512_v19 = vld [vmem:[%s11745_s3 + $0x58] sm:$0xff]  }
 0x1e8   : > { %v1760_v36 = vmax.f32 %v1758_v26, %v1759_v10  ;;  %v1767_v18 = vmax.f32 %v1765_v53, %v1766_v25  ;;  %v1773_v51 = vrot.slane %v1772_v0, 2  ;;  %v1890_v34 = vrot.slane %v1889_v38, 4  ;;  %v8511_v26 = vld [vmem:[%s11745_s3 + $0xb8] sm:$0xff]   ;;  %7461 = vmatpush3.bf16.msra.mxu1 %v8510_v61 }
 0x1e9   : > { %v1754_v31 = vrot.slane %v1753_v1, 1  ;;  %v1267_v58 = vcombine.high %v1265_v44, %v1265_v44  ;;  %v1896_v29 = vsel %vm1496_vm6, %v1266_v7, -inf  ;;  %v1903_v45 = vsel %vm1496_vm6, %v1265_v44, -inf  ;;  %7822 = vmatprep.subr.bf16.mxu0 %v8511_v26  ;;  %7462 = vmatprep.subr.bf16.mxu1 %v8512_v19 }
 0x1ea   : > { %v1761_v50 = vrot.slane %v1760_v36, 1  ;;  %v1768_v5 = vrot.slane %v1767_v18, 1  ;;  %v1774_v11 = vmax.f32 %v1772_v0, %v1773_v51  ;;  %v1891_v14 = vmax.f32 %v1889_v38, %v1890_v34  ;;  %7823 = vmatpush3.bf16.msra.mxu0 %v8511_v26  ;;  %v8513_v51 = vld [vmem:[%s11745_s3 + $0x18] sm:$0xff]  }
 0x1eb   : > { %v9712_v53 = vmax.f32 %v1753_v1, %v1754_v31  ;;  %v1897_v2 = vrot.slane %v1896_v29, 4  ;;  %v1904_v59 = vrot.slane %v1903_v45, 4  ;;  %v1910_v63 = vsel %vm1496_vm6, %v1267_v58, -inf }
 0x1ec   : > { %v1762_v10 = vmax.f32 %v1760_v36, %v1761_v50  ;;  %v1769_v25 = vmax.f32 %v1767_v18, %v1768_v5  ;;  %v1775_v0 = vrot.slane %v1774_v11, 1  ;;  %v1892_v15 = vrot.slane %v1891_v14, 2  ;;  %7463 = vmatpush3.bf16.msra.mxu1 %v8513_v51 }
 0x1ed   : > { %11811 = vst [vmem:[#allocation24_spill] sm:$0xff] %v9712_v53  ;;  %v2320_v44 = vsel %vm2288_vm9, %v9712_v53, %v2319_v16  ;;  %v1898_v7 = vmax.f32 %v1896_v29, %v1897_v2  ;;  %v1905_v1 = vmax.f32 %v1903_v45, %v1904_v59  ;;  %v1911_v38 = vrot.slane %v1910_v63, 4  ;;  %v8514_v16 = vld [vmem:[%s11745_s3 + $0x60] sm:$0xff]  }
 0x1ee   : > { %v1776_v34 = vmax.f32 %v1774_v11, %v1775_v0  ;;  %v2321_v36 = vsel %vm2290_vm11, %v1762_v10, %v2320_v44  ;;  %v2438_v18 = vsel %vm2282_vm7, %v1769_v25, %v1762_v10  ;;  %v1893_v31 = vmax.f32 %v1891_v14, %v1892_v15  ;;  %7464 = vmatprep.subr.bf16.mxu1 %v8514_v16 }
 0x1ef   : > { %v2322_v58 = vsel %vm2292_vm12, %v1769_v25, %v2321_v36  ;;  %v1899_v29 = vrot.slane %v1898_v7, 2  ;;  %v1906_v45 = vrot.slane %v1905_v1, 2  ;;  %v1912_v50 = vmax.f32 %v1910_v63, %v1911_v38  ;;  %v8515_v63 = vld [vmem:[%s11745_s3 + $0x20] sm:$0xff]  }
 0x1f0   : > { %v9730_v5 = vsel %vm2294_vm13, %v1776_v34, %v2322_v58  ;;  %v2439_v11 = vsel %vm2284_vm8, %v1776_v34, %v2438_v18  ;;  %v1894_v49 = vrot.slane %v1893_v31, 1  ;;  %v1217_v61 = vcombine.high %v9694_v55, %v9694_v55  ;;  %7465 = vmatpush3.bf16.msra.mxu1 %v8515_v63 }
 0x1f1   : > { %v9738_v26 = vsel %vm2286_vm10, %v9625_v39, %v2439_v11  ;;  %v1900_v2 = vmax.f32 %v1898_v7, %v1899_v29  ;;  %v1907_v59 = vmax.f32 %v1905_v1, %v1906_v45  ;;  %v1913_v10 = vrot.slane %v1912_v50, 2  ;;  %v8516_v39 = vld [vmem:[%s11745_s3 + $0x68] sm:$0xff]   ;;  %v9759_v1 = vld [vmem:[%s11744_s2] ss:$0 sm:$0xff] }
 0x1f2   : > { %11812 = vst [vmem:[#allocation25_spill] sm:$0xff] %v9738_v26  ;;  %v9743_v19 = vmax.f32 %v1893_v31, %v1894_v49  ;;  %v1224_v25 = vrot.slane %v9694_v55, %v9349_v43  ;;  %v1231_v0 = vrot.slane %v1217_v61, %v9349_v43  ;;  %v9754_v7 = vsel %vm2284_vm8, %v9679_v47, %v9689_v57  ;;  %v8517_v57 = vld [vmem:[%s11745_s3 + $0x28] sm:$0xff]  }
 0x1f3   : > { %v1901_v15 = vrot.slane %v1900_v2, 1  ;;  %v1908_v44 = vrot.slane %v1907_v59, 1  ;;  %v956_v55 = vadd.f32 %v9759_v1, %v9435_v48  ;;  %v1914_v38 = vmax.f32 %v1912_v50, %v1913_v10  ;;  %7466 = vmatprep.subr.bf16.mxu1 %v8516_v39  ;;  %v8518_v50 = vld [vmem:[%s11745_s3 + $0x70] sm:$0xff]  }
 0x1f4   : > { %v1232_v51 = vcombine.high %v1224_v25, %v1224_v25  ;;  %v1233_v34 = vcombine.high %v1231_v0, %v1231_v0  ;;  %v1833_v36 = vsel %vm1496_vm6, %v1224_v25, -inf  ;;  %v1847_v47 = vsel %vm1496_vm6, %v1231_v0, -inf  ;;  %7467 = vmatpush3.bf16.msra.mxu1 %v8517_v57 }
 0x1f5   : > { %v9764_v18 = vmax.f32 %v1900_v2, %v1901_v15  ;;  %v9766_v31 = vmax.f32 %v1907_v59, %v1908_v44  ;;  %v1834_v16 = vrot.slane %v1833_v36, 4  ;;  %v1915_v58 = vrot.slane %v1914_v38, 1  ;;  %7468 = vmatprep.subr.bf16.mxu1 %v8518_v50 }
 0x1f6   : > { %v1840_v48 = vsel %vm1496_vm6, %v1232_v51, -inf  ;;  %v1848_v29 = vrot.slane %v1847_v47, 4  ;;  %v1854_v45 = vsel %vm1496_vm6, %v1233_v34, -inf  ;;  %v1268_v25 = vcombine.high %v956_v55, %v956_v55  ;;  %v8519_v51 = vld [vmem:[%s11745_s3 + $0x30] sm:$0xff]  }
 0x1f7   : > { %11813 = vst [vmem:[#allocation26_spill] sm:$0xff] %v9764_v18  ;;  %11814 = vst [vmem:[#allocation27_spill] sm:$0xff] %v9766_v31  ;;  %v2338_v11 = vsel %vm2282_vm7, %v9764_v18, %v9743_v19  ;;  %v1835_v49 = vmax.f32 %v1833_v36, %v1834_v16  ;;  %v1841_v61 = vrot.slane %v1840_v48, 4  ;;  %v1855_v2 = vrot.slane %v1854_v45, 4 }
 0x1f8   : > { %v9780_v59 = vmax.f32 %v1914_v38, %v1915_v58  ;;  %v2339_v63 = vsel %vm2284_vm8, %v9766_v31, %v2338_v11  ;;  %v1849_v10 = vmax.f32 %v1847_v47, %v1848_v29  ;;  %v1275_v44 = vrot.slane %v956_v55, %v9349_v43  ;;  %v8520_v55 = vld [vmem:[%s11745_s3 + $0x78] sm:$0xff]   ;;  %7469 = vmatpush3.bf16.msra.mxu1 %v8519_v51 }
 0x1f9   : > { %v1836_v0 = vrot.slane %v1835_v49, 2  ;;  %v1842_v39 = vmax.f32 %v1840_v48, %v1841_v61  ;;  %v1856_v15 = vmax.f32 %v1854_v45, %v1855_v2  ;;  %v1282_v36 = vrot.slane %v1268_v25, %v9349_v43  ;;  %7470 = vmatprep.subr.bf16.mxu1 %v8520_v55 }
 0x1fa   : > { %11815 = vst [vmem:[#allocation28_spill] sm:$0xff] %v9780_v59  ;;  %v1850_v34 = vrot.slane %v1849_v10, 2  ;;  %v9791_v38 = vsel %vm2286_vm10, %v9780_v59, %v2339_v63  ;;  %v948_v16 = vadd.f32 %v9759_v1, %v9440_v9  ;;  %v1283_v48 = vcombine.high %v1275_v44, %v1275_v44  ;;  %v8521_v9 = vld [vmem:[%s11745_s3 + $0x38] sm:$0xff]  }
 0x1fb   : > { %v1837_v47 = vmax.f32 %v1835_v49, %v1836_v0  ;;  %v1843_v57 = vrot.slane %v1842_v39, 2  ;;  %v1857_v58 = vrot.slane %v1856_v15, 2  ;;  %v1284_v45 = vcombine.high %v1282_v36, %v1282_v36 }
 0x1fc   : > { %v1851_v29 = vmax.f32 %v1849_v10, %v1850_v34  ;;  %v1917_v11 = vsel %vm1496_vm6, %v1275_v44, -inf  ;;  %v1931_v61 = vsel %vm1496_vm6, %v1282_v36, -inf  ;;  %v1924_v49 = vsel %vm1496_vm6, %v1283_v48, -inf  ;;  %7471 = vmatpush3.bf16.msra.mxu1 %v8521_v9 }
 0x1fd   : > { %v1838_v2 = vrot.slane %v1837_v47, 1  ;;  %v1844_v63 = vmax.f32 %v1842_v39, %v1843_v57  ;;  %v1858_v25 = vmax.f32 %v1856_v15, %v1857_v58  ;;  %v1918_v14 = vrot.slane %v1917_v11, 4 }
 0x1fe   : > { %v1852_v50 = vrot.slane %v1851_v29, 1  ;;  %v1932_v0 = vrot.slane %v1931_v61, 4  ;;  %v1938_v10 = vsel %vm1496_vm6, %v1284_v45, -inf  ;;  %v1925_v39 = vrot.slane %v1924_v49, 4 }
 0x1ff   : > { %v1839_v34 = vmax.f32 %v1837_v47, %v1838_v2  ;;  %v1845_v44 = vrot.slane %v1844_v63, 1  ;;  %v1859_v59 = vrot.slane %v1858_v25, 1  ;;  %v1919_v36 = vmax.f32 %v1917_v11, %v1918_v14 }
 0x200   : > { %v1853_v31 = vmax.f32 %v1851_v29, %v1852_v50  ;;  %v1933_v15 = vmax.f32 %v1931_v61, %v1932_v0  ;;  %v1939_v57 = vrot.slane %v1938_v10, 4  ;;  %v1926_v48 = vmax.f32 %v1924_v49, %v1925_v39 }
 0x201   : > { %v1846_v51 = vmax.f32 %v1844_v63, %v1845_v44  ;;  %v9805_v58 = vmax.f32 %v1858_v25, %v1859_v59  ;;  %v2447_v18 = vsel %vm2286_vm10, %v1839_v34, %v9754_v7  ;;  %v1920_v28 = vrot.slane %v1919_v36, 2 }
 0x202   : > { %v1934_v27 = vrot.slane %v1933_v15, 2  ;;  %v1940_v45 = vmax.f32 %v1938_v10, %v1939_v57  ;;  %v1234_v55 = vcombine.high %v948_v16, %v948_v16  ;;  %v1241_v11 = vrot.slane %v948_v16, %v9349_v43 }
 0x203   : > { %11816 = vst [vmem:[#allocation29_spill] sm:$0xff] %v9805_v58  ;;  %v2331_v47 = vsel %vm2282_vm7, %v1846_v51, %v1839_v34  ;;  %v2448_v14 = vsel %vm2288_vm9, %v1846_v51, %v2447_v18  ;;  %v1921_v29 = vmax.f32 %v1919_v36, %v1920_v28  ;;  %v1927_v2 = vrot.slane %v1926_v48, 2 }
 0x204   : > { %v2332_v61 = vsel %vm2284_vm8, %v1853_v31, %v2331_v47  ;;  %v9814_v59 = vsel %vm2290_vm11, %v1853_v31, %v2448_v14  ;;  %v1935_v7 = vmax.f32 %v1933_v15, %v1934_v27  ;;  %v1941_v25 = vrot.slane %v1940_v45, 2 }
 0x205   : > { %11817 = vst [vmem:[#allocation30_spill] sm:$0xff] %v9814_v59  ;;  %v1922_v63 = vrot.slane %v1921_v29, 1  ;;  %v1248_v9 = vrot.slane %v1234_v55, %v9349_v43  ;;  %v1249_v50 = vcombine.high %v1241_v11, %v1241_v11  ;;  %v1928_v49 = vmax.f32 %v1926_v48, %v1927_v2 }
 0x206   : > { %v1936_v0 = vrot.slane %v1935_v7, 1  ;;  %v1861_v10 = vsel %vm1496_vm6, %v1241_v11, -inf  ;;  %v2333_v28 = vsel %vm2286_vm10, %v9805_v58, %v2332_v61  ;;  %v1942_v16 = vmax.f32 %v1940_v45, %v1941_v25 }
 0x207   : > { %v9820_v18 = vmax.f32 %v1921_v29, %v1922_v63  ;;  %v1250_v34 = vcombine.high %v1248_v9, %v1248_v9  ;;  %v1862_v31 = vrot.slane %v1861_v10, 4  ;;  %v1929_v44 = vrot.slane %v1928_v49, 1 }
 0x208   : > { %v1937_v36 = vmax.f32 %v1935_v7, %v1936_v0  ;;  %v1868_v27 = vsel %vm1496_vm6, %v1249_v50, -inf  ;;  %v1875_v39 = vsel %vm1496_vm6, %v1248_v9, -inf  ;;  %v1943_v15 = vrot.slane %v1942_v16, 1 }
 0x209   : > { %11818 = vst [vmem:[#allocation31_spill] sm:$0xff] %v9820_v18  ;;  %v2341_v57 = vsel %vm2288_vm9, %v9820_v18, %v9791_v38  ;;  %v1863_v51 = vmax.f32 %v1861_v10, %v1862_v31  ;;  %v1869_v48 = vrot.slane %v1868_v27, 4  ;;  %v1930_v55 = vmax.f32 %v1928_v49, %v1929_v44 }
 0x20a   : > { %v1876_v47 = vrot.slane %v1875_v39, 4  ;;  %v1882_v14 = vsel %vm1496_vm6, %v1250_v34, -inf  ;;  %v969_v45 = vadd.f32 %v9759_v1, %v9448_v21  ;;  %v9830_v29 = vmax.f32 %v1942_v16, %v1943_v15 }
 0x20b   : > { %v1864_v11 = vrot.slane %v1863_v51, 2  ;;  %v1870_v61 = vmax.f32 %v1868_v27, %v1869_v48  ;;  %v1883_v2 = vrot.slane %v1882_v14, 4  ;;  %v2342_v7 = vsel %vm2290_vm11, %v1930_v55, %v2341_v57 }
 0x20c   : > { %v2459_v63 = vsel %vm2282_vm7, %v1937_v36, %v1930_v55  ;;  %v1877_v25 = vmax.f32 %v1875_v39, %v1876_v47  ;;  %v1319_v38 = vcombine.high %v969_v45, %v969_v45  ;;  %v9835_v9 = vsel %vm2292_vm12, %v1937_v36, %v2342_v7 }
 0x20d   : > { %v1865_v50 = vmax.f32 %v1863_v51, %v1864_v11  ;;  %v1871_v49 = vrot.slane %v1870_v61, 2  ;;  %v1884_v0 = vmax.f32 %v1882_v14, %v1883_v2  ;;  %v1326_v21 = vrot.slane %v969_v45, %v9349_v43 }
 0x20e   : > { %v1878_v10 = vrot.slane %v1877_v25, 2  ;;  %v1333_v16 = vrot.slane %v1319_v38, %v9349_v43  ;;  %v961_v34 = vadd.f32 %v9759_v1, %v9450_v30  ;;  %v9843_v39 = vsel %vm2284_vm8, %v9830_v29, %v2459_v63 }
 0x20f   : > { %v1866_v31 = vrot.slane %v1865_v50, 1  ;;  %v1872_v44 = vmax.f32 %v1870_v61, %v1871_v49  ;;  %v1885_v27 = vrot.slane %v1884_v0, 2  ;;  %v1334_v15 = vcombine.high %v1326_v21, %v1326_v21 }
 0x210   : > { %v1879_v36 = vmax.f32 %v1877_v25, %v1878_v10  ;;  %v1335_v57 = vcombine.high %v1333_v16, %v1333_v16  ;;  %v2001_v51 = vsel %vm1496_vm6, %v1326_v21, -inf  ;;  %v2015_v11 = vsel %vm1496_vm6, %v1333_v16, -inf }
 0x211   : > { %v9846_v48 = vmax.f32 %v1865_v50, %v1866_v31  ;;  %v1873_v55 = vrot.slane %v1872_v44, 1  ;;  %v1886_v47 = vmax.f32 %v1884_v0, %v1885_v27  ;;  %v2002_v14 = vrot.slane %v2001_v51, 4 }
 0x212   : > { %v1880_v45 = vrot.slane %v1879_v36, 1  ;;  %v2008_v30 = vsel %vm1496_vm6, %v1334_v15, -inf  ;;  %v2022_v61 = vsel %vm1496_vm6, %v1335_v57, -inf  ;;  %v2016_v50 = vrot.slane %v2015_v11, 4 }
 0x213   : > { %11819 = vst [vmem:[#allocation32_spill] sm:$0xff] %v9846_v48  ;;  %v1874_v2 = vmax.f32 %v1872_v44, %v1873_v55  ;;  %v1887_v7 = vrot.slane %v1886_v47, 1  ;;  %v2334_v63 = vsel %vm2288_vm9, %v9846_v48, %v2333_v28  ;;  %v2003_v25 = vmax.f32 %v2001_v51, %v2002_v14 }
 0x214   : > { %v1881_v38 = vmax.f32 %v1879_v36, %v1880_v45  ;;  %v2009_v49 = vrot.slane %v2008_v30, 4  ;;  %v2023_v10 = vrot.slane %v2022_v61, 4  ;;  %v1285_v27 = vcombine.high %v961_v34, %v961_v34 }
 0x215   : > { %v9853_v21 = vmax.f32 %v1886_v47, %v1887_v7  ;;  %v2335_v0 = vsel %vm2290_vm11, %v1874_v2, %v2334_v63  ;;  %v2004_v31 = vrot.slane %v2003_v25, 2  ;;  %v2017_v57 = vmax.f32 %v2015_v11, %v2016_v50 }
 0x216   : > { %v9857_v16 = vsel %vm2292_vm12, %v1881_v38, %v2335_v0  ;;  %v2452_v44 = vsel %vm2282_vm7, %v1881_v38, %v1874_v2  ;;  %v2010_v15 = vmax.f32 %v2008_v30, %v2009_v49  ;;  %v2024_v51 = vmax.f32 %v2022_v61, %v2023_v10 }
 0x217   : > { %v2453_v28 = vsel %vm2284_vm8, %v9853_v21, %v2452_v44  ;;  %v2005_v36 = vmax.f32 %v2003_v25, %v2004_v31  ;;  %v1292_v55 = vrot.slane %v961_v34, %v9349_v43  ;;  %v2018_v45 = vrot.slane %v2017_v57, 2 }
 0x218   : > { %v9865_v47 = vsel %vm2286_vm10, %v9743_v19, %v2453_v28  ;;  %v2011_v14 = vrot.slane %v2010_v15, 2  ;;  %v1299_v7 = vrot.slane %v1285_v27, %v9349_v43  ;;  %v2025_v0 = vrot.slane %v2024_v51, 2 }
 0x219   : > { %11820 = vst [vmem:[#allocation33_spill] sm:$0xff] %v9865_v47  ;;  %v2006_v63 = vrot.slane %v2005_v36, 1  ;;  %v1300_v2 = vcombine.high %v1292_v55, %v1292_v55  ;;  %v1945_v30 = vsel %vm1496_vm6, %v1292_v55, -inf  ;;  %v2019_v38 = vmax.f32 %v2017_v57, %v2018_v45 }
 0x21a   : > { %v2012_v11 = vmax.f32 %v2010_v15, %v2011_v14  ;;  %v1301_v49 = vcombine.high %v1299_v7, %v1299_v7  ;;  %v1946_v25 = vrot.slane %v1945_v30, 4  ;;  %v2026_v34 = vmax.f32 %v2024_v51, %v2025_v0 }
 0x21b   : > { %v9869_v61 = vmax.f32 %v2005_v36, %v2006_v63  ;;  %v1952_v50 = vsel %vm1496_vm6, %v1300_v2, -inf  ;;  %v1959_v19 = vsel %vm1496_vm6, %v1299_v7, -inf  ;;  %v2020_v31 = vrot.slane %v2019_v38, 1 }
 0x21c   : > { %v2013_v10 = vrot.slane %v2012_v11, 1  ;;  %v1947_v44 = vmax.f32 %v1945_v30, %v1946_v25  ;;  %v1953_v27 = vrot.slane %v1952_v50, 4  ;;  %v2027_v28 = vrot.slane %v2026_v34, 1 }
 0x21d   : > { %v1960_v18 = vrot.slane %v1959_v19, 4  ;;  %v1966_v48 = vsel %vm1496_vm6, %v1301_v49, -inf  ;;  %v972_v15 = vadd.f32 %v9759_v1, %v9454_v8  ;;  %v9878_v36 = vmax.f32 %v2019_v38, %v2020_v31 }
 0x21e   : > { %v9876_v57 = vmax.f32 %v2012_v11, %v2013_v10  ;;  %v1948_v51 = vrot.slane %v1947_v44, 2  ;;  %v1954_v55 = vmax.f32 %v1952_v50, %v1953_v27  ;;  %v9880_v14 = vmax.f32 %v2026_v34, %v2027_v28 }
 0x21f   : > { %11822 = vst [vmem:[#allocation35_spill] sm:$0xff] %v9878_v36  ;;  %v1961_v45 = vmax.f32 %v1959_v19, %v1960_v18  ;;  %v1967_v7 = vrot.slane %v1966_v48, 4  ;;  %v1336_v63 = vcombine.high %v972_v15, %v972_v15  ;;  %v1343_v49 = vrot.slane %v972_v15, %v9349_v43 }
 0x220   : > { %11821 = vst [vmem:[#allocation34_spill] sm:$0xff] %v9876_v57  ;;  %11823 = vst [vmem:[#allocation36_spill] sm:$0xff] %v9880_v14  ;;  %v2352_v0 = vsel %vm2282_vm7, %v9876_v57, %v9869_v61  ;;  %v1949_v2 = vmax.f32 %v1947_v44, %v1948_v51  ;;  %v1955_v30 = vrot.slane %v1954_v55, 2 }
 0x221   : > { %v2353_v8 = vsel %vm2284_vm8, %v9878_v36, %v2352_v0  ;;  %v1962_v11 = vrot.slane %v1961_v45, 2  ;;  %v1968_v38 = vmax.f32 %v1966_v48, %v1967_v7  ;;  %v1350_v25 = vrot.slane %v1336_v63, %v9349_v43 }
 0x222   : > { %v1950_v34 = vrot.slane %v1949_v2, 1  ;;  %v1956_v50 = vmax.f32 %v1954_v55, %v1955_v30  ;;  %v1351_v18 = vcombine.high %v1343_v49, %v1343_v49  ;;  %v2029_v19 = vsel %vm1496_vm6, %v1343_v49, -inf }
 0x223   : > { %v1963_v10 = vmax.f32 %v1961_v45, %v1962_v11  ;;  %v1969_v31 = vrot.slane %v1968_v38, 2  ;;  %v1352_v27 = vcombine.high %v1350_v25, %v1350_v25  ;;  %v2030_v28 = vrot.slane %v2029_v19, 4 }
 0x224   : > { %v1951_v44 = vmax.f32 %v1949_v2, %v1950_v34  ;;  %v1957_v51 = vrot.slane %v1956_v50, 1  ;;  %v2036_v15 = vsel %vm1496_vm6, %v1351_v18, -inf  ;;  %v2043_v57 = vsel %vm1496_vm6, %v1350_v25, -inf }
 0x225   : > { %v1964_v0 = vrot.slane %v1963_v10, 1  ;;  %v1970_v36 = vmax.f32 %v1968_v38, %v1969_v31  ;;  %v2031_v48 = vmax.f32 %v2029_v19, %v2030_v28  ;;  %v2037_v7 = vrot.slane %v2036_v15, 4 }
 0x226   : > { %v1958_v63 = vmax.f32 %v1956_v50, %v1957_v51  ;;  %v2461_v55 = vsel %vm2286_vm10, %v1951_v44, %v9843_v39  ;;  %v2044_v30 = vrot.slane %v2043_v57, 4  ;;  %v2050_v45 = vsel %vm1496_vm6, %v1352_v27, -inf }
 0x227   : > { %v1965_v49 = vmax.f32 %v1963_v10, %v1964_v0  ;;  %v1971_v11 = vrot.slane %v1970_v36, 1  ;;  %v2032_v47 = vrot.slane %v2031_v48, 2  ;;  %v2038_v2 = vmax.f32 %v2036_v15, %v2037_v7 }
 0x228   : > { %v2345_v34 = vsel %vm2282_vm7, %v1958_v63, %v1951_v44  ;;  %v2462_v18 = vsel %vm2288_vm9, %v1958_v63, %v2461_v55  ;;  %v2045_v25 = vmax.f32 %v2043_v57, %v2044_v30  ;;  %v2051_v58 = vrot.slane %v2050_v45, 4 }
 0x229   : > { %v9897_v38 = vmax.f32 %v1970_v36, %v1971_v11  ;;  %v2346_v50 = vsel %vm2284_vm8, %v1965_v49, %v2345_v34  ;;  %v9901_v19 = vsel %vm2290_vm11, %v1965_v49, %v2462_v18  ;;  %v2033_v39 = vmax.f32 %v2031_v48, %v2032_v47 }
 0x22a   : > { %11825 = vst [vmem:[#allocation38_spill] sm:$0xff] %v9901_v19  ;;  %v2039_v10 = vrot.slane %v2038_v2, 2  ;;  %v2046_v27 = vrot.slane %v2045_v25, 2  ;;  %v2052_v28 = vmax.f32 %v2050_v45, %v2051_v58  ;;  %v2354_v44 = vsel %vm2286_vm10, %v9880_v14, %v2353_v8 }
 0x22b   : > { %11824 = vst [vmem:[#allocation37_spill] sm:$0xff] %v9897_v38  ;;  %v2034_v51 = vrot.slane %v2033_v39, 1  ;;  %v964_v57 = vadd.f32 %v9759_v1, %v9481_v22  ;;  %v985_v36 = vadd.f32 %v9759_v1, %v9530_v13  ;;  %v9912_v47 = vsel %vm2286_vm10, %v9897_v38, %v2346_v50 }
 0x22c   : > { %v2040_v15 = vmax.f32 %v2038_v2, %v2039_v10  ;;  %v2047_v0 = vmax.f32 %v2045_v25, %v2046_v27  ;;  %v2053_v7 = vrot.slane %v2052_v28, 2 }
 0x22d   : > { %v9914_v48 = vmax.f32 %v2033_v39, %v2034_v51  ;;  %v1302_v58 = vcombine.high %v964_v57, %v964_v57  ;;  %v1309_v63 = vrot.slane %v964_v57, %v9349_v43  ;;  %v1387_v55 = vcombine.high %v985_v36, %v985_v36 }
 0x22e   : > { %v2041_v8 = vrot.slane %v2040_v15, 1  ;;  %v2048_v30 = vrot.slane %v2047_v0, 1  ;;  %v2054_v45 = vmax.f32 %v2052_v28, %v2053_v7  ;;  %v1394_v22 = vrot.slane %v985_v36, %v9349_v43 }
 0x22f   : > { %11826 = vst [vmem:[#allocation39_spill] sm:$0xff] %v9914_v48  ;;  %v2355_v13 = vsel %vm2288_vm9, %v9914_v48, %v2354_v44  ;;  %v1316_v49 = vrot.slane %v1302_v58, %v9349_v43  ;;  %v1317_v11 = vcombine.high %v1309_v63, %v1309_v63  ;;  %v1973_v2 = vsel %vm1496_vm6, %v1309_v63, -inf }
 0x230   : > { %v9922_v34 = vmax.f32 %v2040_v15, %v2041_v8  ;;  %v9924_v18 = vmax.f32 %v2047_v0, %v2048_v30  ;;  %v2055_v25 = vrot.slane %v2054_v45, 1  ;;  %v1974_v50 = vrot.slane %v1973_v2, 4 }
 0x231   : > { %v1318_v39 = vcombine.high %v1316_v49, %v1316_v49  ;;  %v1980_v10 = vsel %vm1496_vm6, %v1317_v11, -inf  ;;  %v1987_v27 = vsel %vm1496_vm6, %v1316_v49, -inf  ;;  %v1401_v28 = vrot.slane %v1387_v55, %v9349_v43 }
 0x232   : > { %v9929_v51 = vmax.f32 %v2054_v45, %v2055_v25  ;;  %v2356_v44 = vsel %vm2290_vm11, %v9922_v34, %v2355_v13  ;;  %v1975_v57 = vmax.f32 %v1973_v2, %v1974_v50  ;;  %v9935_v36 = vadd.f32 %v9759_v1, %v9533_v52 }
 0x233   : > { %v9939_v15 = vsel %vm2292_vm12, %v9924_v18, %v2356_v44  ;;  %v1981_v0 = vrot.slane %v1980_v10, 4  ;;  %v1988_v7 = vrot.slane %v1987_v27, 4  ;;  %v1994_v58 = vsel %vm1496_vm6, %v1318_v39, -inf }
 0x234   : > { %v1976_v63 = vrot.slane %v1975_v57, 2  ;;  %v1995_v55 = vrot.slane %v1994_v58, 4  ;;  %v1402_v8 = vcombine.high %v1394_v22, %v1394_v22  ;;  %v1403_v30 = vcombine.high %v1401_v28, %v1401_v28 }
 0x235   : > { %v1982_v45 = vmax.f32 %v1980_v10, %v1981_v0  ;;  %v1989_v49 = vmax.f32 %v1987_v27, %v1988_v7  ;;  %v2113_v13 = vsel %vm1496_vm6, %v1394_v22, -inf  ;;  %v2127_v11 = vsel %vm1496_vm6, %v1401_v28, -inf }
 0x236   : > { %v1977_v52 = vmax.f32 %v1975_v57, %v1976_v63  ;;  %v1996_v2 = vmax.f32 %v1994_v58, %v1995_v55  ;;  %v2114_v25 = vrot.slane %v2113_v13, 4  ;;  %v2120_v50 = vsel %vm1496_vm6, %v1402_v8, -inf }
 0x237   : > { %v1983_v44 = vrot.slane %v1982_v45, 2  ;;  %v1990_v31 = vrot.slane %v1989_v49, 2  ;;  %v2121_v48 = vrot.slane %v2120_v50, 4  ;;  %v2128_v14 = vrot.slane %v2127_v11, 4 }
 0x238   : > { %v1978_v39 = vrot.slane %v1977_v52, 1  ;;  %v1997_v38 = vrot.slane %v1996_v2, 2  ;;  %v2115_v19 = vmax.f32 %v2113_v13, %v2114_v25  ;;  %v2134_v59 = vsel %vm1496_vm6, %v1403_v30, -inf }
 0x239   : > { %v1984_v10 = vmax.f32 %v1982_v45, %v1983_v44  ;;  %v1991_v27 = vmax.f32 %v1989_v49, %v1990_v31  ;;  %v2122_v0 = vmax.f32 %v2120_v50, %v2121_v48  ;;  %v2129_v22 = vmax.f32 %v2127_v11, %v2128_v14 }
 0x23a   : > { %v9946_v7 = vmax.f32 %v1977_v52, %v1978_v39  ;;  %v1998_v28 = vmax.f32 %v1996_v2, %v1997_v38  ;;  %v2116_v57 = vrot.slane %v2115_v19, 2  ;;  %v2135_v58 = vrot.slane %v2134_v59, 4 }
 0x23b   : > { %v1985_v63 = vrot.slane %v1984_v10, 1  ;;  %v1992_v55 = vrot.slane %v1991_v27, 1  ;;  %v2123_v8 = vrot.slane %v2122_v0, 2  ;;  %v2130_v53 = vrot.slane %v2129_v22, 2 }
 0x23c   : > { %11827 = vst [vmem:[#allocation40_spill] sm:$0xff] %v9946_v7  ;;  %v1999_v26 = vrot.slane %v1998_v28, 1  ;;  %v2348_v13 = vsel %vm2288_vm9, %v9946_v7, %v9912_v47  ;;  %v2117_v25 = vmax.f32 %v2115_v19, %v2116_v57  ;;  %v2136_v30 = vmax.f32 %v2134_v59, %v2135_v58 }
 0x23d   : > { %v1986_v45 = vmax.f32 %v1984_v10, %v1985_v63  ;;  %v1993_v31 = vmax.f32 %v1991_v27, %v1992_v55  ;;  %v2124_v48 = vmax.f32 %v2122_v0, %v2123_v8  ;;  %v2131_v14 = vmax.f32 %v2129_v22, %v2130_v53 }
 0x23e   : > { %v9951_v49 = vmax.f32 %v1998_v28, %v1999_v26  ;;  %v2118_v38 = vrot.slane %v2117_v25, 1  ;;  %v2137_v11 = vrot.slane %v2136_v30, 2  ;;  %v1353_v52 = vcombine.high %v9935_v36, %v9935_v36 }
 0x23f   : > { %v2349_v2 = vsel %vm2290_vm11, %v1986_v45, %v2348_v13  ;;  %v2466_v50 = vsel %vm2282_vm7, %v1993_v31, %v1986_v45  ;;  %v2125_v44 = vrot.slane %v2124_v48, 1  ;;  %v2132_v39 = vrot.slane %v2131_v14, 1 }
 0x240   : > { %v2473_v59 = vsel %vm2282_vm7, %v9924_v18, %v9922_v34  ;;  %v9961_v19 = vsel %vm2292_vm12, %v1993_v31, %v2349_v2  ;;  %v2467_v53 = vsel %vm2284_vm8, %v9951_v49, %v2466_v50  ;;  %v2138_v26 = vmax.f32 %v2136_v30, %v2137_v11 }
 0x241   : > { %v9967_v47 = vsel %vm2286_vm10, %v9869_v61, %v2467_v53  ;;  %v9969_v10 = vmax.f32 %v2117_v25, %v2118_v38  ;;  %v9971_v27 = vmax.f32 %v2124_v48, %v2125_v44  ;;  %v1360_v0 = vrot.slane %v9935_v36, %v9349_v43 }
 0x242   : > { %11828 = vst [vmem:[#allocation41_spill] sm:$0xff] %v9967_v47  ;;  %v9975_v22 = vmax.f32 %v2131_v14, %v2132_v39  ;;  %v2139_v34 = vrot.slane %v2138_v26, 1  ;;  %v1367_v18 = vrot.slane %v1353_v52, %v9349_v43  ;;  %v980_v28 = vadd.f32 %v9759_v1, %v9590_v42 }
 0x243   : > { %11829 = vst [vmem:[#allocation42_spill] sm:$0xff] %v9969_v10  ;;  %11830 = vst [vmem:[#allocation43_spill] sm:$0xff] %v9971_v27  ;;  %v9983_v61 = vsel %vm2282_vm7, %v9971_v27, %v9969_v10  ;;  %v1368_v57 = vcombine.high %v1360_v0, %v1360_v0  ;;  %v2057_v58 = vsel %vm1496_vm6, %v1360_v0, -inf  ;;  %v2474_v63 = vsel %vm2284_vm8, %v9929_v51, %v2473_v59 }
 0x244   : > { %v9988_v36 = vmax.f32 %v2138_v26, %v2139_v34  ;;  %v1369_v55 = vcombine.high %v1367_v18, %v1367_v18  ;;  %v2058_v8 = vrot.slane %v2057_v58, 4  ;;  %v2407_v13 = vsel %vm2290_vm11, %v9407_v6, %v9420_v35 }
 0x245   : > { %v2064_v42 = vsel %vm1496_vm6, %v1368_v57, -inf  ;;  %v2071_v1 = vsel %vm1496_vm6, %v1367_v18, -inf  ;;  %v1370_v25 = vcombine.high %v980_v28, %v980_v28  ;;  %v1377_v30 = vrot.slane %v980_v28, %v9349_v43 }
 0x246   : > { %v2059_v45 = vmax.f32 %v2057_v58, %v2058_v8  ;;  %v2065_v31 = vrot.slane %v2064_v42, 4  ;;  %v2072_v48 = vrot.slane %v2071_v1, 4  ;;  %v2078_v14 = vsel %vm1496_vm6, %v1369_v55, -inf }
 0x247   : > { %v2079_v38 = vrot.slane %v2078_v14, 4  ;;  %v1384_v11 = vrot.slane %v1370_v25, %v9349_v43  ;;  %v1385_v52 = vcombine.high %v1377_v30, %v1377_v30  ;;  %v2085_v2 = vsel %vm1496_vm6, %v1377_v30, -inf }
 0x248   : > { %v2060_v50 = vrot.slane %v2059_v45, 2  ;;  %v2066_v6 = vmax.f32 %v2064_v42, %v2065_v31  ;;  %v2073_v35 = vmax.f32 %v2071_v1, %v2072_v48  ;;  %v2086_v44 = vrot.slane %v2085_v2, 4 }
 0x249   : > { %v2080_v39 = vmax.f32 %v2078_v14, %v2079_v38  ;;  %v1386_v59 = vcombine.high %v1384_v11, %v1384_v11  ;;  %v2092_v53 = vsel %vm1496_vm6, %v1385_v52, -inf  ;;  %v2099_v26 = vsel %vm1496_vm6, %v1384_v11, -inf }
 0x24a   : > { %v2061_v0 = vmax.f32 %v2059_v45, %v2060_v50  ;;  %v2067_v34 = vrot.slane %v2066_v6, 2  ;;  %v2074_v18 = vrot.slane %v2073_v35, 2  ;;  %v2087_v28 = vmax.f32 %v2085_v2, %v2086_v44 }
 0x24b   : > { %v2081_v57 = vrot.slane %v2080_v39, 2  ;;  %v2093_v58 = vrot.slane %v2092_v53, 4  ;;  %v2100_v55 = vrot.slane %v2099_v26, 4  ;;  %v2106_v8 = vsel %vm1496_vm6, %v1386_v59, -inf }
 0x24c   : > { %v2062_v25 = vrot.slane %v2061_v0, 1  ;;  %v2068_v30 = vmax.f32 %v2066_v6, %v2067_v34  ;;  %v2075_v42 = vmax.f32 %v2073_v35, %v2074_v18  ;;  %v2088_v1 = vrot.slane %v2087_v28, 2 }
 0x24d   : > { %v2082_v31 = vmax.f32 %v2080_v39, %v2081_v57  ;;  %v2094_v48 = vmax.f32 %v2092_v53, %v2093_v58  ;;  %v2101_v14 = vmax.f32 %v2099_v26, %v2100_v55  ;;  %v2107_v38 = vrot.slane %v2106_v8, 4 }
 0x24e   : > { %v2063_v52 = vmax.f32 %v2061_v0, %v2062_v25  ;;  %v2069_v43 = vrot.slane %v2068_v30, 1  ;;  %v2076_v11 = vrot.slane %v2075_v42, 1  ;;  %v2089_v45 = vmax.f32 %v2087_v28, %v2088_v1 }
 0x24f   : > { %v2083_v50 = vrot.slane %v2082_v31, 1  ;;  %v2095_v27 = vrot.slane %v2094_v48, 2  ;;  %v2102_v2 = vrot.slane %v2101_v14, 2  ;;  %v2108_v44 = vmax.f32 %v2106_v8, %v2107_v38 }
 0x250   : > { %v2070_v10 = vmax.f32 %v2068_v30, %v2069_v43  ;;  %v2077_v47 = vmax.f32 %v2075_v42, %v2076_v11  ;;  %v2475_v59 = vsel %vm2286_vm10, %v2063_v52, %v2474_v63  ;;  %v2090_v7 = vrot.slane %v2089_v45, 1  ;;  %v11836_v11 = vld [vmem:[#allocation8_spill] sm:$0xff] }
 0x251   : > { %v10003_v6 = vmax.f32 %v2082_v31, %v2083_v50  ;;  %v2096_v35 = vmax.f32 %v2094_v48, %v2095_v27  ;;  %v2103_v39 = vmax.f32 %v2101_v14, %v2102_v2  ;;  %v2109_v53 = vrot.slane %v2108_v44, 2  ;;  %v11832_v31 = vld [vmem:[#allocation10_spill] sm:$0xff]  ;;  %v11834_v14 = vld [vmem:[#allocation13_spill] sm:$0xff] }
 0x252   : > { %v2359_v26 = vsel %vm2282_vm7, %v2070_v10, %v2063_v52  ;;  %v2476_v0 = vsel %vm2288_vm9, %v2070_v10, %v2475_v59  ;;  %v10007_v34 = vmax.f32 %v2089_v45, %v2090_v7  ;;  %v2408_v18 = vsel %vm2292_vm12, %v9416_v32, %v2407_v13  ;;  %v11835_v52 = vld [vmem:[#allocation11_spill] sm:$0xff]  ;;  %v11838_v50 = vld [vmem:[#allocation14_spill] sm:$0xff] }
 0x253   : > { %v2360_v43 = vsel %vm2284_vm8, %v2077_v47, %v2359_v26  ;;  %v10013_v28 = vsel %vm2290_vm11, %v2077_v47, %v2476_v0  ;;  %v2097_v63 = vrot.slane %v2096_v35, 1  ;;  %v2104_v57 = vrot.slane %v2103_v39, 1  ;;  %v11841_v26 = vld [vmem:[#allocation15_spill] sm:$0xff] }
 0x254   : > { %v2110_v58 = vmax.f32 %v2108_v44, %v2109_v53  ;;  %v2361_v27 = vsel %vm2286_vm10, %v10003_v6, %v2360_v43  ;;  %v2409_v55 = vsel %vm2294_vm13, %v9468_v23, %v2408_v18  ;;  %v2412_v7 = vsel %vm2286_vm10, %v9386_v54, %v9542_v3  ;;  %v11842_v18 = vld [vmem:[#allocation17_spill] sm:$0xff]  ;;  %v11843_v43 = vld [vmem:[#allocation16_spill] sm:$0xff] }
 0x255   : > { %v2098_v10 = vmax.f32 %v2096_v35, %v2097_v63  ;;  %v2105_v32 = vmax.f32 %v2103_v39, %v2104_v57  ;;  %v2362_v13 = vsel %vm2288_vm9, %v10007_v34, %v2361_v27  ;;  %v2413_v47 = vsel %vm2288_vm9, %v9390_v12, %v2412_v7  ;;  %v11839_v35 = vld [vmem:[#allocation19_spill] sm:$0xff]  ;;  %v11840_v39 = vld [vmem:[#allocation18_spill] sm:$0xff] }
 0x256   : > { %v2111_v8 = vrot.slane %v2110_v58, 1  ;;  %v2414_v25 = vsel %vm2290_vm11, %v9392_v46, %v2413_v47  ;;  %v2421_v23 = vsel %vm2290_vm11, %v9526_v33, %v9537_v62  ;;  %v2426_v54 = vsel %vm2286_vm10, %v9500_v24, %v9623_v41 }
 0x257   : > { %v10037_v3 = vsel %vm2284_vm8, %v9975_v22, %v9983_v61  ;;  %v2363_v30 = vsel %vm2290_vm11, %v2098_v10, %v2362_v13  ;;  %v2415_v12 = vsel %vm2292_vm12, %v9405_v20, %v2414_v25  ;;  %v2422_v46 = vsel %vm2292_vm12, %v9544_v40, %v2421_v23  ;;  %v11831_v61 = vld [vmem:[#allocation12_spill] sm:$0xff]  ;;  %v11833_v40 = vld [vmem:[#allocation9_spill] sm:$0xff] }
 0x258   : > { %v10045_v42 = vsel %vm2292_vm12, %v2105_v32, %v2363_v30  ;;  %v10048_v33 = vsel %vm2282_vm7, %v2105_v32, %v2098_v10  ;;  %v2416_v24 = vsel %vm2294_vm13, %v9445_v17, %v2415_v12  ;;  %v2423_v62 = vsel %vm2294_vm13, %v9597_v60, %v2422_v46  ;;  %v11837_v60 = vld [vmem:[#allocation7_spill] sm:$0xff] }
 0x259   : > { %v10054_v41 = vmax.f32 %v2110_v58, %v2111_v8  ;;  %v2427_v20 = vsel %vm2288_vm9, %v11831_v61, %v2426_v54  ;;  %v2535_v1 = vpack.c.bf16 %v2416_v24, %v2409_v55  ;;  %v2293_v48 = vsel %vm2292_vm12, %v11833_v40, %v11832_v31 }
 0x25a   : > { %v2428_v38 = vsel %vm2290_vm11, %v11834_v14, %v2427_v20  ;;  %v10065_v17 = vsel %vm2294_vm13, %v11835_v52, %v2293_v48  ;;  %v10070_v45 = vsel %vm2294_vm13, %v11837_v60, %v11836_v11  ;;  %v10077_v53 = vsel %vm2294_vm13, %v11840_v39, %v11839_v35 }
 0x25b   : > { %v2429_v2 = vsel %vm2292_vm12, %v11838_v50, %v2428_v38  ;;  %v2577_v44 = vshrl.u32 %v2535_v1, 16  ;;  %v2580_v59 = vshll.u32 %v2535_v1, 16  ;;  %v10084_v63 = vsel %vm2294_vm13, %v11843_v43, %v11842_v18 }
 0x25c   : > { %v2430_v0 = vsel %vm2294_vm13, %v11841_v26, %v2429_v2  ;;  %v2382_v57 = vrot.slane %v10065_v17, 4  ;;  %v2499_v58 = vrot.slane %v10065_v17, 6  ;;  %v2500_v10 = vrot.slane %v10070_v45, 6  ;;  %v11849_v17 = vld [vmem:[#allocation20_spill] sm:$0xff] }
 0x25d   : > { %v2538_v27 = vpack.c.bf16 %v2430_v0, %v2423_v62  ;;  %v2579_v55 = vrot.slane %v2577_v44, 1  ;;  %v2582_v7 = vrot.slane %v2580_v59, 2  ;;  %v2502_v32 = vrot.slane %v10077_v53, 6 }
 0x25e   : > { %v2504_v13 = vrot.slane %v10084_v63, 6  ;;  %v11844_v47 = vrot.slane %v9686_v4, 6  ;;  %v11845_v8 = vrot.slane %v9730_v5, 6  ;;  %v10099_v23 = vsel %vm2294_vm13, %v9853_v21, %v9857_v16 }
 0x25f   : > { %v2583_v54 = vor.u32 %v2582_v7, %v2579_v55  ;;  %v2585_v30 = vshrl.u32 %v2538_v27, 16  ;;  %v2588_v12 = vshll.u32 %v2538_v27, 16  ;;  %v2501_v46 = vsel %vm1496_vm6, %v2499_v58, %v2500_v10 }
 0x260   : > { %v2509_v25 = vsel %vm1496_vm6, %v11845_v8, %v11844_v47  ;;  %v2503_v24 = vsel %vm1496_vm6, %v2500_v10, %v2502_v32  ;;  %v2505_v62 = vsel %vm1496_vm6, %v2502_v32, %v2504_v13  ;;  %v2536_v61 = vpack.c.bf16 %v2501_v46, %v2499_v58 }
 0x261   : > { %v11846_v20 = vmov %v11845_v8  ;;  %v2587_v31 = vrot.slane %v2585_v30, 1  ;;  %v2590_v40 = vrot.slane %v2588_v12, 2  ;;  %v2539_v48 = vpack.c.bf16 %v2505_v62, %v2503_v24 }
 0x262   : > { %v2507_v1 = vsel %vm1496_vm6, %v2504_v13, %v11846_v20  ;;  %v2594_v21 = vshrl.u32 %v2536_v61, 16  ;;  %v2597_v16 = vshll.u32 %v2536_v61, 16  ;;  %v10110_v38 = vsel %vm2294_vm13, %v9830_v29, %v9835_v9 }
 0x263   : > { %v2542_v14 = vpack.c.bf16 %v2509_v25, %v2507_v1  ;;  %v2510_v52 = vrot.slane %v10099_v23, 6  ;;  %v10113_v11 = vor.u32 %v2590_v40, %v2587_v31  ;;  %v2602_v60 = vshrl.u32 %v2539_v48, 16 }
 0x264   : > { %v2605_v50 = vshll.u32 %v2539_v48, 16  ;;  %v2596_v44 = vrot.slane %v2594_v21, 1  ;;  %v2599_v59 = vrot.slane %v2597_v16, 2  ;;  %v11847_v39 = vmov %v11844_v47  ;;  %v11848_v16 = vld [vmem:[#allocation25_spill] sm:$0xff] }
 0x265   : > { %v2629_v2 = vshrl.u32 %v2542_v14, 16  ;;  %v2632_v35 = vshll.u32 %v2542_v14, 16  ;;  %v2511_v26 = vsel %vm1496_vm6, %v11847_v39, %v2510_v52  ;;  %v2592_v0 = vsel %vm2558_vm14, %v2583_v54, %v10113_v11 }
 0x266   : > { %v2604_v18 = vrot.slane %v2602_v60, 1  ;;  %v2607_v29 = vrot.slane %v2605_v50, 2  ;;  %2912 = vmatprep.mubr.bf16.mxu1 %v2592_v0  ;;  %v2600_v43 = vor.u32 %v2599_v59, %v2596_v44  ;;  %v2512_v27 = vrot.slane %v10110_v38, 6 }
 0x267   : > { %v2631_v9 = vrot.slane %v2629_v2, 1  ;;  %v2634_v58 = vrot.slane %v2632_v35, 2  ;;  %v10124_v55 = vsel %vm2294_vm13, %v9951_v49, %v9961_v19  ;;  %v10129_v10 = vsel %vm2294_vm13, %v9929_v51, %v9939_v15  ;;  %v11850_v35 = vld [vmem:[#allocation24_spill] sm:$0xff] }
 0x268   : > { %v2608_v7 = vor.u32 %v2607_v29, %v2604_v18  ;;  %v2514_v32 = vrot.slane %v10124_v55, 6  ;;  %v2368_v13 = vsel %vm2286_vm10, %v9988_v36, %v10037_v3  ;;  %v2513_v8 = vsel %vm1496_vm6, %v2510_v52, %v2512_v27 }
 0x269   : > { %v2635_v47 = vor.u32 %v2634_v58, %v2631_v9  ;;  %v2516_v25 = vrot.slane %v10129_v10, 6  ;;  %v2545_v19 = vpack.c.bf16 %v2513_v8, %v2511_v26  ;;  %v10142_v51 = vsel %vm2381_vm15, %v2382_v57, %v2368_v13  ;;  %v11851_v26 = vld [vmem:[#allocation21_spill] sm:$0xff]  ;;  %v11852_v58 = vld [vmem:[#allocation22_spill] sm:$0xff] }
 0x26a   : > { %v2609_v49 = vsel %vm2558_vm14, %v2600_v43, %v2608_v7  ;;  %v2515_v54 = vsel %vm1496_vm6, %v2512_v27, %v2514_v32  ;;  %v2384_v30 = vrot.slane %v10070_v45, 4  ;;  %v2385_v12 = vrot.slane %v10077_v53, 4 }
 0x26b   : > { %7824 = vmatprep.mubr.bf16.mxu0 %v2609_v49  ;;  %v2636_v15 = vsel %vm2558_vm14, %v2608_v7, %v2635_v47  ;;  %v2517_v3 = vsel %vm1496_vm6, %v2514_v32, %v2516_v25  ;;  %v2656_v46 = vshrl.u32 %v2545_v19, 16  ;;  %v2659_v24 = vshll.u32 %v2545_v19, 16  ;;  %v11853_v49 = vld [vmem:[#allocation23_spill] sm:$0xff] }
 0x26c   : > { %7825 = vmatmul.mubr.bf16.vlgmr.msra.gmra.mrb[24].mxu0 %v2636_v15  ;;  %v2548_v62 = vpack.c.bf16 %v2517_v3, %v2515_v54  ;;  %v2386_v61 = vrot.slane %v10084_v63, 4  ;;  %v10152_v20 = vsel %vm2284_vm8, %v10054_v41, %v10048_v33  ;;  %v2395_v1 = vsel %vm2381_vm15, %v2384_v30, %v2382_v57 }
 0x26d   : > { %v2396_v31 = vsel %vm2381_vm15, %v2385_v12, %v2384_v30  ;;  %v2520_v45 = vrot.slane %v10142_v51, 6  ;;  %v2658_v53 = vrot.slane %v2656_v46, 1  ;;  %v2661_v40 = vrot.slane %v2659_v24, 2  ;;  %v11854_v46 = vld [vmem:[#allocation30_spill] sm:$0xff]  ;;  %v11856_v24 = vld [vmem:[#allocation33_spill] sm:$0xff] }
 0x26e   : > { %v2683_v48 = vshrl.u32 %v2548_v62, 16  ;;  %v2686_v14 = vshll.u32 %v2548_v62, 16  ;;  %v2397_v21 = vsel %vm2381_vm15, %v2386_v61, %v2385_v12  ;;  %v2534_v63 = vpack.c.bf16 %v2395_v1, %v10142_v51  ;;  %v11857_v62 = vld [vmem:[#allocation26_spill] sm:$0xff] }
 0x26f   : > { %v2436_v33 = vsel %vm2292_vm12, %v9660_v56, %v9663_v37  ;;  %v2441_v57 = vsel %vm2288_vm9, %v11849_v17, %v11848_v16  ;;  %v2662_v52 = vor.u32 %v2661_v40, %v2658_v53  ;;  %v2537_v2 = vpack.c.bf16 %v2397_v21, %v2396_v31  ;;  %v11858_v17 = vld [vmem:[#allocation32_spill] sm:$0xff] }
 0x270   : > { %v2685_v60 = vrot.slane %v2683_v48, 1  ;;  %v2688_v50 = vrot.slane %v2686_v14, 2  ;;  %v2560_v44 = vshrl.u32 %v2534_v63, 16  ;;  %v2563_v59 = vshll.u32 %v2534_v63, 16 }
 0x271   : > { %v2437_v39 = vsel %vm2294_vm13, %v11850_v35, %v2436_v33  ;;  %v2442_v0 = vsel %vm2290_vm11, %v11851_v26, %v2441_v57  ;;  %v2663_v18 = vsel %vm2558_vm14, %v2635_v47, %v2662_v52  ;;  %v2568_v56 = vshrl.u32 %v2537_v2, 16 }
 0x272   : > { %v2689_v29 = vor.u32 %v2688_v50, %v2685_v60  ;;  %v2571_v37 = vshll.u32 %v2537_v2, 16  ;;  %7828 = vmatprep.mubr.bf16.mxu0 %v2663_v18  ;;  %v2562_v9 = vrot.slane %v2560_v44, 1  ;;  %v2565_v43 = vrot.slane %v2563_v59, 2  ;;  %v11859_v50 = vld [vmem:[#allocation27_spill] sm:$0xff] }
 0x273   : > { %v2443_v27 = vsel %vm2292_vm12, %v11852_v58, %v2442_v0  ;;  %v10177_v7 = vsel %vm2294_vm13, %v10054_v41, %v10045_v42  ;;  %v2570_v13 = vrot.slane %v2568_v56, 1  ;;  %v2387_v3 = vrot.slane %v9730_v5, 4  ;;  %v11855_v42 = vld [vmem:[#allocation29_spill] sm:$0xff]  ;;  %v11861_v0 = vld [vmem:[#allocation31_spill] sm:$0xff] }
 0x274   : > { %v2690_v32 = vsel %vm2558_vm14, %v2662_v52, %v2689_v29  ;;  %v2573_v8 = vrot.slane %v2571_v37, 2  ;;  %v2444_v47 = vsel %vm2294_vm13, %v11853_v49, %v2443_v27  ;;  %v2566_v19 = vor.u32 %v2565_v43, %v2562_v9 }
 0x275   : > { %7829 = vmatmul.mubr.bf16.gmra.mrb[28].mxu0 %v2690_v32  ;;  %v2541_v54 = vpack.c.bf16 %v2444_v47, %v2437_v39  ;;  %v2518_v15 = vrot.slane %v10177_v7, 6  ;;  %v2388_v12 = vrot.slane %v9686_v4, 4  ;;  %v2450_v41 = vsel %vm2292_vm12, %v11855_v42, %v11854_v46  ;;  %v11865_v46 = vld [vmem:[#allocation41_spill] sm:$0xff]  ;;  %v11866_v42 = vld [vmem:[#allocation34_spill] sm:$0xff] }
 0x276   : > { %v2574_v30 = vor.u32 %v2573_v8, %v2570_v13  ;;  %v2455_v1 = vsel %vm2288_vm9, %v11857_v62, %v11856_v24  ;;  %v2398_v21 = vsel %vm2381_vm15, %v2387_v3, %v2386_v61  ;;  %v2451_v57 = vsel %vm2294_vm13, %v11858_v17, %v2450_v41  ;;  %v11860_v61 = vld [vmem:[#allocation28_spill] sm:$0xff]  ;;  %v11862_v13 = vld [vmem:[#allocation38_spill] sm:$0xff]  ;;  %v11863_v8 = vld [vmem:[#allocation37_spill] sm:$0xff] }
 0x277   : > { %v2620_v31 = vshrl.u32 %v2541_v54, 16  ;;  %v2623_v53 = vshll.u32 %v2541_v54, 16  ;;  %v2519_v40 = vsel %vm1496_vm6, %v2516_v25, %v2518_v15  ;;  %v2521_v48 = vsel %vm1496_vm6, %v2518_v15, %v2520_v45 }
 0x278   : > { %v2575_v14 = vsel %vm2558_vm14, %v2566_v19, %v2574_v30  ;;  %v2551_v5 = vpack.c.bf16 %v2521_v48, %v2519_v40  ;;  %v2399_v4 = vsel %vm2381_vm15, %v2388_v12, %v2387_v3  ;;  %v2456_v25 = vsel %vm2290_vm11, %v11859_v50, %v2455_v1  ;;  %v11867_v40 = vld [vmem:[#allocation35_spill] sm:$0xff]  ;;  %v11870_v50 = vld [vmem:[#allocation42_spill] sm:$0xff] }
 0x279   : > { %2913 = vmatmul.mubr.bf16.vlgmr.msra.gmra.mrb[0].mxu1 %v2575_v14  ;;  %v2622_v63 = vrot.slane %v2620_v31, 1  ;;  %v2625_v33 = vrot.slane %v2623_v53, 2  ;;  %v2540_v16 = vpack.c.bf16 %v2399_v4, %v2398_v21  ;;  %v2389_v45 = vrot.slane %v10099_v23, 4  ;;  %v11868_v4 = vld [vmem:[#allocation36_spill] sm:$0xff] }
 0x27a   : > { %v2710_v52 = vshrl.u32 %v2551_v5, 16  ;;  %v2713_v60 = vshll.u32 %v2551_v5, 16  ;;  %v2457_v35 = vsel %vm2292_vm12, %v11860_v61, %v2456_v25  ;;  %v2390_v56 = vrot.slane %v10110_v38, 4 }
 0x27b   : > { %v2626_v2 = vor.u32 %v2625_v33, %v2622_v63  ;;  %v2611_v44 = vshrl.u32 %v2540_v16, 16  ;;  %v2614_v59 = vshll.u32 %v2540_v16, 16  ;;  %v2458_v18 = vsel %vm2294_vm13, %v11861_v0, %v2457_v35  ;;  %v11869_v33 = vld [vmem:[#allocation39_spill] sm:$0xff] }
 0x27c   : > { %v2712_v39 = vrot.slane %v2710_v52, 1  ;;  %v2715_v26 = vrot.slane %v2713_v60, 2  ;;  %v2544_v58 = vpack.c.bf16 %v2458_v18, %v2451_v57  ;;  %v2400_v27 = vsel %vm2381_vm15, %v2389_v45, %v2388_v12 }
 0x27d   : > { %v2627_v37 = vsel %vm2558_vm14, %v10113_v11, %v2626_v2  ;;  %v2613_v9 = vrot.slane %v2611_v44, 1  ;;  %v2616_v43 = vrot.slane %v2614_v59, 2  ;;  %v2401_v32 = vsel %vm2381_vm15, %v2390_v56, %v2389_v45  ;;  %v11864_v11 = vld [vmem:[#allocation40_spill] sm:$0xff] }
 0x27e   : > { %2920 = vmatprep.mubr.bf16.mxu1 %v2627_v37  ;;  %v2716_v23 = vor.u32 %v2715_v26, %v2712_v39  ;;  %v2464_v49 = vsel %vm2292_vm12, %v11863_v8, %v11862_v13  ;;  %v2647_v19 = vshrl.u32 %v2544_v58, 16  ;;  %v2650_v54 = vshll.u32 %v2544_v58, 16 }
 0x27f   : > { %v2617_v47 = vor.u32 %v2616_v43, %v2613_v9  ;;  %v2543_v38 = vpack.c.bf16 %v2401_v32, %v2400_v27  ;;  %v2465_v3 = vsel %vm2294_vm13, %v11864_v11, %v2464_v49  ;;  %v2469_v41 = vsel %vm2288_vm9, %v11866_v42, %v11865_v46  ;;  %v8522_v46 = vld [vmem:[%s11747_s5 + $0x40] sm:$0xff]  }
 0x280   : > { %v2717_v15 = vsel %vm2558_vm14, %v2689_v29, %v2716_v23  ;;  %v2391_v12 = vrot.slane %v10124_v55, 4  ;;  %v2649_v62 = vrot.slane %v2647_v19, 1  ;;  %v2652_v1 = vrot.slane %v2650_v54, 2  ;;  %v8523_v42 = vld [vmem:[%s11747_s5] sm:$0xff]   ;;  %7522 = vmatprep.subr.bf16.mxu1 %v8522_v46 }
 0x281   : > { %7832 = vmatprep.mubr.bf16.mxu0 %v2717_v15  ;;  %v2618_v24 = vsel %vm2558_vm14, %v2574_v30, %v2617_v47  ;;  %v2638_v31 = vshrl.u32 %v2543_v38, 16  ;;  %v2641_v53 = vshll.u32 %v2543_v38, 16  ;;  %v2470_v29 = vsel %vm2290_vm11, %v11867_v40, %v2469_v41  ;;  %7523 = vmatpush3.bf16.msra.mxu1 %v8523_v42  ;;  %v8525_v41 = vld [vmem:[%s11747_s5 + $0x80] sm:$0xff]  }
 0x282   : > { %2921 = vmatmul.mubr.bf16.gmra.mrb[4].mxu1 %v2618_v24  ;;  %7833 = vmatmul.mubr.bf16.gmra.mrb[32].mxu0 %v2716_v23  ;;  %v2392_v48 = vrot.slane %v10129_v10, 4  ;;  %v2402_v14 = vsel %vm2381_vm15, %v2391_v12, %v2390_v56  ;;  %v2653_v5 = vor.u32 %v2652_v1, %v2649_v62  ;;  %v2471_v55 = vsel %vm2292_vm12, %v11868_v4, %v2470_v29  ;;  %v8527_v24 = vld [vmem:[%s11747_s5 + $0x88] sm:$0xff]   ;;  %v8529_v4 = vld [vmem:[%s11747_s5 + $0x10] sm:$0xff]  }
 0x283   : > { %v2640_v21 = vrot.slane %v2638_v31, 1  ;;  %v2478_v30 = vsel %vm2292_vm12, %v10003_v6, %v10013_v28  ;;  %v2643_v63 = vrot.slane %v2641_v53, 2  ;;  %v2472_v16 = vsel %vm2294_vm13, %v11869_v33, %v2471_v55  ;;  %v11871_v28 = vld [vmem:[#allocation43_spill] sm:$0xff]  ;;  %v8532_v53 = vld [vmem:[%s11747_s5 + $0x98] sm:$0xff]  }
 0x284   : > { %v2403_v17 = vsel %vm2381_vm15, %v2392_v48, %v2391_v12  ;;  %v2479_v10 = vsel %vm2294_vm13, %v10007_v34, %v2478_v30  ;;  %v2654_v57 = vsel %vm2558_vm14, %v2626_v2, %v2653_v5  ;;  %v2547_v52 = vpack.c.bf16 %v2472_v16, %v2465_v3  ;;  %v8524_v62 = vld [vmem:[%s11747_s5 + $0x48] sm:$0xff]   ;;  %v8530_v31 = vld [vmem:[%s11747_s5 + $0x90] sm:$0xff]   ;;  %v8531_v33 = vld [vmem:[%s11747_s5 + $0x58] sm:$0xff]  }
 0x285   : > { %v2546_v60 = vpack.c.bf16 %v2403_v17, %v2402_v14  ;;  %v2482_v25 = vsel %vm2286_vm10, %v11870_v50, %v10152_v20  ;;  %v2394_v45 = vrot.slane %v10142_v51, 4  ;;  %2928 = vmatprep.mubr.bf16.mxu1 %v2654_v57  ;;  %v2644_v6 = vor.u32 %v2643_v63, %v2640_v21  ;;  %v8526_v1 = vld [vmem:[%s11747_s5 + $0x8] sm:$0xff]   ;;  %7524 = vmatprep.subr.bf16.mxu1 %v8524_v62  ;;  %v8528_v21 = vld [vmem:[%s11747_s5 + $0x50] sm:$0xff]   ;;  %v8533_v17 = vld [vmem:[%s11747_s5 + $0x18] sm:$0xff]  }
 0x286   : > { %v2483_v44 = vsel %vm2288_vm9, %v11871_v28, %v2482_v25  ;;  %v2393_v59 = vrot.slane %v10177_v7, 4  ;;  %v2674_v61 = vshrl.u32 %v2547_v52, 16  ;;  %v2677_v35 = vshll.u32 %v2547_v52, 16  ;;  %7525 = vmatpush3.bf16.msra.mxu1 %v8526_v1  ;;  %v8537_v55 = vld [vmem:[%s11747_s5 + $0xa8] sm:$0xff]   ;;  %v10318_v52 = vld [vmem:[%s11746_s4] ss:$0 sm:$0xff] }
 0x287   : > { %v2665_v34 = vshrl.u32 %v2546_v60, 16  ;;  %v2668_v39 = vshll.u32 %v2546_v60, 16  ;;  %v2645_v2 = vsel %vm2558_vm14, %v2617_v47, %v2644_v6  ;;  %v2484_v26 = vsel %vm2290_vm11, %v9975_v22, %v2483_v44  ;;  %7526 = vmatprep.subr.bf16.mxu1 %v8528_v21  ;;  %v8535_v50 = vld [vmem:[%s11747_s5 + $0x60] sm:$0xff]  }
 0x288   : > { %v2404_v20 = vsel %vm2381_vm15, %v2393_v59, %v2392_v48  ;;  %v2405_v51 = vsel %vm2381_vm15, %v2394_v45, %v2393_v59  ;;  %v2676_v0 = vrot.slane %v2674_v61, 1  ;;  %v2679_v18 = vrot.slane %v2677_v35, 2 }
 0x289   : > { %v2667_v56 = vrot.slane %v2665_v34, 1  ;;  %v2670_v37 = vrot.slane %v2668_v39, 2  ;;  %v2485_v7 = vsel %vm2292_vm12, %v9988_v36, %v2484_v26  ;;  %v2549_v9 = vpack.c.bf16 %v2405_v51, %v2404_v20  ;;  %v8538_v34 = vld [vmem:[%s11747_s5 + $0x68] sm:$0xff]   ;;  %v8539_v39 = vld [vmem:[%s11747_s5 + $0xb0] sm:$0xff]  }
 0x28a   : > { %2929 = vmatmul.mubr.bf16.gmra.mrb[8].mxu1 %v2645_v2  ;;  %v2680_v43 = vor.u32 %v2679_v18, %v2676_v0  ;;  %v2550_v23 = vpack.c.bf16 %v2485_v7, %v2479_v10  ;;  %v11786_v12 = vmov 0.0   ;;  %v8540_v2 = vld [vmem:[%s11747_s5 + $0x28] sm:$0xff]   ;;  %v8542_v18 = vld [vmem:[%s11747_s5 + $0x70] sm:$0xff]   ;;  %v8541_v7 = vld [vmem:[%s11747_s5 + $0xb8] sm:$0xff]  }
 0x28b   : > { %v2671_v58 = vor.u32 %v2670_v37, %v2667_v56  ;;  %v2692_v27 = vshrl.u32 %v2549_v9, 16  ;;  %v2695_v32 = vshll.u32 %v2549_v9, 16  ;;  %7836 = vmatprep.subr.bf16.mxu0 %v11786_v12  ;;  %7527 = vmatpush3.bf16.msra.mxu1 %v8529_v4  ;;  %v11872_v20 = vld [vmem:[#allocation6_spill] sm:$0xff] }
 0x28c   : > { %v2681_v22 = vsel %vm2558_vm14, %v2653_v5, %v2680_v43  ;;  %v2701_v8 = vshrl.u32 %v2550_v23, 16  ;;  %v2704_v49 = vshll.u32 %v2550_v23, 16  ;;  %7837 = vmatpush3.bf16.msra.mxu0 %v8525_v41  ;;  %v8534_v5 = vld [vmem:[%s11747_s5 + $0xa0] sm:$0xff]   ;;  %7528 = vmatprep.subr.bf16.mxu1 %v8531_v33 }
 0x28d   : > { %v2672_v13 = vsel %vm2558_vm14, %v2644_v6, %v2671_v58  ;;  %2936 = vmatprep.mubr.bf16.mxu1 %v2681_v22  ;;  %v2694_v47 = vrot.slane %v2692_v27, 1  ;;  %v2697_v19 = vrot.slane %v2695_v32, 2  ;;  %7838 = vmatprep.subr.bf16.mxu0 %v11786_v12  ;;  %v8536_v6 = vld [vmem:[%s11747_s5 + $0x20] sm:$0xff]   ;;  %v8543_v22 = vld [vmem:[%s11747_s5 + $0x30] sm:$0xff]  }
 0x28e   : > { %v2703_v54 = vrot.slane %v2701_v8, 1  ;;  %v2706_v38 = vrot.slane %v2704_v49, 2  ;;  %7852 = vmatprep.mubr.msk.bf16.mxu0 %vm8803_vm1, %v11786_v12 }
 0x28f   : > { %v2698_v15 = vor.u32 %v2697_v19, %v2694_v47  ;;  %7529 = vmatpush3.bf16.msra.mxu1 %v8533_v17 }
 0x290   : > { %v2707_v11 = vor.u32 %v2706_v38, %v2703_v54  ;;  %7839 = vmatpush3.bf16.msra.mxu0 %v8527_v24  ;;  %7530 = vmatprep.subr.bf16.mxu1 %v8535_v50 }
 0x291   : > { %v2699_v36 = vsel %vm2558_vm14, %v2671_v58, %v2698_v15  ;;  %7840 = vmatprep.subr.bf16.mxu0 %v11786_v12 }
 0x292   : > { %2937 = vmatmul.mubr.bf16.gmra.mrb[12].mxu1 %v2672_v13  ;;  %v2708_v3 = vsel %vm2558_vm14, %v2680_v43, %v2707_v11 }
 0x293   : > { %2944 = vmatprep.mubr.bf16.mxu1 %v2708_v3  ;;  %7531 = vmatpush3.bf16.msra.mxu1 %v8536_v6 }
 0x294   : > { %7841 = vmatpush3.bf16.msra.mxu0 %v8530_v31  ;;  %7532 = vmatprep.subr.bf16.mxu1 %v8538_v34 }
 0x295   : > { %7842 = vmatprep.subr.bf16.mxu0 %v11786_v12 }
 0x297   : > { %7533 = vmatpush3.bf16.msra.mxu1 %v8540_v2 }
 0x298   : > { %7843 = vmatpush3.bf16.msra.mxu0 %v8532_v53  ;;  %7534 = vmatprep.subr.bf16.mxu1 %v8542_v18 }
 0x299   : > { %7844 = vmatprep.subr.bf16.mxu0 %v11786_v12 }
 0x29a   : > { %2945 = vmatmul.mubr.bf16.gmra.mrb[16].mxu1 %v2699_v36 }
 0x29b   : > { %2952 = vmatprep.mubr.bf16.mxu1 %v2707_v11  ;;  %7535 = vmatpush3.bf16.msra.mxu1 %v8543_v22 }
 0x29c   : > { %7845 = vmatpush3.bf16.msra.mxu0 %v8534_v5 }
 0x29d   : > { %7846 = vmatprep.subr.bf16.mxu0 %v11786_v12 }
 0x2a0   : > { %7847 = vmatpush3.bf16.msra.mxu0 %v8537_v55 }
 0x2a1   : > { %7848 = vmatprep.subr.bf16.mxu0 %v11786_v12 }
 0x2a2   : > { %2953 = vmatmul.mubr.bf16.gmra.mrb[20].mxu1 %v2698_v15 }
 0x2a4   : > { %7849 = vmatpush3.bf16.msra.mxu0 %v8539_v39 }
 0x2a5   : > { %7850 = vmatprep.subr.bf16.mxu0 %v11786_v12 }
 0x2a8   : > { %7851 = vmatpush3.bf16.msra.mxu0 %v8541_v7 }
 0x2a9   : > { %7884 = vmatprep.subr.bf16.mxu0 %v11786_v12 }
 0x33f   : > { %v10282_v40 = vpop.f32.mrb[24].mxu0 }
 0x340   : > { %v2995_v29 = vpop.f32.mrb[25].mxu0 }
 0x341   : > { %v10284_v48 = vpop.f32.mrb[26].mxu0 }
 0x342   : > { %v2998_v14 = vpop.f32.mrb[27].mxu0 }
 0x348   : > { %v10300_v30 = vpop.f32.mrb[28].mxu0 }
 0x349   : > { %v10302_v63 = vpop.f32.mrb[29].mxu0 }
 0x34a   : > { %v10308_v16 = vpop.f32.mrb[30].mxu0 }
 0x34b   : > { %v10313_v10 = vpop.f32.mrb[31].mxu0 }
 0x34c   : > { %v7472_v57 = vpop.f32.mrb[0].mxu1 }
 0x34d   : > { %v7473_v60 = vpop.f32.mrb[1].mxu1 }
 0x34e   : > { %v7474_v25 = vadd.f32 %v7473_v60, %v7472_v57  ;;  %v7475_v45 = vpop.f32.mrb[2].mxu1  ;;  %v8544_v57 = vld [vmem:[%s11747_s5 + $0x78] sm:$0xff]  }
 0x34f   : > { %v7476_v28 = vpop.f32.mrb[3].mxu1  ;;  %v8545_v60 = vld [vmem:[%s11747_s5 + $0x38] sm:$0xff]   ;;  %7536 = vmatprep.subr.bf16.mxu1 %v8544_v57 }
 0x350   : > { %v2915_v44 = vadd.f32 %v7474_v25, %v10318_v52  ;;  %v7477_v59 = vadd.f32 %v7476_v28, %v7475_v45  ;;  %7537 = vmatpush3.bf16.msra.mxu1 %v8545_v60 }
 0x351   : > { %7864 = vmatprep.subr.bf16.mxu1 %v11786_v12 }
 0x352   : > { %v2996_v61 = vadd.f32 %v2995_v29, %v2915_v44  ;;  %v2918_v35 = vadd.f32 %v7477_v59, %v10318_v52 }
 0x354   : > { %v3054_v26 = vcombine.high %v2996_v61, %v2996_v61  ;;  %v3061_v51 = vrot.slane %v2996_v61, %v11872_v20  ;;  %v2999_v0 = vadd.f32 %v2998_v14, %v2918_v35 }
 0x355   : > { %v7478_v56 = vpop.f32.mrb[4].mxu1  ;;  %v10343_v37 = vpop.f32.mrb[32].mxu0 }
 0x356   : > { %v3068_v9 = vrot.slane %v3054_v26, %v11872_v20  ;;  %v3069_v43 = vcombine.high %v3061_v51, %v3061_v51  ;;  %v3295_v58 = vsel %vm1496_vm6, %v3061_v51, -inf  ;;  %v3071_v23 = vcombine.high %v2999_v0, %v2999_v0  ;;  %v7479_v27 = vpop.f32.mrb[5].mxu1  ;;  %v10350_v32 = vpop.f32.mrb[33].mxu0 }
 0x357   : > { %v3296_v13 = vrot.slane %v3295_v58, 4  ;;  %v3078_v8 = vrot.slane %v2999_v0, %v11872_v20  ;;  %v10357_v49 = vadd.f32 %v7479_v27, %v7478_v56  ;;  %v10359_v47 = vpop.f32.mrb[6].mxu1  ;;  %v10361_v19 = vpop.f32.mrb[34].mxu0 }
 0x358   : > { %v3070_v54 = vcombine.high %v3068_v9, %v3068_v9  ;;  %v3302_v38 = vsel %vm1496_vm6, %v3069_v43, -inf  ;;  %v3309_v15 = vsel %vm1496_vm6, %v3068_v9, -inf  ;;  %v3085_v11 = vrot.slane %v3071_v23, %v11872_v20  ;;  %v10366_v36 = vpop.f32.mrb[7].mxu1  ;;  %v10368_v3 = vpop.f32.mrb[35].mxu0 }
 0x359   : > { %v3297_v46 = vmax.f32 %v3295_v58, %v3296_v13  ;;  %v3303_v42 = vrot.slane %v3302_v38, 4  ;;  %v3310_v41 = vrot.slane %v3309_v15, 4  ;;  %v3086_v24 = vcombine.high %v3078_v8, %v3078_v8 }
 0x35a   : > { %v3316_v62 = vsel %vm1496_vm6, %v3070_v54, -inf  ;;  %v3087_v1 = vcombine.high %v3085_v11, %v3085_v11  ;;  %v3323_v31 = vsel %vm1496_vm6, %v3078_v8, -inf  ;;  %v3337_v53 = vsel %vm1496_vm6, %v3085_v11, -inf }
 0x35b   : > { %v3298_v29 = vrot.slane %v3297_v46, 2  ;;  %v3304_v14 = vmax.f32 %v3302_v38, %v3303_v42  ;;  %v3311_v5 = vmax.f32 %v3309_v15, %v3310_v41  ;;  %v3317_v21 = vrot.slane %v3316_v62, 4 }
 0x35c   : > { %v3324_v4 = vrot.slane %v3323_v31, 4  ;;  %v3330_v55 = vsel %vm1496_vm6, %v3086_v24, -inf  ;;  %v3338_v33 = vrot.slane %v3337_v53, 4  ;;  %v3344_v17 = vsel %vm1496_vm6, %v3087_v1, -inf }
 0x35d   : > { %v3299_v50 = vmax.f32 %v3297_v46, %v3298_v29  ;;  %v3305_v25 = vrot.slane %v3304_v14, 2  ;;  %v3312_v45 = vrot.slane %v3311_v5, 2  ;;  %v3318_v6 = vmax.f32 %v3316_v62, %v3317_v21  ;;  %v10382_v28 = vpop.f32.mrb[8].mxu1 }
 0x35e   : > { %v3325_v44 = vmax.f32 %v3323_v31, %v3324_v4  ;;  %v3331_v59 = vrot.slane %v3330_v55, 4  ;;  %v3339_v61 = vmax.f32 %v3337_v53, %v3338_v33  ;;  %v3345_v35 = vrot.slane %v3344_v17, 4  ;;  %v10384_v34 = vpop.f32.mrb[9].mxu1 }
 0x35f   : > { %v3300_v39 = vrot.slane %v3299_v50, 1  ;;  %v3306_v2 = vmax.f32 %v3304_v14, %v3305_v25  ;;  %v3313_v26 = vmax.f32 %v3311_v5, %v3312_v45  ;;  %v3319_v51 = vrot.slane %v3318_v6, 2  ;;  %v10386_v0 = vpop.f32.mrb[10].mxu1 }
 0x360   : > { %v3326_v18 = vrot.slane %v3325_v44, 2  ;;  %v3332_v56 = vmax.f32 %v3330_v55, %v3331_v59  ;;  %v3340_v7 = vrot.slane %v3339_v61, 2  ;;  %v3346_v9 = vmax.f32 %v3344_v17, %v3345_v35  ;;  %v7488_v43 = vpop.f32.mrb[11].mxu1 }
 0x361   : > { %v10389_v58 = vmax.f32 %v3299_v50, %v3300_v39  ;;  %v3307_v23 = vrot.slane %v3306_v2, 1  ;;  %v3314_v27 = vrot.slane %v3313_v26, 1  ;;  %v3320_v22 = vmax.f32 %v3318_v6, %v3319_v51 }
 0x362   : > { %v3327_v13 = vmax.f32 %v3325_v44, %v3326_v18  ;;  %v3333_v8 = vrot.slane %v3332_v56, 2  ;;  %v3341_v54 = vmax.f32 %v3339_v61, %v3340_v7  ;;  %v3347_v38 = vrot.slane %v3346_v9, 2 }
 0x363   : > { %v10391_v15 = vmax.f32 %v3306_v2, %v3307_v23  ;;  %v10393_v11 = vmax.f32 %v3313_v26, %v3314_v27  ;;  %v3321_v46 = vrot.slane %v3320_v22, 1  ;;  %v2923_v42 = vadd.f32 %v10357_v49, %v10318_v52 }
 0x364   : > { %v3328_v41 = vrot.slane %v3327_v13, 1  ;;  %v3334_v24 = vmax.f32 %v3332_v56, %v3333_v8  ;;  %v3342_v62 = vrot.slane %v3341_v54, 1  ;;  %v3348_v1 = vmax.f32 %v3346_v9, %v3347_v38 }
 0x365   : > { %v3322_v31 = vmax.f32 %v3320_v22, %v3321_v46  ;;  %v3712_v53 = vsel %vm2282_vm7, %v10391_v15, %v10389_v58  ;;  %v3004_v29 = vadd.f32 %v10282_v40, %v2923_v42  ;;  %v7483_v14 = vadd.f32 %v10366_v36, %v10359_v47  ;;  %v10403_v5 = vpop.f32.mrb[12].mxu1 }
 0x366   : > { %v3713_v21 = vsel %vm2284_vm8, %v10393_v11, %v3712_v53  ;;  %v3329_v49 = vmax.f32 %v3327_v13, %v3328_v41  ;;  %v3335_v4 = vrot.slane %v3334_v24, 1  ;;  %v10407_v55 = vmax.f32 %v3341_v54, %v3342_v62  ;;  %v10409_v33 = vpop.f32.mrb[13].mxu1 }
 0x367   : > { %v3349_v17 = vrot.slane %v3348_v1, 1  ;;  %v3714_v57 = vsel %vm2286_vm10, %v3322_v31, %v3713_v21  ;;  %v3088_v60 = vcombine.high %v3004_v29, %v3004_v29  ;;  %v3095_v40 = vrot.slane %v3004_v29, %v11872_v20  ;;  %v10413_v50 = vpop.f32.mrb[14].mxu1 }
 0x368   : > { %v3336_v47 = vmax.f32 %v3334_v24, %v3335_v4  ;;  %v3715_v36 = vsel %vm2288_vm9, %v3329_v49, %v3714_v57  ;;  %v3773_v25 = vsel %vm2282_vm7, %v3329_v49, %v3322_v31  ;;  %v2926_v45 = vadd.f32 %v7483_v14, %v10318_v52  ;;  %v10418_v6 = vpop.f32.mrb[15].mxu1 }
 0x369   : > { %v10420_v44 = vmax.f32 %v3348_v1, %v3349_v17  ;;  %v3102_v59 = vrot.slane %v3088_v60, %v11872_v20  ;;  %v3103_v61 = vcombine.high %v3095_v40, %v3095_v40  ;;  %v3351_v35 = vsel %vm1496_vm6, %v3095_v40, -inf }
 0x36a   : > { %v10425_v39 = vsel %vm2290_vm11, %v3336_v47, %v3715_v36  ;;  %v3774_v2 = vsel %vm2284_vm8, %v3336_v47, %v3773_v25  ;;  %v3352_v26 = vrot.slane %v3351_v35, 4  ;;  %v3007_v51 = vadd.f32 %v10284_v48, %v2926_v45 }
 0x36b   : > { %v10431_v18 = vsel %vm2286_vm10, %v10407_v55, %v3774_v2  ;;  %v3104_v56 = vcombine.high %v3102_v59, %v3102_v59  ;;  %v3358_v7 = vsel %vm1496_vm6, %v3103_v61, -inf  ;;  %v3365_v9 = vsel %vm1496_vm6, %v3102_v59, -inf }
 0x36c   : > { %v3353_v23 = vmax.f32 %v3351_v35, %v3352_v26  ;;  %v3359_v27 = vrot.slane %v3358_v7, 4  ;;  %v3366_v22 = vrot.slane %v3365_v9, 4  ;;  %v3105_v13 = vcombine.high %v3007_v51, %v3007_v51 }
 0x36d   : > { %v3372_v8 = vsel %vm1496_vm6, %v3104_v56, -inf  ;;  %v3112_v54 = vrot.slane %v3007_v51, %v11872_v20  ;;  %v7486_v48 = vadd.f32 %v10384_v34, %v10382_v28  ;;  %v10440_v38 = vadd.f32 %v7488_v43, %v10386_v0  ;;  %v10442_v46 = vpop.f32.mrb[16].mxu1 }
 0x36e   : > { %v3354_v42 = vrot.slane %v3353_v23, 2  ;;  %v3360_v41 = vmax.f32 %v3358_v7, %v3359_v27  ;;  %v3367_v24 = vmax.f32 %v3365_v9, %v3366_v22  ;;  %v3373_v62 = vrot.slane %v3372_v8, 4  ;;  %v10444_v1 = vpop.f32.mrb[17].mxu1 }
 0x36f   : > { %v3119_v31 = vrot.slane %v3105_v13, %v11872_v20  ;;  %v3120_v53 = vcombine.high %v3112_v54, %v3112_v54  ;;  %v3379_v29 = vsel %vm1496_vm6, %v3112_v54, -inf  ;;  %v2931_v14 = vadd.f32 %v7486_v48, %v10318_v52  ;;  %v10449_v21 = vpop.f32.mrb[18].mxu1 }
 0x370   : > { %v3355_v28 = vmax.f32 %v3353_v23, %v3354_v42  ;;  %v3361_v34 = vrot.slane %v3360_v41, 2  ;;  %v3368_v0 = vrot.slane %v3367_v24, 2  ;;  %v3374_v43 = vmax.f32 %v3372_v8, %v3373_v62  ;;  %v10451_v49 = vpop.f32.mrb[19].mxu1 }
 0x371   : > { %v3121_v4 = vcombine.high %v3119_v31, %v3119_v31  ;;  %v3380_v17 = vrot.slane %v3379_v29, 4  ;;  %v3386_v57 = vsel %vm1496_vm6, %v3120_v53, -inf  ;;  %v3393_v60 = vsel %vm1496_vm6, %v3119_v31, -inf }
 0x372   : > { %v3356_v40 = vrot.slane %v3355_v28, 1  ;;  %v3362_v47 = vmax.f32 %v3360_v41, %v3361_v34  ;;  %v3369_v36 = vmax.f32 %v3367_v24, %v3368_v0  ;;  %v3375_v25 = vrot.slane %v3374_v43, 2 }
 0x373   : > { %v3381_v45 = vmax.f32 %v3379_v29, %v3380_v17  ;;  %v3387_v59 = vrot.slane %v3386_v57, 4  ;;  %v3394_v61 = vrot.slane %v3393_v60, 4  ;;  %v3400_v35 = vsel %vm1496_vm6, %v3121_v4, -inf }
 0x374   : > { %v10456_v2 = vmax.f32 %v3355_v28, %v3356_v40  ;;  %v3363_v26 = vrot.slane %v3362_v47, 1  ;;  %v3370_v51 = vrot.slane %v3369_v36, 1  ;;  %v3376_v56 = vmax.f32 %v3374_v43, %v3375_v25 }
 0x375   : > { %v3382_v7 = vrot.slane %v3381_v45, 2  ;;  %v3388_v9 = vmax.f32 %v3386_v57, %v3387_v59  ;;  %v3395_v23 = vmax.f32 %v3393_v60, %v3394_v61  ;;  %v3401_v27 = vrot.slane %v3400_v35, 4  ;;  %v10458_v22 = vpop.f32.mrb[20].mxu1 }
 0x376   : > { %v10460_v13 = vmax.f32 %v3362_v47, %v3363_v26  ;;  %v10462_v8 = vmax.f32 %v3369_v36, %v3370_v51  ;;  %v3377_v54 = vrot.slane %v3376_v56, 1  ;;  %v3012_v48 = vadd.f32 %v10302_v63, %v2931_v14  ;;  %v10465_v42 = vpop.f32.mrb[21].mxu1 }
 0x377   : > { %v3383_v41 = vmax.f32 %v3381_v45, %v3382_v7  ;;  %v3389_v24 = vrot.slane %v3388_v9, 2  ;;  %v3396_v62 = vrot.slane %v3395_v23, 2  ;;  %v3402_v31 = vmax.f32 %v3400_v35, %v3401_v27  ;;  %v10467_v53 = vpop.f32.mrb[22].mxu1 }
 0x378   : > { %v3378_v29 = vmax.f32 %v3376_v56, %v3377_v54  ;;  %v3719_v28 = vsel %vm2282_vm7, %v10460_v13, %v10456_v2  ;;  %v3122_v34 = vcombine.high %v3012_v48, %v3012_v48  ;;  %v3129_v0 = vrot.slane %v3012_v48, %v11872_v20  ;;  %v10473_v43 = vpop.f32.mrb[23].mxu1 }
 0x379   : > { %v3720_v63 = vsel %vm2284_vm8, %v10462_v8, %v3719_v28  ;;  %v3384_v14 = vrot.slane %v3383_v41, 1  ;;  %v3390_v4 = vmax.f32 %v3388_v9, %v3389_v24  ;;  %v3397_v17 = vmax.f32 %v3395_v23, %v3396_v62 }
 0x37a   : > { %v3403_v57 = vrot.slane %v3402_v31, 2  ;;  %v3721_v60 = vsel %vm2286_vm10, %v3378_v29, %v3720_v63  ;;  %v3136_v40 = vrot.slane %v3122_v34, %v11872_v20  ;;  %v3137_v47 = vcombine.high %v3129_v0, %v3129_v0 }
 0x37b   : > { %v3385_v36 = vmax.f32 %v3383_v41, %v3384_v14  ;;  %v3391_v25 = vrot.slane %v3390_v4, 1  ;;  %v3398_v45 = vrot.slane %v3397_v17, 1  ;;  %v3407_v59 = vsel %vm1496_vm6, %v3129_v0, -inf }
 0x37c   : > { %v3404_v61 = vmax.f32 %v3402_v31, %v3403_v57  ;;  %v3138_v35 = vcombine.high %v3136_v40, %v3136_v40  ;;  %v3408_v26 = vrot.slane %v3407_v59, 4  ;;  %v3414_v51 = vsel %vm1496_vm6, %v3137_v47, -inf }
 0x37d   : > { %v3392_v56 = vmax.f32 %v3390_v4, %v3391_v25  ;;  %v3399_v7 = vmax.f32 %v3397_v17, %v3398_v45  ;;  %v3722_v9 = vsel %vm2288_vm9, %v3385_v36, %v3721_v60  ;;  %v3780_v23 = vsel %vm2282_vm7, %v3385_v36, %v3378_v29 }
 0x37e   : > { %v3405_v27 = vrot.slane %v3404_v61, 1  ;;  %v3409_v54 = vmax.f32 %v3407_v59, %v3408_v26  ;;  %v3415_v48 = vrot.slane %v3414_v51, 4  ;;  %v3421_v41 = vsel %vm1496_vm6, %v3136_v40, -inf }
 0x37f   : > { %v3723_v24 = vsel %vm2290_vm11, %v3392_v56, %v3722_v9  ;;  %v3781_v62 = vsel %vm2284_vm8, %v3392_v56, %v3780_v23  ;;  %v3422_v31 = vrot.slane %v3421_v41, 4  ;;  %v3428_v28 = vsel %vm1496_vm6, %v3138_v35, -inf }
 0x380   : > { %v10487_v34 = vmax.f32 %v3404_v61, %v3405_v27  ;;  %v10490_v0 = vsel %vm2292_vm12, %v3399_v7, %v3723_v24  ;;  %v10493_v63 = vsel %vm2286_vm10, %v3399_v7, %v3781_v62  ;;  %v3410_v29 = vrot.slane %v3409_v54, 2 }
 0x381   : > { %v3416_v14 = vmax.f32 %v3414_v51, %v3415_v48  ;;  %v3423_v4 = vmax.f32 %v3421_v41, %v3422_v31  ;;  %v3429_v17 = vrot.slane %v3428_v28, 4  ;;  %v2934_v57 = vadd.f32 %v10440_v38, %v10318_v52 }
 0x382   : > { %v3411_v60 = vmax.f32 %v3409_v54, %v3410_v29  ;;  %v7492_v40 = vadd.f32 %v10409_v33, %v10403_v5  ;;  %v7495_v47 = vadd.f32 %v10418_v6, %v10413_v50  ;;  %v7498_v36 = vadd.f32 %v10444_v1, %v10442_v46 }
 0x383   : > { %v3417_v25 = vrot.slane %v3416_v14, 2  ;;  %v3424_v45 = vrot.slane %v3423_v4, 2  ;;  %v3430_v59 = vmax.f32 %v3428_v28, %v3429_v17  ;;  %v3015_v61 = vadd.f32 %v10313_v10, %v2934_v57 }
 0x384   : > { %v3412_v35 = vrot.slane %v3411_v60, 1  ;;  %v2939_v26 = vadd.f32 %v7492_v40, %v10318_v52  ;;  %v2942_v38 = vadd.f32 %v7495_v47, %v10318_v52  ;;  %v10507_v51 = vadd.f32 %v7498_v36, %v10318_v52 }
 0x385   : > { %v3418_v5 = vmax.f32 %v3416_v14, %v3417_v25  ;;  %v3425_v33 = vmax.f32 %v3423_v4, %v3424_v45  ;;  %v3431_v56 = vrot.slane %v3430_v59, 2  ;;  %v3139_v50 = vcombine.high %v3015_v61, %v3015_v61 }
 0x386   : > { %v10509_v6 = vmax.f32 %v3411_v60, %v3412_v35  ;;  %v3146_v46 = vrot.slane %v3015_v61, %v11872_v20  ;;  %v3020_v1 = vadd.f32 %v10300_v30, %v2939_v26  ;;  %v10514_v10 = vadd.f32 %v10308_v16, %v2942_v38 }
 0x387   : > { %v3419_v7 = vrot.slane %v3418_v5, 1  ;;  %v3426_v9 = vrot.slane %v3425_v33, 1  ;;  %v3432_v23 = vmax.f32 %v3430_v59, %v3431_v56  ;;  %v3153_v27 = vrot.slane %v3139_v50, %v11872_v20 }
 0x388   : > { %v3154_v54 = vcombine.high %v3146_v46, %v3146_v46  ;;  %v3435_v48 = vsel %vm1496_vm6, %v3146_v46, -inf  ;;  %v3156_v41 = vcombine.high %v3020_v1, %v3020_v1  ;;  %v3163_v24 = vrot.slane %v3020_v1, %v11872_v20 }
 0x389   : > { %v10519_v62 = vmax.f32 %v3418_v5, %v3419_v7  ;;  %v10521_v31 = vmax.f32 %v3425_v33, %v3426_v9  ;;  %v3433_v28 = vrot.slane %v3432_v23, 1  ;;  %v3155_v30 = vcombine.high %v3153_v27, %v3153_v27 }
 0x38a   : > { %v3436_v29 = vrot.slane %v3435_v48, 4  ;;  %v3442_v16 = vsel %vm1496_vm6, %v3154_v54, -inf  ;;  %v3449_v14 = vsel %vm1496_vm6, %v3153_v27, -inf  ;;  %v3170_v4 = vrot.slane %v3156_v41, %v11872_v20 }
 0x38b   : > { %v3434_v17 = vmax.f32 %v3432_v23, %v3433_v28  ;;  %v3726_v57 = vsel %vm2282_vm7, %v10519_v62, %v10509_v6  ;;  %v3443_v60 = vrot.slane %v3442_v16, 4  ;;  %v3450_v40 = vrot.slane %v3449_v14, 4 }
 0x38c   : > { %v3727_v47 = vsel %vm2284_vm8, %v10521_v31, %v3726_v57  ;;  %v3437_v36 = vmax.f32 %v3435_v48, %v3436_v29  ;;  %v3456_v25 = vsel %vm1496_vm6, %v3155_v30, -inf  ;;  %v3171_v45 = vcombine.high %v3163_v24, %v3163_v24 }
 0x38d   : > { %v3444_v59 = vmax.f32 %v3442_v16, %v3443_v60  ;;  %v3451_v61 = vmax.f32 %v3449_v14, %v3450_v40  ;;  %v3457_v35 = vrot.slane %v3456_v25, 4  ;;  %v3728_v26 = vsel %vm2286_vm10, %v3434_v17, %v3727_v47 }
 0x38e   : > { %v3438_v38 = vrot.slane %v3437_v36, 2  ;;  %v3172_v5 = vcombine.high %v3170_v4, %v3170_v4  ;;  %v3463_v33 = vsel %vm1496_vm6, %v3163_v24, -inf  ;;  %v3470_v56 = vsel %vm1496_vm6, %v3171_v45, -inf }
 0x38f   : > { %v3445_v50 = vrot.slane %v3444_v59, 2  ;;  %v3452_v46 = vrot.slane %v3451_v61, 2  ;;  %v3458_v1 = vmax.f32 %v3456_v25, %v3457_v35  ;;  %v3464_v7 = vrot.slane %v3463_v33, 4 }
 0x390   : > { %v3439_v9 = vmax.f32 %v3437_v36, %v3438_v38  ;;  %v3471_v23 = vrot.slane %v3470_v56, 4  ;;  %v3477_v27 = vsel %vm1496_vm6, %v3170_v4, -inf  ;;  %v3484_v54 = vsel %vm1496_vm6, %v3172_v5, -inf }
 0x391   : > { %v3446_v48 = vmax.f32 %v3444_v59, %v3445_v50  ;;  %v3453_v41 = vmax.f32 %v3451_v61, %v3452_v46  ;;  %v3459_v28 = vrot.slane %v3458_v1, 2  ;;  %v3465_v30 = vmax.f32 %v3463_v33, %v3464_v7 }
 0x392   : > { %v3440_v29 = vrot.slane %v3439_v9, 1  ;;  %v3472_v16 = vmax.f32 %v3470_v56, %v3471_v23  ;;  %v3478_v14 = vrot.slane %v3477_v27, 4  ;;  %v3485_v24 = vrot.slane %v3484_v54, 4 }
 0x393   : > { %v3447_v57 = vrot.slane %v3446_v48, 1  ;;  %v3454_v60 = vrot.slane %v3453_v41, 1  ;;  %v3460_v40 = vmax.f32 %v3458_v1, %v3459_v28  ;;  %v3466_v47 = vrot.slane %v3465_v30, 2 }
 0x394   : > { %v3441_v25 = vmax.f32 %v3439_v9, %v3440_v29  ;;  %v3473_v45 = vrot.slane %v3472_v16, 2  ;;  %v3479_v36 = vmax.f32 %v3477_v27, %v3478_v14  ;;  %v3486_v35 = vmax.f32 %v3484_v54, %v3485_v24 }
 0x395   : > { %v3448_v38 = vmax.f32 %v3446_v48, %v3447_v57  ;;  %v3455_v4 = vmax.f32 %v3453_v41, %v3454_v60  ;;  %v3461_v12 = vrot.slane %v3460_v40, 1  ;;  %v3467_v5 = vmax.f32 %v3465_v30, %v3466_v47 }
 0x396   : > { %v3729_v59 = vsel %vm2288_vm9, %v3441_v25, %v3728_v26  ;;  %v3787_v61 = vsel %vm2282_vm7, %v3441_v25, %v3434_v17  ;;  %v3474_v33 = vmax.f32 %v3472_v16, %v3473_v45  ;;  %v3480_v56 = vrot.slane %v3479_v36, 2 }
 0x397   : > { %v10539_v50 = vmax.f32 %v3460_v40, %v3461_v12  ;;  %v3730_v46 = vsel %vm2290_vm11, %v3448_v38, %v3729_v59  ;;  %v3788_v1 = vsel %vm2284_vm8, %v3448_v38, %v3787_v61  ;;  %v3468_v7 = vrot.slane %v3467_v5, 1 }
 0x398   : > { %v10544_v9 = vsel %vm2292_vm12, %v3455_v4, %v3730_v46  ;;  %v10547_v23 = vsel %vm2286_vm10, %v3455_v4, %v3788_v1  ;;  %v3475_v27 = vrot.slane %v3474_v33, 1  ;;  %v3481_v54 = vmax.f32 %v3479_v36, %v3480_v56 }
 0x399   : > { %11873 = vst [vmem:[#allocation12_spill] sm:$0xff] %v10544_v9  ;;  %v10549_v26 = vmax.f32 %v3467_v5, %v3468_v7  ;;  %v3487_v17 = vrot.slane %v3486_v35, 2  ;;  %v3173_v12 = vcombine.high %v10514_v10, %v10514_v10  ;;  %v3180_v48 = vrot.slane %v10514_v10, %v11872_v20 }
 0x39a   : > { %v10555_v41 = vmax.f32 %v3474_v33, %v3475_v27  ;;  %v3482_v28 = vrot.slane %v3481_v54, 1  ;;  %v3028_v30 = vadd.f32 %v10350_v32, %v10507_v51  ;;  %v10561_v29 = vadd.f32 %v10451_v49, %v10449_v21 }
 0x39b   : > { %v3488_v16 = vmax.f32 %v3486_v35, %v3487_v17  ;;  %v3187_v14 = vrot.slane %v3173_v12, %v11872_v20  ;;  %v3188_v24 = vcombine.high %v3180_v48, %v3180_v48  ;;  %v3491_v57 = vsel %vm1496_vm6, %v3180_v48, -inf }
 0x39c   : > { %v10565_v60 = vmax.f32 %v3481_v54, %v3482_v28  ;;  %v3733_v10 = vsel %vm2282_vm7, %v10555_v41, %v10549_v26  ;;  %v3492_v40 = vrot.slane %v3491_v57, 4  ;;  %v3190_v47 = vcombine.high %v3028_v30, %v3028_v30 }
 0x39d   : > { %v3489_v25 = vrot.slane %v3488_v16, 1  ;;  %v3189_v32 = vcombine.high %v3187_v14, %v3187_v14  ;;  %v3498_v51 = vsel %vm1496_vm6, %v3188_v24, -inf  ;;  %v3505_v21 = vsel %vm1496_vm6, %v3187_v14, -inf }
 0x39e   : > { %v3734_v49 = vsel %vm2284_vm8, %v10565_v60, %v3733_v10  ;;  %v3493_v45 = vmax.f32 %v3491_v57, %v3492_v40  ;;  %v3499_v36 = vrot.slane %v3498_v51, 4  ;;  %v3506_v35 = vrot.slane %v3505_v21, 4 }
 0x39f   : > { %v3490_v38 = vmax.f32 %v3488_v16, %v3489_v25  ;;  %v3512_v4 = vsel %vm1496_vm6, %v3189_v32, -inf  ;;  %v3197_v5 = vrot.slane %v3028_v30, %v11872_v20  ;;  %v3204_v59 = vrot.slane %v3190_v47, %v11872_v20 }
 0x3a0   : > { %v3494_v61 = vrot.slane %v3493_v45, 2  ;;  %v3500_v33 = vmax.f32 %v3498_v51, %v3499_v36  ;;  %v3507_v56 = vmax.f32 %v3505_v21, %v3506_v35  ;;  %v3513_v46 = vrot.slane %v3512_v4, 4 }
 0x3a1   : > { %v3735_v1 = vsel %vm2286_vm10, %v3490_v38, %v3734_v49  ;;  %v3205_v7 = vcombine.high %v3197_v5, %v3197_v5  ;;  %v3206_v27 = vcombine.high %v3204_v59, %v3204_v59  ;;  %v3519_v54 = vsel %vm1496_vm6, %v3197_v5, -inf }
 0x3a2   : > { %v3495_v17 = vmax.f32 %v3493_v45, %v3494_v61  ;;  %v3501_v12 = vrot.slane %v3500_v33, 2  ;;  %v3508_v48 = vrot.slane %v3507_v56, 2  ;;  %v3514_v28 = vmax.f32 %v3512_v4, %v3513_v46 }
 0x3a3   : > { %v3520_v16 = vrot.slane %v3519_v54, 4  ;;  %v3526_v14 = vsel %vm1496_vm6, %v3205_v7, -inf  ;;  %v3533_v30 = vsel %vm1496_vm6, %v3204_v59, -inf  ;;  %v3540_v24 = vsel %vm1496_vm6, %v3206_v27, -inf }
 0x3a4   : > { %v3496_v57 = vrot.slane %v3495_v17, 1  ;;  %v3502_v10 = vmax.f32 %v3500_v33, %v3501_v12  ;;  %v3509_v40 = vmax.f32 %v3507_v56, %v3508_v48  ;;  %v3515_v47 = vrot.slane %v3514_v28, 2 }
 0x3a5   : > { %v3521_v25 = vmax.f32 %v3519_v54, %v3520_v16  ;;  %v3527_v32 = vrot.slane %v3526_v14, 4  ;;  %v3534_v51 = vrot.slane %v3533_v30, 4  ;;  %v3541_v21 = vrot.slane %v3540_v24, 4 }
 0x3a6   : > { %v3497_v49 = vmax.f32 %v3495_v17, %v3496_v57  ;;  %v3503_v45 = vrot.slane %v3502_v10, 1  ;;  %v3510_v36 = vrot.slane %v3509_v40, 1  ;;  %v3516_v35 = vmax.f32 %v3514_v28, %v3515_v47 }
 0x3a7   : > { %v3522_v4 = vrot.slane %v3521_v25, 2  ;;  %v3528_v5 = vmax.f32 %v3526_v14, %v3527_v32  ;;  %v3535_v61 = vmax.f32 %v3533_v30, %v3534_v51  ;;  %v3542_v46 = vmax.f32 %v3540_v24, %v3541_v21 }
 0x3a8   : > { %v3504_v7 = vmax.f32 %v3502_v10, %v3503_v45  ;;  %v3511_v59 = vmax.f32 %v3509_v40, %v3510_v36  ;;  %v3517_v9 = vrot.slane %v3516_v35, 1  ;;  %v3736_v27 = vsel %vm2288_vm9, %v3497_v49, %v3735_v1 }
 0x3a9   : > { %v3794_v33 = vsel %vm2282_vm7, %v3497_v49, %v3490_v38  ;;  %v3523_v56 = vmax.f32 %v3521_v25, %v3522_v4  ;;  %v3529_v54 = vrot.slane %v3528_v5, 2  ;;  %v3536_v12 = vrot.slane %v3535_v61, 2 }
 0x3aa   : > { %v10584_v48 = vmax.f32 %v3516_v35, %v3517_v9  ;;  %v3737_v17 = vsel %vm2290_vm11, %v3504_v7, %v3736_v27  ;;  %v3795_v28 = vsel %vm2284_vm8, %v3504_v7, %v3794_v33  ;;  %v3543_v16 = vrot.slane %v3542_v46, 2 }
 0x3ab   : > { %v10589_v14 = vsel %vm2292_vm12, %v3511_v59, %v3737_v17  ;;  %v10592_v30 = vsel %vm2286_vm10, %v3511_v59, %v3795_v28  ;;  %v3524_v24 = vrot.slane %v3523_v56, 1  ;;  %v3530_v1 = vmax.f32 %v3528_v5, %v3529_v54 }
 0x3ac   : > { %v3537_v57 = vmax.f32 %v3535_v61, %v3536_v12  ;;  %v3544_v38 = vmax.f32 %v3542_v46, %v3543_v16  ;;  %v2950_v10 = vadd.f32 %v10561_v29, %v10318_v52  ;;  %v7504_v9 = vadd.f32 %v10465_v42, %v10458_v22 }
 0x3ad   : > { %v10598_v40 = vmax.f32 %v3523_v56, %v3524_v24  ;;  %v3531_v47 = vrot.slane %v3530_v1, 1  ;;  %v7507_v25 = vadd.f32 %v10473_v43, %v10467_v53  ;;  %v3771_v32 = vsel %vm2292_vm12, %v10391_v15, %v10389_v58 }
 0x3ae   : > { %v3538_v51 = vrot.slane %v3537_v57, 1  ;;  %v3545_v21 = vrot.slane %v3544_v38, 1  ;;  %v3031_v49 = vadd.f32 %v10368_v3, %v2950_v10  ;;  %v2955_v45 = vadd.f32 %v7504_v9, %v10318_v52 }
 0x3af   : > { %v10607_v29 = vmax.f32 %v3530_v1, %v3531_v47  ;;  %v2958_v22 = vadd.f32 %v7507_v25, %v10318_v52  ;;  %v10612_v42 = vsel %vm2294_vm13, %v10393_v11, %v3771_v32  ;;  %v3776_v53 = vsel %vm2288_vm9, %v10420_v44, %v10431_v18 }
 0x3b0   : > { %v10617_v43 = vmax.f32 %v3537_v57, %v3538_v51  ;;  %v10619_v58 = vmax.f32 %v3544_v38, %v3545_v21  ;;  %v3207_v15 = vcombine.high %v3031_v49, %v3031_v49  ;;  %v3214_v3 = vrot.slane %v3031_v49, %v11872_v20 }
 0x3b1   : > { %v3740_v36 = vsel %vm2282_vm7, %v10607_v29, %v10598_v40  ;;  %v3036_v52 = vadd.f32 %v10343_v37, %v2955_v45  ;;  %v3039_v11 = vadd.f32 %v10361_v19, %v2958_v22  ;;  %v10629_v35 = vsel %vm2290_vm11, %v10456_v2, %v3776_v53 }
 0x3b2   : > { %v3741_v18 = vsel %vm2284_vm8, %v10617_v43, %v3740_v36  ;;  %v3221_v4 = vrot.slane %v3207_v15, %v11872_v20  ;;  %v3222_v5 = vcombine.high %v3214_v3, %v3214_v3  ;;  %v3547_v61 = vsel %vm1496_vm6, %v3214_v3, -inf }
 0x3b3   : > { %v3548_v46 = vrot.slane %v3547_v61, 4  ;;  %v3742_v7 = vsel %vm2286_vm10, %v10619_v58, %v3741_v18  ;;  %v3224_v59 = vcombine.high %v3036_v52, %v3036_v52  ;;  %v3231_v37 = vrot.slane %v3036_v52, %v11872_v20 }
 0x3b4   : > { %v3223_v19 = vcombine.high %v3221_v4, %v3221_v4  ;;  %v3554_v27 = vsel %vm1496_vm6, %v3222_v5, -inf  ;;  %v3561_v2 = vsel %vm1496_vm6, %v3221_v4, -inf  ;;  %v3247_v33 = vrot.slane %v3039_v11, %v11872_v20 }
 0x3b5   : > { %v3549_v56 = vmax.f32 %v3547_v61, %v3548_v46  ;;  %v3555_v54 = vrot.slane %v3554_v27, 4  ;;  %v3562_v12 = vrot.slane %v3561_v2, 4  ;;  %v3238_v17 = vrot.slane %v3224_v59, %v11872_v20 }
 0x3b6   : > { %v3568_v28 = vsel %vm1496_vm6, %v3223_v19, -inf  ;;  %v3239_v16 = vcombine.high %v3231_v37, %v3231_v37  ;;  %v3575_v24 = vsel %vm1496_vm6, %v3231_v37, -inf  ;;  %v3248_v1 = vcombine.high %v3247_v33, %v3247_v33 }
 0x3b7   : > { %v3550_v57 = vrot.slane %v3549_v56, 2  ;;  %v3556_v38 = vmax.f32 %v3554_v27, %v3555_v54  ;;  %v3563_v10 = vmax.f32 %v3561_v2, %v3562_v12  ;;  %v3569_v9 = vrot.slane %v3568_v28, 4 }
 0x3b8   : > { %v3240_v47 = vcombine.high %v3238_v17, %v3238_v17  ;;  %v3576_v25 = vrot.slane %v3575_v24, 4  ;;  %v3582_v32 = vsel %vm1496_vm6, %v3239_v16, -inf  ;;  %v3589_v51 = vsel %vm1496_vm6, %v3238_v17, -inf }
 0x3b9   : > { %v3551_v21 = vmax.f32 %v3549_v56, %v3550_v57  ;;  %v3557_v49 = vrot.slane %v3556_v38, 2  ;;  %v3564_v45 = vrot.slane %v3563_v10, 2  ;;  %v3570_v22 = vmax.f32 %v3568_v28, %v3569_v9 }
 0x3ba   : > { %v3577_v53 = vmax.f32 %v3575_v24, %v3576_v25  ;;  %v3583_v15 = vrot.slane %v3582_v32, 4  ;;  %v3590_v3 = vrot.slane %v3589_v51, 4  ;;  %v3596_v36 = vsel %vm1496_vm6, %v3240_v47, -inf }
 0x3bb   : > { %v3552_v52 = vrot.slane %v3551_v21, 1  ;;  %v3558_v11 = vmax.f32 %v3556_v38, %v3557_v49  ;;  %v3565_v18 = vmax.f32 %v3563_v10, %v3564_v45  ;;  %v3571_v4 = vrot.slane %v3570_v22, 2 }
 0x3bc   : > { %v3578_v5 = vrot.slane %v3577_v53, 2  ;;  %v3584_v61 = vmax.f32 %v3582_v32, %v3583_v15  ;;  %v3591_v46 = vmax.f32 %v3589_v51, %v3590_v3  ;;  %v3597_v59 = vrot.slane %v3596_v36, 4 }
 0x3bd   : > { %v3553_v37 = vmax.f32 %v3551_v21, %v3552_v52  ;;  %v3559_v19 = vrot.slane %v3558_v11, 1  ;;  %v3566_v27 = vrot.slane %v3565_v18, 1  ;;  %v3572_v2 = vmax.f32 %v3570_v22, %v3571_v4 }
 0x3be   : > { %v3579_v56 = vmax.f32 %v3577_v53, %v3578_v5  ;;  %v3585_v54 = vrot.slane %v3584_v61, 2  ;;  %v3592_v12 = vrot.slane %v3591_v46, 2  ;;  %v3598_v17 = vmax.f32 %v3596_v36, %v3597_v59 }
 0x3bf   : > { %v3560_v28 = vmax.f32 %v3558_v11, %v3559_v19  ;;  %v10647_v16 = vmax.f32 %v3565_v18, %v3566_v27  ;;  %v3573_v24 = vrot.slane %v3572_v2, 1  ;;  %v3743_v57 = vsel %vm2288_vm9, %v3553_v37, %v3742_v7 }
 0x3c0   : > { %v3801_v38 = vsel %vm2282_vm7, %v3553_v37, %v10619_v58  ;;  %v3580_v10 = vrot.slane %v3579_v56, 1  ;;  %v3586_v9 = vmax.f32 %v3584_v61, %v3585_v54  ;;  %v3593_v47 = vmax.f32 %v3591_v46, %v3592_v12 }
 0x3c1   : > { %v10652_v25 = vmax.f32 %v3572_v2, %v3573_v24  ;;  %v10655_v32 = vsel %vm2290_vm11, %v3560_v28, %v3743_v57  ;;  %v3802_v51 = vsel %vm2284_vm8, %v3560_v28, %v3801_v38  ;;  %v3599_v21 = vrot.slane %v3598_v17, 2  ;;  %v11874_v57 = vld [vmem:[#allocation12_spill] sm:$0xff] }
 0x3c2   : > { %v10660_v49 = vsel %vm2286_vm10, %v10647_v16, %v3802_v51  ;;  %v10662_v45 = vmax.f32 %v3579_v56, %v3580_v10  ;;  %v3587_v7 = vrot.slane %v3586_v9, 1  ;;  %v3594_v22 = vrot.slane %v3593_v47, 1 }
 0x3c3   : > { %v3600_v58 = vmax.f32 %v3598_v17, %v3599_v21  ;;  %v3603_v53 = vsel %vm1496_vm6, %v3247_v33, -inf  ;;  %v3610_v15 = vsel %vm1496_vm6, %v3248_v1, -inf  ;;  %v3778_v3 = vsel %vm2292_vm12, %v10460_v13, %v10629_v35 }
 0x3c4   : > { %v10669_v36 = vmax.f32 %v3586_v9, %v3587_v7  ;;  %v10671_v52 = vmax.f32 %v3593_v47, %v3594_v22  ;;  %v3604_v11 = vrot.slane %v3603_v53, 4  ;;  %v3611_v18 = vrot.slane %v3610_v15, 4 }
 0x3c5   : > { %v3601_v4 = vrot.slane %v3600_v58, 1  ;;  %v3779_v5 = vsel %vm2294_vm13, %v10462_v8, %v3778_v3  ;;  %v3783_v33 = vsel %vm2288_vm9, %v10487_v34, %v10493_v63  ;;  %v3790_v1 = vsel %vm2288_vm9, %v10539_v50, %v10547_v23 }
 0x3c6   : > { %v3747_v13 = vsel %vm2282_vm7, %v10669_v36, %v10662_v45  ;;  %v3605_v35 = vmax.f32 %v3603_v53, %v3604_v11  ;;  %v3612_v61 = vmax.f32 %v3610_v15, %v3611_v18  ;;  %v3784_v46 = vsel %vm2290_vm11, %v10509_v6, %v3783_v33 }
 0x3c7   : > { %v10686_v59 = vmax.f32 %v3600_v58, %v3601_v4  ;;  %v3748_v8 = vsel %vm2284_vm8, %v10671_v52, %v3747_v13  ;;  %v3785_v63 = vsel %vm2292_vm12, %v10519_v62, %v3784_v46  ;;  %v3791_v23 = vsel %vm2290_vm11, %v10549_v26, %v3790_v1 }
 0x3c8   : > { %v3606_v37 = vrot.slane %v3605_v35, 2  ;;  %v3613_v19 = vrot.slane %v3612_v61, 2  ;;  %v3786_v27 = vsel %vm2294_vm13, %v10521_v31, %v3785_v63  ;;  %v3792_v6 = vsel %vm2292_vm12, %v10555_v41, %v3791_v23 }
 0x3c9   : > { %v3749_v2 = vsel %vm2286_vm10, %v10686_v59, %v3748_v8  ;;  %v3793_v56 = vsel %vm2294_vm13, %v10565_v60, %v3792_v6  ;;  %v3837_v62 = vpack.c.bf16 %v3779_v5, %v10612_v42  ;;  %v3717_v26 = vsel %vm2292_vm12, %v10407_v55, %v10425_v39 }
 0x3ca   : > { %v3607_v54 = vmax.f32 %v3605_v35, %v3606_v37  ;;  %v3614_v12 = vmax.f32 %v3612_v61, %v3613_v19  ;;  %v3840_v17 = vpack.c.bf16 %v3793_v56, %v3786_v27  ;;  %v3718_v31 = vsel %vm2294_vm13, %v10420_v44, %v3717_v26 }
 0x3cb   : > { %v3873_v28 = vshrl.u32 %v3837_v62, 16  ;;  %v3876_v41 = vshll.u32 %v3837_v62, 16  ;;  %v3725_v24 = vsel %vm2294_vm13, %v10487_v34, %v10490_v0  ;;  %v3732_v60 = vsel %vm2294_vm13, %v10539_v50, %v11874_v57 }
 0x3cc   : > { %v3608_v42 = vrot.slane %v3607_v54, 1  ;;  %v3615_v38 = vrot.slane %v3614_v12, 1  ;;  %v3881_v10 = vshrl.u32 %v3840_v17, 16  ;;  %v3884_v55 = vshll.u32 %v3840_v17, 16 }
 0x3cd   : > { %v3875_v39 = vrot.slane %v3873_v28, 2  ;;  %v3878_v9 = vrot.slane %v3876_v41, 3  ;;  %v10717_v44 = vsel %vm2294_vm13, %v10584_v48, %v10589_v14  ;;  %v3759_v47 = vrot.slane %v3718_v31, 2 }
 0x3ce   : > { %v10719_v51 = vmax.f32 %v3607_v54, %v3608_v42  ;;  %v10721_v21 = vmax.f32 %v3614_v12, %v3615_v38  ;;  %v3883_v34 = vrot.slane %v3881_v10, 2  ;;  %v3886_v0 = vrot.slane %v3884_v55, 3 }
 0x3cf   : > { %v3879_v7 = vor.u32 %v3878_v9, %v3875_v39  ;;  %v3818_v50 = vrot.slane %v3718_v31, 4  ;;  %v3819_v22 = vrot.slane %v3725_v24, 4  ;;  %v3821_v58 = vrot.slane %v3732_v60, 4 }
 0x3d0   : > { %v3750_v53 = vsel %vm2288_vm9, %v10719_v51, %v3749_v2  ;;  %v10725_v15 = vor.u32 %v3886_v0, %v3883_v34  ;;  %v3823_v3 = vrot.slane %v10717_v44, 4  ;;  %v3761_v4 = vrot.slane %v3725_v24, 2 }
 0x3d1   : > { %v3820_v14 = vsel %vm858_vm0, %v3818_v50, %v3819_v22  ;;  %v3822_v11 = vsel %vm858_vm0, %v3819_v22, %v3821_v58  ;;  %v3751_v18 = vsel %vm2290_vm11, %v10721_v21, %v3750_v53  ;;  %v3762_v61 = vrot.slane %v3732_v60, 2 }
 0x3d2   : > { %v3888_v5 = vsel %vm3854_vm2, %v3879_v7, %v10725_v15  ;;  %v3824_v33 = vsel %vm858_vm0, %v3821_v58, %v3823_v3  ;;  %v3838_v1 = vpack.c.bf16 %v3820_v14, %v3818_v50  ;;  %v3760_v13 = vsel %vm3758_vm3, %v3759_v47, %v3751_v18 }
 0x3d3   : > { %4145 = vmatprep.mubr.bf16.mxu1 %v3888_v5  ;;  %v3841_v35 = vpack.c.bf16 %v3824_v33, %v3822_v11  ;;  %v3763_v46 = vrot.slane %v10717_v44, 2  ;;  %v3766_v8 = vsel %vm3758_vm3, %v3761_v4, %v3759_v47  ;;  %v3797_v19 = vsel %vm2288_vm9, %v10584_v48, %v10592_v30 }
 0x3d4   : > { %v3890_v63 = vshrl.u32 %v3838_v1, 16  ;;  %v3893_v23 = vshll.u32 %v3838_v1, 16  ;;  %v3836_v37 = vpack.c.bf16 %v3766_v8, %v3760_v13  ;;  %v3767_v2 = vsel %vm3758_vm3, %v3762_v61, %v3761_v4 }
 0x3d5   : > { %v3898_v27 = vshrl.u32 %v3841_v35, 16  ;;  %v3901_v6 = vshll.u32 %v3841_v35, 16  ;;  %v3768_v56 = vsel %vm3758_vm3, %v3763_v46, %v3762_v61  ;;  %v3798_v41 = vsel %vm2290_vm11, %v10598_v40, %v3797_v19 }
 0x3d6   : > { %v3892_v62 = vrot.slane %v3890_v63, 2  ;;  %v3895_v26 = vrot.slane %v3893_v23, 3  ;;  %v3839_v54 = vpack.c.bf16 %v3768_v56, %v3767_v2  ;;  %v3856_v12 = vshrl.u32 %v3836_v37, 16 }
 0x3d7   : > { %v3900_v17 = vrot.slane %v3898_v27, 2  ;;  %v3903_v31 = vrot.slane %v3901_v6, 3  ;;  %v3859_v28 = vshll.u32 %v3836_v37, 16  ;;  %v3799_v38 = vsel %vm2292_vm12, %v10607_v29, %v3798_v41 }
 0x3d8   : > { %v3896_v24 = vor.u32 %v3895_v26, %v3892_v62  ;;  %v3858_v57 = vrot.slane %v3856_v12, 2  ;;  %v3864_v60 = vshrl.u32 %v3839_v54, 16  ;;  %v3867_v48 = vshll.u32 %v3839_v54, 16 }
 0x3d9   : > { %v3904_v30 = vor.u32 %v3903_v31, %v3900_v17  ;;  %v3861_v42 = vrot.slane %v3859_v28, 3  ;;  %v3804_v10 = vsel %vm2288_vm9, %v10652_v25, %v10660_v49  ;;  %v3800_v9 = vsel %vm2294_vm13, %v10617_v43, %v3799_v38 }
 0x3da   : > { %v3866_v55 = vrot.slane %v3864_v60, 2  ;;  %v3869_v39 = vrot.slane %v3867_v48, 3  ;;  %v3805_v40 = vsel %vm2290_vm11, %v10662_v45, %v3804_v10  ;;  %v3745_v29 = vsel %vm2292_vm12, %v10647_v16, %v10655_v32 }
 0x3db   : > { %v3905_v47 = vsel %vm3854_vm2, %v3896_v24, %v3904_v30  ;;  %v3862_v34 = vor.u32 %v3861_v42, %v3858_v57  ;;  %v3806_v0 = vsel %vm2292_vm12, %v10669_v36, %v3805_v40  ;;  %v3746_v43 = vsel %vm2294_vm13, %v10652_v25, %v3745_v29  ;;  %v8547_v40 = vld [vmem:[%s11749_s7 + $0x40] sm:$0xff]   ;;  %v8551_v29 = vld [vmem:[%s11749_s7 + $0x50] sm:$0xff]  }
 0x3dc   : > { %7853 = vmatmul.mubr.bf16.vlgmr.msra.gmra.mrb[36].mxu0 %v3905_v47  ;;  %v3870_v49 = vor.u32 %v3869_v39, %v3866_v55  ;;  %v3807_v7 = vsel %vm2294_vm13, %v10671_v52, %v3806_v0  ;;  %v3827_v50 = vrot.slane %v3760_v13, 4  ;;  %v11875_v22 = vmov 0.0   ;;  %v8548_v47 = vld [vmem:[%s11749_s7 + $0x8] sm:$0xff]   ;;  %v8550_v0 = vld [vmem:[%s11749_s7 + $0x10] sm:$0xff]  }
 0x3dd   : > { %v3843_v45 = vpack.c.bf16 %v3807_v7, %v3800_v9  ;;  %7856 = vmatprep.mubr.msk.bf16.mxu0 %vm8803_vm1, %v11875_v22  ;;  %v3825_v58 = vrot.slane %v3746_v43, 4  ;;  %v3764_v53 = vrot.slane %v3746_v43, 2  ;;  %v3765_v36 = vrot.slane %v3760_v13, 2  ;;  %v8546_v9 = vld [vmem:[%s11749_s7] sm:$0xff]   ;;  %7885 = vmatpush3.bf16.msra.mxu0 %v8547_v40  ;;  %v8553_v7 = vld [vmem:[%s11749_s7 + $0x58] sm:$0xff]  }
 0x3de   : > { %v3871_v14 = vsel %vm3854_vm2, %v3862_v34, %v3870_v49  ;;  %v3808_v16 = vsel %vm2282_vm7, %v10719_v51, %v10686_v59  ;;  %v3847_v32 = vpack.c.bf16 %v3827_v50, %v3827_v50  ;;  %v8549_v34 = vld [vmem:[%s11749_s7 + $0x48] sm:$0xff]   ;;  %7886 = vmatprep.subr.bf16.mxu0 %v11875_v22  ;;  %v8554_v43 = vld [vmem:[%s11749_s7 + $0x20] sm:$0xff]  }
 0x3df   : > { %4146 = vmatmul.mubr.bf16.vlgmr.msra.gmra.mrb[24].mxu1 %v3871_v14  ;;  %v3916_v52 = vshrl.u32 %v3843_v45, 16  ;;  %v3919_v11 = vshll.u32 %v3843_v45, 16  ;;  %v3826_v25 = vsel %vm858_vm0, %v3823_v3, %v3825_v58  ;;  %v3828_v18 = vsel %vm858_vm0, %v3825_v58, %v3827_v50  ;;  %v8555_v50 = vld [vmem:[%s11749_s7 + $0x60] sm:$0xff]   ;;  %v8556_v45 = vld [vmem:[%s11749_s7 + $0x28] sm:$0xff]   ;;  %v8560_v14 = vld [vmem:[%s11749_s7 + $0x38] sm:$0xff]  }
 0x3e0   : > { %v3844_v4 = vpack.c.bf16 %v3828_v18, %v3826_v25  ;;  %v3769_v5 = vsel %vm3758_vm3, %v3764_v53, %v3763_v46  ;;  %v3770_v33 = vsel %vm3758_vm3, %v3765_v36, %v3764_v53  ;;  %v3809_v1 = vsel %vm2284_vm8, %v10721_v21, %v3808_v16  ;;  %7865 = vmatpush3.bf16.msra.mxu1 %v8546_v9  ;;  %v8557_v58 = vld [vmem:[%s11749_s7 + $0x68] sm:$0xff]   ;;  %v8558_v53 = vld [vmem:[%s11749_s7 + $0x30] sm:$0xff]   ;;  %v8561_v16 = vld [vmem:[%s11749_s7 + $0x78] sm:$0xff]  }
 0x3e1   : > { %v3918_v13 = vrot.slane %v3916_v52, 2  ;;  %v3921_v59 = vrot.slane %v3919_v11, 3  ;;  %v3842_v51 = vpack.c.bf16 %v3770_v33, %v3769_v5  ;;  %v3846_v35 = vpack.c.bf16 %v3809_v1, %v3809_v1  ;;  %7866 = vmatprep.subr.bf16.mxu1 %v11875_v22  ;;  %7887 = vmatpush3.bf16.msra.mxu0 %v8549_v34 }
 0x3e2   : > { %v3925_v61 = vshrl.u32 %v3844_v4, 16  ;;  %v3928_v8 = vshll.u32 %v3844_v4, 16  ;;  %v3952_v63 = vshrl.u32 %v3847_v32, 16  ;;  %v3955_v44 = vshll.u32 %v3847_v32, 16  ;;  %7888 = vmatprep.subr.bf16.mxu0 %v11875_v22  ;;  %v7224_v4 = vld [vmem:[%s11748_s6] ss:$0 sm:$0xff] }
 0x3e3   : > { %v3922_v23 = vor.u32 %v3921_v59, %v3918_v13  ;;  %v3907_v3 = vshrl.u32 %v3842_v51, 16  ;;  %v3910_v37 = vshll.u32 %v3842_v51, 16  ;;  %v3943_v19 = vshrl.u32 %v3846_v35, 16 }
 0x3e4   : > { %v3927_v27 = vrot.slane %v3925_v61, 2  ;;  %v3930_v6 = vrot.slane %v3928_v8, 3  ;;  %v3946_v46 = vshll.u32 %v3846_v35, 16  ;;  %v3954_v2 = vrot.slane %v3952_v63, 2  ;;  %7867 = vmatpush3.bf16.msra.mxu1 %v8548_v47 }
 0x3e5   : > { %v3923_v56 = vsel %vm3854_vm2, %v10725_v15, %v3922_v23  ;;  %v3909_v21 = vrot.slane %v3907_v3, 2  ;;  %v3912_v62 = vrot.slane %v3910_v37, 3  ;;  %v3945_v26 = vrot.slane %v3943_v19, 2  ;;  %7868 = vmatprep.subr.bf16.mxu1 %v11875_v22  ;;  %7889 = vmatpush3.bf16.msra.mxu0 %v8551_v29 }
 0x3e6   : > { %4153 = vmatprep.mubr.bf16.mxu1 %v3923_v56  ;;  %v3931_v54 = vor.u32 %v3930_v6, %v3927_v27  ;;  %v3948_v12 = vrot.slane %v3946_v46, 3  ;;  %v3957_v17 = vrot.slane %v3955_v44, 3  ;;  %v3845_v31 = vpack.c.bf16 %v3765_v36, %v3765_v36  ;;  %7890 = vmatprep.subr.bf16.mxu0 %v11875_v22  ;;  %v8559_v36 = vld [vmem:[%s11749_s7 + $0x70] sm:$0xff]  }
 0x3e7   : > { %v3913_v28 = vor.u32 %v3912_v62, %v3909_v21  ;;  %vm6933_vm0 = vcmask 253952  }
 0x3e8   : > { %v3932_v41 = vsel %vm3854_vm2, %v3904_v30, %v3931_v54  ;;  %v3949_v24 = vor.u32 %v3948_v12, %v3945_v26  ;;  %v3958_v57 = vor.u32 %v3957_v17, %v3954_v2  ;;  %v3934_v60 = vshrl.u32 %v3845_v31, 16  ;;  %7869 = vmatpush3.bf16.msra.mxu1 %v8550_v0 }
 0x3e9   : > { %7857 = vmatmul.mubr.bf16.gmra.mrb[40].mxu0 %v3932_v41  ;;  %v3914_v48 = vsel %vm3854_vm2, %v3870_v49, %v3913_v28  ;;  %v3937_v42 = vshll.u32 %v3845_v31, 16  ;;  %v8552_v49 = vld [vmem:[%s11749_s7 + $0x18] sm:$0xff]   ;;  %7870 = vmatprep.subr.bf16.mxu1 %v11875_v22 }
 0x3ea   : > { %4154 = vmatmul.mubr.bf16.gmra.mrb[28].mxu1 %v3914_v48  ;;  %v3950_v15 = vsel %vm3854_vm2, %v3922_v23, %v3949_v24  ;;  %7860 = vmatprep.mubr.msk.bf16.mxu0 %vm8803_vm1, %v11875_v22  ;;  %v3959_v38 = vsel %vm3854_vm2, %v3931_v54, %v3958_v57  ;;  %v3936_v10 = vrot.slane %v3934_v60, 2 }
 0x3eb   : > { %4161 = vmatprep.mubr.bf16.mxu1 %v3950_v15  ;;  %v3939_v55 = vrot.slane %v3937_v42, 3  ;;  %7891 = vmatpush3.bf16.msra.mxu0 %v8553_v7 }
 0x3ec   : > { %7871 = vmatpush3.bf16.msra.mxu1 %v8552_v49  ;;  %7892 = vmatprep.subr.bf16.mxu0 %v11875_v22 }
 0x3ed   : > { %v3940_v39 = vor.u32 %v3939_v55, %v3936_v10  ;;  %7872 = vmatprep.subr.bf16.mxu1 %v11875_v22 }
 0x3ef   : > { %v3941_v30 = vsel %vm3854_vm2, %v3913_v28, %v3940_v39  ;;  %7893 = vmatpush3.bf16.msra.mxu0 %v8555_v50  ;;  %v8562_v50 = vld [vmem:[%s11749_s7 + $0x80] sm:$0xff]  }
 0x3f0   : > { %7873 = vmatpush3.bf16.msra.mxu1 %v8554_v43  ;;  %7894 = vmatprep.subr.bf16.mxu0 %v11875_v22 }
 0x3f1   : > { %7861 = vmatmul.mubr.bf16.gmra.mrb[44].mxu0 %v3959_v38  ;;  %7874 = vmatprep.subr.bf16.mxu1 %v11875_v22 }
 0x3f2   : > { %4162 = vmatmul.mubr.bf16.gmra.mrb[32].mxu1 %v3941_v30  ;;  %7900 = vmatprep.mubr.msk.bf16.mxu0 %vm8803_vm1, %v11875_v22 }
 0x3f3   : > { %7880 = vmatprep.mubr.msk.bf16.mxu1 %vm8803_vm1, %v11875_v22  ;;  %7895 = vmatpush3.bf16.msra.mxu0 %v8557_v58 }
 0x3f4   : > { %7875 = vmatpush3.bf16.msra.mxu1 %v8556_v45  ;;  %7896 = vmatprep.subr.bf16.mxu0 %v11875_v22 }
 0x3f5   : > { %7876 = vmatprep.subr.bf16.mxu1 %v11875_v22 }
 0x3f7   : > { %7897 = vmatpush3.bf16.msra.mxu0 %v8559_v36 }
 0x3f8   : > { %7877 = vmatpush3.bf16.msra.mxu1 %v8558_v53  ;;  %7898 = vmatprep.subr.bf16.mxu0 %v11875_v22 }
 0x3f9   : > { %7878 = vmatprep.subr.bf16.mxu1 %v11875_v22 }
 0x3fb   : > { %7899 = vmatpush3.bf16.msra.mxu0 %v8561_v16 }
 0x3fc   : > { %7879 = vmatpush3.bf16.msra.mxu1 %v8560_v14  ;;  %7924 = vmatprep.subr.bf16.mxu0 %v11875_v22  ;;  %v8563_v14 = vld [vmem:[%s11749_s7 + $0xc0] sm:$0xff]  }
 0x3fd   : > { %7904 = vmatprep.subr.bf16.mxu1 %v11875_v22 }
 0x4af   : > { %v4204_v32 = vpop.f32.mrb[36].mxu0 }
 0x4b0   : > { %v7854_v52 = vpop.f32.mrb[37].mxu0 }
 0x4b1   : > { %v4207_v11 = vpop.f32.mrb[38].mxu0 }
 0x4b2   : > { %v7855_v25 = vpop.f32.mrb[39].mxu0  ;;  %v7538_v18 = vpop.f32.mrb[24].mxu1 }
 0x4b3   : > { %v7539_v5 = vpop.f32.mrb[25].mxu1  ;;  %v8564_v25 = vld [vmem:[%s11749_s7 + $0x88] sm:$0xff]  }
 0x4b4   : > { %v7540_v33 = vadd.f32 %v7539_v5, %v7538_v18  ;;  %v7541_v1 = vpop.f32.mrb[26].mxu1 }
 0x4b5   : > { %v7542_v13 = vpop.f32.mrb[27].mxu1 }
 0x4b6   : > { %v4148_v59 = vadd.f32 %v7540_v33, %v7224_v4  ;;  %v7543_v51 = vadd.f32 %v7542_v13, %v7541_v1  ;;  %v8566_v33 = vld [vmem:[%s11749_s7 + $0x90] sm:$0xff]  }
 0x4b7   : > { %v8567_v13 = vld [vmem:[%s11749_s7 + $0xd0] sm:$0xff]  }
 0x4b8   : > { %v4205_v35 = vadd.f32 %v4204_v32, %v4148_v59  ;;  %v4151_v61 = vadd.f32 %v7543_v51, %v7224_v4 }
 0x4ba   : > { %v4240_v8 = vrot.slane %v4205_v35, %v11872_v20  ;;  %v10861_v63 = vadd.f32 %v4207_v11, %v4151_v61  ;;  %v4233_v41 = vcombine.high %v4205_v35, %v4205_v35  ;;  %v8568_v35 = vld [vmem:[%s11749_s7 + $0x98] sm:$0xff]  }
 0x4bc   : > { %v4248_v44 = vcombine.high %v4240_v8, %v4240_v8  ;;  %v4357_v23 = vsel %vm1496_vm6, %v4240_v8, -inf  ;;  %v4212_v3 = vpop.f32.mrb[40].mxu0  ;;  %v4247_v29 = vrot.slane %v4233_v41, %v11872_v20  ;;  %v8569_v8 = vld [vmem:[%s11749_s7 + $0xd8] sm:$0xff]   ;;  %v8578_v41 = vld [vmem:[%s11749_s7 + $0x100] sm:$0xff]  }
 0x4bd   : > { %v4358_v37 = vrot.slane %v4357_v23, 4  ;;  %v7858_v19 = vpop.f32.mrb[41].mxu0  ;;  %v7544_v27 = vpop.f32.mrb[28].mxu1 }
 0x4be   : > { %v4364_v6 = vsel %vm1496_vm6, %v4248_v44, -inf  ;;  %v4215_v46 = vpop.f32.mrb[42].mxu0  ;;  %v7545_v2 = vpop.f32.mrb[29].mxu1  ;;  %v4249_v11 = vcombine.high %v4247_v29, %v4247_v29  ;;  %v4371_v18 = vsel %vm1496_vm6, %v4247_v29, -inf  ;;  %v8586_v29 = vld [vmem:[%s11749_s7 + $0x120] sm:$0xff]  }
 0x4bf   : > { %v4359_v56 = vmax.f32 %v4357_v23, %v4358_v37  ;;  %v4365_v21 = vrot.slane %v4364_v6, 4  ;;  %v7859_v62 = vpop.f32.mrb[43].mxu0  ;;  %v7547_v26 = vpop.f32.mrb[30].mxu1  ;;  %v7546_v24 = vadd.f32 %v7545_v2, %v7544_v27  ;;  %v4372_v1 = vrot.slane %v4371_v18, 4  ;;  %v8570_v23 = vld [vmem:[%s11749_s7 + $0xa0] sm:$0xff]   ;;  %v8572_v27 = vld [vmem:[%s11749_s7 + $0xa8] sm:$0xff]  }
 0x4c0   : > { %v7548_v54 = vpop.f32.mrb[31].mxu1  ;;  %v4378_v5 = vsel %vm1496_vm6, %v4249_v11, -inf  ;;  %v8571_v37 = vld [vmem:[%s11749_s7 + $0xe0] sm:$0xff]   ;;  %v8575_v62 = vld [vmem:[%s11749_s7 + $0xf0] sm:$0xff]  }
 0x4c1   : > { %v4360_v12 = vrot.slane %v4359_v56, 2  ;;  %v4366_v17 = vmax.f32 %v4364_v6, %v4365_v21  ;;  %v7549_v57 = vadd.f32 %v7548_v54, %v7547_v26  ;;  %v4156_v10 = vadd.f32 %v7546_v24, %v7224_v4  ;;  %v8576_v54 = vld [vmem:[%s11749_s7 + $0xb8] sm:$0xff]   ;;  %v8591_v11 = vld [vmem:[%s11749_s7 + $0x170] sm:$0xff]  }
 0x4c2   : > { %v4379_v59 = vrot.slane %v4378_v5, 4  ;;  %v4373_v61 = vmax.f32 %v4371_v18, %v4372_v1  ;;  %v4250_v18 = vcombine.high %v10861_v63, %v10861_v63 }
 0x4c3   : > { %v4361_v31 = vmax.f32 %v4359_v56, %v4360_v12  ;;  %v4367_v28 = vrot.slane %v4366_v17, 2  ;;  %v4159_v55 = vadd.f32 %v7549_v57, %v7224_v4  ;;  %v10866_v49 = vadd.f32 %v4212_v3, %v4156_v10  ;;  %v8574_v56 = vld [vmem:[%s11749_s7 + $0xb0] sm:$0xff]   ;;  %v8579_v57 = vld [vmem:[%s11749_s7 + $0x140] sm:$0xff]  }
 0x4c4   : > { %v4220_v60 = vpop.f32.mrb[44].mxu0  ;;  %v4380_v44 = vmax.f32 %v4378_v5, %v4379_v59  ;;  %v4374_v3 = vrot.slane %v4373_v61, 2 }
 0x4c5   : > { %v4362_v48 = vrot.slane %v4361_v31, 1  ;;  %v4368_v42 = vmax.f32 %v4366_v17, %v4367_v28  ;;  %v7862_v15 = vpop.f32.mrb[45].mxu0  ;;  %v7550_v38 = vpop.f32.mrb[32].mxu1  ;;  %v10868_v7 = vadd.f32 %v4215_v46, %v4159_v55  ;;  %v8573_v46 = vld [vmem:[%s11749_s7 + $0xe8] sm:$0xff]   ;;  %v8577_v17 = vld [vmem:[%s11749_s7 + $0xf8] sm:$0xff]   ;;  %v4257_v28 = vrot.slane %v10861_v63, %v11872_v20  ;;  %v8582_v55 = vld [vmem:[%s11749_s7 + $0x110] sm:$0xff]  }
 0x4c6   : > { %v4223_v39 = vpop.f32.mrb[46].mxu0  ;;  %v7551_v30 = vpop.f32.mrb[33].mxu1  ;;  %v4381_v19 = vrot.slane %v4380_v44, 2  ;;  %v4375_v6 = vmax.f32 %v4373_v61, %v4374_v3  ;;  %v8594_v63 = vld [vmem:[%s11749_s7 + $0x180] sm:$0xff]   ;;  %v8597_v3 = vld [vmem:[%s11749_s7 + $0x1c8] sm:$0xff]  }
 0x4c7   : > { %v7863_v9 = vpop.f32.mrb[47].mxu0  ;;  %v7552_v40 = vadd.f32 %v7551_v30, %v7550_v38  ;;  %v7553_v47 = vpop.f32.mrb[34].mxu1  ;;  %v4363_v34 = vmax.f32 %v4361_v31, %v4362_v48  ;;  %v4369_v0 = vrot.slane %v4368_v42, 1  ;;  %v4265_v48 = vcombine.high %v4257_v28, %v4257_v28  ;;  %v8581_v38 = vld [vmem:[%s11749_s7 + $0x148] sm:$0xff]   ;;  %v8583_v30 = vld [vmem:[%s11749_s7 + $0x150] sm:$0xff]  }
 0x4c8   : > { %v7554_v43 = vpop.f32.mrb[35].mxu1  ;;  %v4382_v2 = vmax.f32 %v4380_v44, %v4381_v19  ;;  %v4376_v21 = vrot.slane %v4375_v6, 1  ;;  %v4385_v15 = vsel %vm1496_vm6, %v4257_v28, -inf  ;;  %v8596_v44 = vld [vmem:[%s11749_s7 + $0x188] sm:$0xff]   ;;  %v8598_v19 = vld [vmem:[%s11749_s7 + $0x190] sm:$0xff]  }
 0x4c9   : > { %v4164_v45 = vadd.f32 %v7552_v40, %v7224_v4  ;;  %v7555_v58 = vadd.f32 %v7554_v43, %v7553_v47  ;;  %v4518_v53 = vpack.c.bf16 %v4363_v34, %v4363_v34  ;;  %v4370_v36 = vmax.f32 %v4368_v42, %v4369_v0  ;;  %v8580_v42 = vld [vmem:[%s11749_s7 + $0x108] sm:$0xff]   ;;  %v8584_v40 = vld [vmem:[%s11749_s7 + $0x118] sm:$0xff]  }
 0x4ca   : > { %v4383_v26 = vrot.slane %v4382_v2, 1  ;;  %v4377_v12 = vmax.f32 %v4375_v6, %v4376_v21  ;;  %v4392_v10 = vsel %vm1496_vm6, %v4265_v48, -inf  ;;  %v8585_v34 = vld [vmem:[%s11749_s7 + $0x158] sm:$0xff]   ;;  %v8599_v6 = vld [vmem:[%s11749_s7 + $0x1d0] sm:$0xff]  }
 0x4cb   : > { %v10876_v16 = vadd.f32 %v4220_v60, %v4164_v45  ;;  %v4167_v32 = vadd.f32 %v7555_v58, %v7224_v4  ;;  %7881 = vmatmul.mubr.bf16.vlgmr.msra.gmra.mrb[36].mxu1 %v4518_v53  ;;  %v4519_v52 = vpack.c.bf16 %v4370_v36, %v4370_v36  ;;  %v8565_v4 = vld [vmem:[%s11749_s7 + $0xc8] sm:$0xff]   ;;  %v4393_v9 = vrot.slane %v4392_v10, 4  ;;  %v8601_v21 = vld [vmem:[%s11749_s7 + $0x1d8] sm:$0xff]   ;;  %v8607_v48 = vld [vmem:[%s11749_s7 + $0x1f0] sm:$0xff]  }
 0x4cc   : > { %7905 = vmatpush3.bf16.msra.mxu1 %v8562_v50  ;;  %7920 = vmatprep.mubr.msk.bf16.mxu1 %vm8803_vm1, %v11875_v22  ;;  %v4384_v31 = vmax.f32 %v4382_v2, %v4383_v26  ;;  %v4520_v24 = vpack.c.bf16 %v4377_v12, %v4377_v12  ;;  %v8587_v50 = vld [vmem:[%s11749_s7 + $0x160] sm:$0xff]   ;;  %v8588_v58 = vld [vmem:[%s11749_s7 + $0x128] sm:$0xff]   ;;  %v8600_v2 = vld [vmem:[%s11749_s7 + $0x198] sm:$0xff]  }
 0x4cd   : > { %7901 = vmatmul.mubr.bf16.vlgmr.msra.gmra.mrb[48].mxu0 %v4519_v52  ;;  %7906 = vmatprep.subr.bf16.mxu1 %v11875_v22  ;;  %v10899_v51 = vadd.f32 %v4223_v39, %v4167_v32  ;;  %v4386_v39 = vrot.slane %v4385_v15, 4  ;;  %v4394_v0 = vmax.f32 %v4392_v10, %v4393_v9  ;;  %v8589_v36 = vld [vmem:[%s11749_s7 + $0x168] sm:$0xff]   ;;  %v8590_v32 = vld [vmem:[%s11749_s7 + $0x130] sm:$0xff]   ;;  %v8602_v26 = vld [vmem:[%s11749_s7 + $0x1a0] sm:$0xff]  }
 0x4ce   : > { %7925 = vmatpush3.bf16.msra.mxu0 %v8563_v14  ;;  %7940 = vmatprep.mubr.msk.bf16.mxu0 %vm8803_vm1, %v11875_v22  ;;  %v4521_v60 = vpack.c.bf16 %v4384_v31, %v4384_v31  ;;  %v8603_v12 = vld [vmem:[%s11749_s7 + $0x1e0] sm:$0xff]   ;;  %v8604_v31 = vld [vmem:[%s11749_s7 + $0x1a8] sm:$0xff]   ;;  %v8609_v10 = vld [vmem:[%s11749_s7 + $0x1f8] sm:$0xff]  }
 0x4cf   : > { %7926 = vmatprep.subr.bf16.mxu0 %v11875_v22  ;;  %v4387_v47 = vmax.f32 %v4385_v15, %v4386_v39  ;;  %v4395_v45 = vrot.slane %v4394_v0, 2  ;;  %v8608_v15 = vld [vmem:[%s11749_s7 + $0x1b8] sm:$0xff]   ;;  %v4274_v39 = vrot.slane %v10866_v49, %v11872_v20 }
 0x4d0   : > { %7907 = vmatpush3.bf16.msra.mxu1 %v8564_v25 }
 0x4d1   : > { %7908 = vmatprep.subr.bf16.mxu1 %v11875_v22  ;;  %v4388_v43 = vrot.slane %v4387_v47, 2  ;;  %v4396_v14 = vmax.f32 %v4394_v0, %v4395_v45  ;;  %v8612_v0 = vld [vmem:[%s11749_s7 + $0x208] sm:$0xff]   ;;  %v8614_v45 = vld [vmem:[%s11749_s7 + $0x210] sm:$0xff]  }
 0x4d2   : > { %7927 = vmatpush3.bf16.msra.mxu0 %v8565_v4  ;;  %v8592_v4 = vld [vmem:[%s11749_s7 + $0x138] sm:$0xff]  }
 0x4d3   : > { %7928 = vmatprep.subr.bf16.mxu0 %v11875_v22  ;;  %v4389_v53 = vmax.f32 %v4387_v47, %v4388_v43  ;;  %v4397_v25 = vrot.slane %v4396_v14, 1  ;;  %v8613_v43 = vld [vmem:[%s11749_s7 + $0x248] sm:$0xff]  }
 0x4d4   : > { %7909 = vmatpush3.bf16.msra.mxu1 %v8566_v33  ;;  %v8593_v33 = vld [vmem:[%s11749_s7 + $0x178] sm:$0xff]  }
 0x4d5   : > { %7910 = vmatprep.subr.bf16.mxu1 %v11875_v22  ;;  %v4390_v52 = vrot.slane %v4389_v53, 1  ;;  %v4398_v1 = vmax.f32 %v4396_v14, %v4397_v25  ;;  %v8616_v14 = vld [vmem:[%s11749_s7 + $0x218] sm:$0xff]   ;;  %v8618_v25 = vld [vmem:[%s11749_s7 + $0x220] sm:$0xff]  }
 0x4d6   : > { %7929 = vmatpush3.bf16.msra.mxu0 %v8567_v13  ;;  %v4264_v13 = vrot.slane %v4250_v18, %v11872_v20 }
 0x4d7   : > { %7930 = vmatprep.subr.bf16.mxu0 %v11875_v22  ;;  %v4391_v5 = vmax.f32 %v4389_v53, %v4390_v52  ;;  %v4523_v61 = vpack.c.bf16 %v4398_v1, %v4398_v1  ;;  %v8615_v53 = vld [vmem:[%s11749_s7 + $0x250] sm:$0xff]   ;;  %v8617_v52 = vld [vmem:[%s11749_s7 + $0x258] sm:$0xff]  }
 0x4d8   : > { %7911 = vmatpush3.bf16.msra.mxu1 %v8568_v35  ;;  %v8595_v35 = vld [vmem:[%s11749_s7 + $0x1c0] sm:$0xff]  }
 0x4d9   : > { %7912 = vmatprep.subr.bf16.mxu1 %v11875_v22  ;;  %v4522_v59 = vpack.c.bf16 %v4391_v5, %v4391_v5 }
 0x4da   : > { %7931 = vmatpush3.bf16.msra.mxu0 %v8569_v8  ;;  %v4266_v8 = vcombine.high %v4264_v13, %v4264_v13 }
 0x4db   : > { %7932 = vmatprep.subr.bf16.mxu0 %v11875_v22 }
 0x4dc   : > { %7913 = vmatpush3.bf16.msra.mxu1 %v8570_v23  ;;  %v4399_v23 = vsel %vm1496_vm6, %v4264_v13, -inf  ;;  %v8621_v13 = vld [vmem:[%s11749_s7 + $0x268] sm:$0xff]  }
 0x4dd   : > { %7914 = vmatprep.subr.bf16.mxu1 %v11875_v22 }
 0x4de   : > { %7933 = vmatpush3.bf16.msra.mxu0 %v8571_v37  ;;  %v4406_v37 = vsel %vm1496_vm6, %v4266_v8, -inf }
 0x4df   : > { %7934 = vmatprep.subr.bf16.mxu0 %v11875_v22 }
 0x4e0   : > { %7915 = vmatpush3.bf16.msra.mxu1 %v8572_v27  ;;  %v4400_v27 = vrot.slane %v4399_v23, 4 }
 0x4e1   : > { %7916 = vmatprep.subr.bf16.mxu1 %v11875_v22 }
 0x4e2   : > { %7935 = vmatpush3.bf16.msra.mxu0 %v8573_v46  ;;  %v4407_v46 = vrot.slane %v4406_v37, 4 }
 0x4e3   : > { %7936 = vmatprep.subr.bf16.mxu0 %v11875_v22 }
 0x4e4   : > { %7917 = vmatpush3.bf16.msra.mxu1 %v8574_v56  ;;  %v4401_v56 = vmax.f32 %v4399_v23, %v4400_v27  ;;  %v8624_v23 = vld [vmem:[%s11749_s7 + $0x238] sm:$0xff]  }
 0x4e5   : > { %7918 = vmatprep.subr.bf16.mxu1 %v11875_v22 }
 0x4e6   : > { %7937 = vmatpush3.bf16.msra.mxu0 %v8575_v62  ;;  %v4408_v62 = vmax.f32 %v4406_v37, %v4407_v46  ;;  %v8625_v37 = vld [vmem:[%s11749_s7 + $0x278] sm:$0xff]   ;;  %v8627_v46 = vld [vmem:[%s11749_s7 + $0x2c0] sm:$0xff]  }
 0x4e7   : > { %7938 = vmatprep.subr.bf16.mxu0 %v11875_v22 }
 0x4e8   : > { %7919 = vmatpush3.bf16.msra.mxu1 %v8576_v54  ;;  %v4402_v54 = vrot.slane %v4401_v56, 2 }
 0x4e9   : > { %7944 = vmatprep.subr.bf16.mxu1 %v11875_v22 }
 0x4ea   : > { %7939 = vmatpush3.bf16.msra.mxu0 %v8577_v17  ;;  %v4409_v17 = vrot.slane %v4408_v62, 2  ;;  %v4403_v28 = vmax.f32 %v4401_v56, %v4402_v54 }
 0x4eb   : > { %7921 = vmatmul.mubr.bf16.vlgmr.msra.gmra.mrb[40].mxu1 %v4520_v24  ;;  %7964 = vmatprep.subr.bf16.mxu0 %v11875_v22 }
 0x4ec   : > { %7945 = vmatpush3.bf16.msra.mxu1 %v8578_v41  ;;  %7960 = vmatprep.mubr.msk.bf16.mxu1 %vm8803_vm1, %v11875_v22  ;;  %v8605_v41 = vld [vmem:[%s11749_s7 + $0x1e8] sm:$0xff]   ;;  %v4410_v24 = vmax.f32 %v4408_v62, %v4409_v17 }
 0x4ed   : > { %7941 = vmatmul.mubr.bf16.vlgmr.msra.gmra.mrb[52].mxu0 %v4521_v60  ;;  %7946 = vmatprep.subr.bf16.mxu1 %v11875_v22  ;;  %v4404_v60 = vrot.slane %v4403_v28, 1 }
 0x4ee   : > { %7965 = vmatpush3.bf16.msra.mxu0 %v8579_v57  ;;  %7980 = vmatprep.mubr.msk.bf16.mxu0 %vm8803_vm1, %v11875_v22  ;;  %v8606_v57 = vld [vmem:[%s11749_s7 + $0x1b0] sm:$0xff]  }
 0x4ef   : > { %7966 = vmatprep.subr.bf16.mxu0 %v11875_v22 }
 0x4f0   : > { %7947 = vmatpush3.bf16.msra.mxu1 %v8580_v42  ;;  %v4411_v42 = vrot.slane %v4410_v24, 1 }
 0x4f1   : > { %7948 = vmatprep.subr.bf16.mxu1 %v11875_v22 }
 0x4f2   : > { %7967 = vmatpush3.bf16.msra.mxu0 %v8581_v38  ;;  %v4405_v38 = vmax.f32 %v4403_v28, %v4404_v60 }
 0x4f3   : > { %7968 = vmatprep.subr.bf16.mxu0 %v11875_v22 }
 0x4f4   : > { %7949 = vmatpush3.bf16.msra.mxu1 %v8582_v55  ;;  %v4412_v55 = vmax.f32 %v4410_v24, %v4411_v42  ;;  %v4524_v9 = vpack.c.bf16 %v4405_v38, %v4405_v38 }
 0x4f5   : > { %7950 = vmatprep.subr.bf16.mxu1 %v11875_v22 }
 0x4f6   : > { %7969 = vmatpush3.bf16.msra.mxu0 %v8583_v30  ;;  %v8610_v30 = vld [vmem:[%s11749_s7 + $0x200] sm:$0xff]   ;;  %v4525_v47 = vpack.c.bf16 %v4412_v55, %v4412_v55 }
 0x4f7   : > { %7970 = vmatprep.subr.bf16.mxu0 %v11875_v22 }
 0x4f8   : > { %7951 = vmatpush3.bf16.msra.mxu1 %v8584_v40  ;;  %v8611_v40 = vld [vmem:[%s11749_s7 + $0x240] sm:$0xff]  }
 0x4f9   : > { %7952 = vmatprep.subr.bf16.mxu1 %v11875_v22 }
 0x4fa   : > { %7971 = vmatpush3.bf16.msra.mxu0 %v8585_v34  ;;  %v4282_v34 = vcombine.high %v4274_v39, %v4274_v39 }
 0x4fb   : > { %7972 = vmatprep.subr.bf16.mxu0 %v11875_v22 }
 0x4fc   : > { %7953 = vmatpush3.bf16.msra.mxu1 %v8586_v29  ;;  %v4413_v29 = vsel %vm1496_vm6, %v4274_v39, -inf  ;;  %v8637_v39 = vld [vmem:[%s11749_s7 + $0x2e8] sm:$0xff]  }
 0x4fd   : > { %7954 = vmatprep.subr.bf16.mxu1 %v11875_v22 }
 0x4fe   : > { %7973 = vmatpush3.bf16.msra.mxu0 %v8587_v50  ;;  %v4420_v50 = vsel %vm1496_vm6, %v4282_v34, -inf }
 0x4ff   : > { %7974 = vmatprep.subr.bf16.mxu0 %v11875_v22 }
 0x500   : > { %7955 = vmatpush3.bf16.msra.mxu1 %v8588_v58  ;;  %v4414_v58 = vrot.slane %v4413_v29, 4 }
 0x501   : > { %7956 = vmatprep.subr.bf16.mxu1 %v11875_v22 }
 0x502   : > { %7975 = vmatpush3.bf16.msra.mxu0 %v8589_v36  ;;  %v4421_v36 = vrot.slane %v4420_v50, 4 }
 0x503   : > { %7976 = vmatprep.subr.bf16.mxu0 %v11875_v22 }
 0x504   : > { %7957 = vmatpush3.bf16.msra.mxu1 %v8590_v32  ;;  %v4415_v32 = vmax.f32 %v4413_v29, %v4414_v58  ;;  %v8642_v58 = vld [vmem:[%s11749_s7 + $0x300] sm:$0xff]  }
 0x505   : > { %7958 = vmatprep.subr.bf16.mxu1 %v11875_v22 }
 0x506   : > { %7977 = vmatpush3.bf16.msra.mxu0 %v8591_v11  ;;  %v4422_v11 = vmax.f32 %v4420_v50, %v4421_v36  ;;  %v4416_v18 = vrot.slane %v4415_v32, 2  ;;  %v8643_v36 = vld [vmem:[%s11749_s7 + $0x340] sm:$0xff]  }
 0x507   : > { %7978 = vmatprep.subr.bf16.mxu0 %v11875_v22 }
 0x508   : > { %7959 = vmatpush3.bf16.msra.mxu1 %v8592_v4  ;;  %v8619_v4 = vld [vmem:[%s11749_s7 + $0x260] sm:$0xff]   ;;  %v4423_v5 = vrot.slane %v4422_v11, 2  ;;  %v4417_v1 = vmax.f32 %v4415_v32, %v4416_v18 }
 0x509   : > { %7984 = vmatprep.subr.bf16.mxu1 %v11875_v22 }
 0x50a   : > { %7979 = vmatpush3.bf16.msra.mxu0 %v8593_v33  ;;  %v8620_v33 = vld [vmem:[%s11749_s7 + $0x228] sm:$0xff]  }
 0x50b   : > { %7961 = vmatmul.mubr.bf16.vlgmr.msra.gmra.mrb[44].mxu1 %v4522_v59  ;;  %8004 = vmatprep.subr.bf16.mxu0 %v11875_v22  ;;  %v8622_v59 = vld [vmem:[%s11749_s7 + $0x230] sm:$0xff]  }
 0x50c   : > { %7985 = vmatpush3.bf16.msra.mxu1 %v8594_v63  ;;  %8000 = vmatprep.mubr.msk.bf16.mxu1 %vm8803_vm1, %v11875_v22  ;;  %v4424_v63 = vmax.f32 %v4422_v11, %v4423_v5 }
 0x50d   : > { %7981 = vmatmul.mubr.bf16.vlgmr.msra.gmra.mrb[56].mxu0 %v4523_v61  ;;  %7986 = vmatprep.subr.bf16.mxu1 %v11875_v22  ;;  %v8623_v61 = vld [vmem:[%s11749_s7 + $0x270] sm:$0xff]  }
 0x50e   : > { %8005 = vmatpush3.bf16.msra.mxu0 %v8595_v35  ;;  %8020 = vmatprep.mubr.msk.bf16.mxu0 %vm8803_vm1, %v11875_v22  ;;  %v4418_v35 = vrot.slane %v4417_v1, 1  ;;  %v4425_v8 = vrot.slane %v4424_v63, 1 }
 0x50f   : > { %8006 = vmatprep.subr.bf16.mxu0 %v11875_v22 }
 0x510   : > { %7987 = vmatpush3.bf16.msra.mxu1 %v8596_v44  ;;  %v4267_v44 = vcombine.high %v10866_v49, %v10866_v49  ;;  %v8626_v49 = vld [vmem:[%s11749_s7 + $0x280] sm:$0xff]  }
 0x511   : > { %7988 = vmatprep.subr.bf16.mxu1 %v11875_v22 }
 0x512   : > { %8007 = vmatpush3.bf16.msra.mxu0 %v8597_v3  ;;  %v4419_v3 = vmax.f32 %v4417_v1, %v4418_v35  ;;  %v4281_v27 = vrot.slane %v4267_v44, %v11872_v20  ;;  %v8651_v44 = vld [vmem:[%s11749_s7 + $0x360] sm:$0xff]  }
 0x513   : > { %8008 = vmatprep.subr.bf16.mxu0 %v11875_v22 }
 0x514   : > { %7989 = vmatpush3.bf16.msra.mxu1 %v8598_v19  ;;  %v4426_v19 = vmax.f32 %v4424_v63, %v4425_v8  ;;  %v4283_v56 = vcombine.high %v4281_v27, %v4281_v27  ;;  %v4427_v62 = vsel %vm1496_vm6, %v4281_v27, -inf }
 0x515   : > { %7990 = vmatprep.subr.bf16.mxu1 %v11875_v22  ;;  %v4428_v17 = vrot.slane %v4427_v62, 4 }
 0x516   : > { %8009 = vmatpush3.bf16.msra.mxu0 %v8599_v6  ;;  %v4526_v6 = vpack.c.bf16 %v4419_v3, %v4419_v3  ;;  %v4434_v54 = vsel %vm1496_vm6, %v4283_v56, -inf  ;;  %v8652_v3 = vld [vmem:[%s11749_s7 + $0x328] sm:$0xff]   ;;  %v4284_v56 = vcombine.high %v10868_v7, %v10868_v7 }
 0x517   : > { %8010 = vmatprep.subr.bf16.mxu0 %v11875_v22  ;;  %v4435_v28 = vrot.slane %v4434_v54, 4  ;;  %v4429_v24 = vmax.f32 %v4427_v62, %v4428_v17 }
 0x518   : > { %7991 = vmatpush3.bf16.msra.mxu1 %v8600_v2  ;;  %v4527_v2 = vpack.c.bf16 %v4426_v19, %v4426_v19  ;;  %v8653_v19 = vld [vmem:[%s11749_s7 + $0x368] sm:$0xff]  }
 0x519   : > { %7992 = vmatprep.subr.bf16.mxu1 %v11875_v22  ;;  %v4436_v60 = vmax.f32 %v4434_v54, %v4435_v28  ;;  %v4430_v42 = vrot.slane %v4429_v24, 2 }
 0x51a   : > { %8011 = vmatpush3.bf16.msra.mxu0 %v8601_v21  ;;  %v8628_v21 = vld [vmem:[%s11749_s7 + $0x288] sm:$0xff]  }
 0x51b   : > { %8012 = vmatprep.subr.bf16.mxu0 %v11875_v22  ;;  %v4437_v38 = vrot.slane %v4436_v60, 2  ;;  %v4431_v55 = vmax.f32 %v4429_v24, %v4430_v42  ;;  %v8660_v24 = vld [vmem:[%s11749_s7 + $0x388] sm:$0xff]   ;;  %v8662_v42 = vld [vmem:[%s11749_s7 + $0x390] sm:$0xff]  }
 0x51c   : > { %7993 = vmatpush3.bf16.msra.mxu1 %v8602_v26  ;;  %v8629_v26 = vld [vmem:[%s11749_s7 + $0x2c8] sm:$0xff]  }
 0x51d   : > { %7994 = vmatprep.subr.bf16.mxu1 %v11875_v22 }
 0x51e   : > { %8013 = vmatpush3.bf16.msra.mxu0 %v8603_v12  ;;  %v8630_v12 = vld [vmem:[%s11749_s7 + $0x290] sm:$0xff]  }
 0x51f   : > { %8014 = vmatprep.subr.bf16.mxu0 %v11875_v22 }
 0x520   : > { %7995 = vmatpush3.bf16.msra.mxu1 %v8604_v31  ;;  %v8631_v31 = vld [vmem:[%s11749_s7 + $0x2d0] sm:$0xff]  }
 0x521   : > { %7996 = vmatprep.subr.bf16.mxu1 %v11875_v22 }
 0x522   : > { %8015 = vmatpush3.bf16.msra.mxu0 %v8605_v41  ;;  %v8632_v41 = vld [vmem:[%s11749_s7 + $0x298] sm:$0xff]  }
 0x523   : > { %8016 = vmatprep.subr.bf16.mxu0 %v11875_v22 }
 0x524   : > { %7997 = vmatpush3.bf16.msra.mxu1 %v8606_v57  ;;  %v8633_v57 = vld [vmem:[%s11749_s7 + $0x2d8] sm:$0xff]  }
 0x525   : > { %7998 = vmatprep.subr.bf16.mxu1 %v11875_v22 }
 0x526   : > { %8017 = vmatpush3.bf16.msra.mxu0 %v8607_v48  ;;  %v8634_v48 = vld [vmem:[%s11749_s7 + $0x2a0] sm:$0xff]  }
 0x527   : > { %8018 = vmatprep.subr.bf16.mxu0 %v11875_v22 }
 0x528   : > { %7999 = vmatpush3.bf16.msra.mxu1 %v8608_v15  ;;  %v8635_v15 = vld [vmem:[%s11749_s7 + $0x2e0] sm:$0xff]  }
 0x529   : > { %8024 = vmatprep.subr.bf16.mxu1 %v11875_v22 }
 0x52a   : > { %8019 = vmatpush3.bf16.msra.mxu0 %v8609_v10  ;;  %v8636_v10 = vld [vmem:[%s11749_s7 + $0x2a8] sm:$0xff]  }
 0x52b   : > { %8001 = vmatmul.mubr.bf16.vlgmr.msra.gmra.mrb[48].mxu1 %v4524_v9  ;;  %8044 = vmatprep.subr.bf16.mxu0 %v11875_v22  ;;  %v8638_v9 = vld [vmem:[%s11749_s7 + $0x2b0] sm:$0xff]  }
 0x52c   : > { %8025 = vmatpush3.bf16.msra.mxu1 %v8610_v30  ;;  %8040 = vmatprep.mubr.msk.bf16.mxu1 %vm8803_vm1, %v11875_v22  ;;  %v4438_v30 = vmax.f32 %v4436_v60, %v4437_v38  ;;  %v8661_v60 = vld [vmem:[%s11749_s7 + $0x3c8] sm:$0xff]   ;;  %v8663_v38 = vld [vmem:[%s11749_s7 + $0x3d0] sm:$0xff]  }
 0x52d   : > { %8021 = vmatmul.mubr.bf16.vlgmr.msra.gmra.mrb[60].mxu0 %v4525_v47  ;;  %8026 = vmatprep.subr.bf16.mxu1 %v11875_v22  ;;  %v8639_v47 = vld [vmem:[%s11749_s7 + $0x2f0] sm:$0xff]  }
 0x52e   : > { %8045 = vmatpush3.bf16.msra.mxu0 %v8611_v40  ;;  %8060 = vmatprep.mubr.msk.bf16.mxu0 %vm8803_vm1, %v11875_v22  ;;  %v4432_v40 = vrot.slane %v4431_v55, 1  ;;  %v4439_v34 = vrot.slane %v4438_v30, 1 }
 0x52f   : > { %8046 = vmatprep.subr.bf16.mxu0 %v11875_v22 }
 0x530   : > { %8027 = vmatpush3.bf16.msra.mxu1 %v8612_v0  ;;  %v8640_v0 = vld [vmem:[%s11749_s7 + $0x2b8] sm:$0xff]   ;;  %v4433_v29 = vmax.f32 %v4431_v55, %v4432_v40  ;;  %v4440_v50 = vmax.f32 %v4438_v30, %v4439_v34  ;;  %v8666_v40 = vld [vmem:[%s11749_s7 + $0x3a0] sm:$0xff]  }
 0x531   : > { %8028 = vmatprep.subr.bf16.mxu1 %v11875_v22  ;;  %v8664_v55 = vld [vmem:[%s11749_s7 + $0x398] sm:$0xff]   ;;  %v8667_v34 = vld [vmem:[%s11749_s7 + $0x3e0] sm:$0xff]  }
 0x532   : > { %8047 = vmatpush3.bf16.msra.mxu0 %v8613_v43  ;;  %v8641_v43 = vld [vmem:[%s11749_s7 + $0x2f8] sm:$0xff]  }
 0x533   : > { %8048 = vmatprep.subr.bf16.mxu0 %v11875_v22  ;;  %v8665_v30 = vld [vmem:[%s11749_s7 + $0x3d8] sm:$0xff]  }
 0x534   : > { %8029 = vmatpush3.bf16.msra.mxu1 %v8614_v45  ;;  %v4291_v45 = vrot.slane %v10868_v7, %v11872_v20  ;;  %v8658_v7 = vld [vmem:[%s11749_s7 + $0x380] sm:$0xff]  }
 0x535   : > { %8030 = vmatprep.subr.bf16.mxu1 %v11875_v22 }
 0x536   : > { %8049 = vmatpush3.bf16.msra.mxu0 %v8615_v53  ;;  %v4528_v53 = vpack.c.bf16 %v4433_v29, %v4433_v29  ;;  %v4299_v32 = vcombine.high %v4291_v45, %v4291_v45  ;;  %v4441_v11 = vsel %vm1496_vm6, %v4291_v45, -inf  ;;  %v8668_v29 = vld [vmem:[%s11749_s7 + $0x3a8] sm:$0xff]  }
 0x537   : > { %8050 = vmatprep.subr.bf16.mxu0 %v11875_v22  ;;  %v4442_v5 = vrot.slane %v4441_v11, 4  ;;  %v8669_v45 = vld [vmem:[%s11749_s7 + $0x3e8] sm:$0xff]  }
 0x538   : > { %8031 = vmatpush3.bf16.msra.mxu1 %v8616_v14  ;;  %v4529_v14 = vpack.c.bf16 %v4440_v50, %v4440_v50  ;;  %v4448_v18 = vsel %vm1496_vm6, %v4299_v32, -inf  ;;  %v8670_v32 = vld [vmem:[%s11749_s7 + $0x3b0] sm:$0xff]  }
 0x539   : > { %8032 = vmatprep.subr.bf16.mxu1 %v11875_v22  ;;  %v4449_v1 = vrot.slane %v4448_v18, 4  ;;  %v4443_v63 = vmax.f32 %v4441_v11, %v4442_v5 }
 0x53a   : > { %8051 = vmatpush3.bf16.msra.mxu0 %v8617_v52  ;;  %v8644_v52 = vld [vmem:[%s11749_s7 + $0x308] sm:$0xff]  }
 0x53b   : > { %8052 = vmatprep.subr.bf16.mxu0 %v11875_v22  ;;  %v4450_v35 = vmax.f32 %v4448_v18, %v4449_v1  ;;  %v4444_v8 = vrot.slane %v4443_v63, 2  ;;  %v8671_v1 = vld [vmem:[%s11749_s7 + $0x3f0] sm:$0xff]  }
 0x53c   : > { %8033 = vmatpush3.bf16.msra.mxu1 %v8618_v25  ;;  %v8645_v25 = vld [vmem:[%s11749_s7 + $0x348] sm:$0xff]  }
 0x53d   : > { %8034 = vmatprep.subr.bf16.mxu1 %v11875_v22 }
 0x53e   : > { %8053 = vmatpush3.bf16.msra.mxu0 %v8619_v4  ;;  %v8646_v4 = vld [vmem:[%s11749_s7 + $0x310] sm:$0xff]  }
 0x53f   : > { %8054 = vmatprep.subr.bf16.mxu0 %v11875_v22 }
 0x540   : > { %8035 = vmatpush3.bf16.msra.mxu1 %v8620_v33  ;;  %v8647_v33 = vld [vmem:[%s11749_s7 + $0x350] sm:$0xff]  }
 0x541   : > { %8036 = vmatprep.subr.bf16.mxu1 %v11875_v22 }
 0x542   : > { %8055 = vmatpush3.bf16.msra.mxu0 %v8621_v13  ;;  %v8648_v13 = vld [vmem:[%s11749_s7 + $0x318] sm:$0xff]  }
 0x543   : > { %8056 = vmatprep.subr.bf16.mxu0 %v11875_v22 }
 0x544   : > { %8037 = vmatpush3.bf16.msra.mxu1 %v8622_v59  ;;  %v8649_v59 = vld [vmem:[%s11749_s7 + $0x358] sm:$0xff]  }
 0x545   : > { %8038 = vmatprep.subr.bf16.mxu1 %v11875_v22 }
 0x546   : > { %8057 = vmatpush3.bf16.msra.mxu0 %v8623_v61  ;;  %v8650_v61 = vld [vmem:[%s11749_s7 + $0x320] sm:$0xff]  }
 0x547   : > { %8058 = vmatprep.subr.bf16.mxu0 %v11875_v22 }
 0x548   : > { %8039 = vmatpush3.bf16.msra.mxu1 %v8624_v23  ;;  %v4451_v23 = vrot.slane %v4450_v35, 2 }
 0x549   : > { %8064 = vmatprep.subr.bf16.mxu1 %v11875_v22 }
 0x54a   : > { %8059 = vmatpush3.bf16.msra.mxu0 %v8625_v37  ;;  %v4445_v37 = vmax.f32 %v4443_v63, %v4444_v8  ;;  %v4452_v27 = vmax.f32 %v4450_v35, %v4451_v23  ;;  %v8674_v23 = vld [vmem:[%s11749_s7 + $0x400] sm:$0xff]  }
 0x54b   : > { %8041 = vmatmul.mubr.bf16.vlgmr.msra.gmra.mrb[52].mxu1 %v4526_v6  ;;  %8084 = vmatprep.subr.bf16.mxu0 %v11875_v22 }
 0x54c   : > { %8065 = vmatpush3.bf16.msra.mxu1 %v8626_v49  ;;  %8080 = vmatprep.mubr.msk.bf16.mxu1 %vm8803_vm1, %v11875_v22  ;;  %v8654_v49 = vld [vmem:[%s11749_s7 + $0x330] sm:$0xff]   ;;  %v4446_v6 = vrot.slane %v4445_v37, 1 }
 0x54d   : > { %8061 = vmatmul.mubr.bf16.vlgmr.msra.gmra.mrb[64].mxu0 %v4527_v2  ;;  %8066 = vmatprep.subr.bf16.mxu1 %v11875_v22  ;;  %v4453_v2 = vrot.slane %v4452_v27, 1 }
 0x54e   : > { %8085 = vmatpush3.bf16.msra.mxu0 %v8627_v46  ;;  %8100 = vmatprep.mubr.msk.bf16.mxu0 %vm8803_vm1, %v11875_v22  ;;  %v8655_v46 = vld [vmem:[%s11749_s7 + $0x370] sm:$0xff]   ;;  %v4447_v62 = vmax.f32 %v4445_v37, %v4446_v6  ;;  %v8675_v37 = vld [vmem:[%s11749_s7 + $0x440] sm:$0xff]  }
 0x54f   : > { %8086 = vmatprep.subr.bf16.mxu0 %v11875_v22  ;;  %v4454_v54 = vmax.f32 %v4452_v27, %v4453_v2 }
 0x550   : > { %8067 = vmatpush3.bf16.msra.mxu1 %v8628_v21  ;;  %v8656_v21 = vld [vmem:[%s11749_s7 + $0x338] sm:$0xff]   ;;  %v4530_v17 = vpack.c.bf16 %v4447_v62, %v4447_v62  ;;  %v8679_v62 = vld [vmem:[%s11749_s7 + $0x450] sm:$0xff]  }
 0x551   : > { %8068 = vmatprep.subr.bf16.mxu1 %v11875_v22  ;;  %v4531_v28 = vpack.c.bf16 %v4454_v54, %v4454_v54  ;;  %v8680_v54 = vld [vmem:[%s11749_s7 + $0x418] sm:$0xff]  }
 0x552   : > { %8087 = vmatpush3.bf16.msra.mxu0 %v8629_v26  ;;  %v8657_v26 = vld [vmem:[%s11749_s7 + $0x378] sm:$0xff]  }
 0x553   : > { %8088 = vmatprep.subr.bf16.mxu0 %v11875_v22 }
 0x554   : > { %8069 = vmatpush3.bf16.msra.mxu1 %v8630_v12  ;;  %v4298_v12 = vrot.slane %v4284_v56, %v11872_v20  ;;  %v8678_v56 = vld [vmem:[%s11749_s7 + $0x410] sm:$0xff]  }
 0x555   : > { %8070 = vmatprep.subr.bf16.mxu1 %v11875_v22 }
 0x556   : > { %8089 = vmatpush3.bf16.msra.mxu0 %v8631_v31  ;;  %v8659_v31 = vld [vmem:[%s11749_s7 + $0x3c0] sm:$0xff]  }
 0x557   : > { %8090 = vmatprep.subr.bf16.mxu0 %v11875_v22 }
 0x558   : > { %8071 = vmatpush3.bf16.msra.mxu1 %v8632_v41  ;;  %v4300_v41 = vcombine.high %v4298_v12, %v4298_v12 }
 0x559   : > { %8072 = vmatprep.subr.bf16.mxu1 %v11875_v22 }
 0x55a   : > { %8091 = vmatpush3.bf16.msra.mxu0 %v8633_v57  ;;  %v4455_v57 = vsel %vm1496_vm6, %v4298_v12, -inf }
 0x55b   : > { %8092 = vmatprep.subr.bf16.mxu0 %v11875_v22 }
 0x55c   : > { %8073 = vmatpush3.bf16.msra.mxu1 %v8634_v48  ;;  %v4462_v48 = vsel %vm1496_vm6, %v4300_v41, -inf  ;;  %v8683_v41 = vld [vmem:[%s11749_s7 + $0x460] sm:$0xff]  }
 0x55d   : > { %8074 = vmatprep.subr.bf16.mxu1 %v11875_v22 }
 0x55e   : > { %8093 = vmatpush3.bf16.msra.mxu0 %v8635_v15  ;;  %v4456_v15 = vrot.slane %v4455_v57, 4 }
 0x55f   : > { %8094 = vmatprep.subr.bf16.mxu0 %v11875_v22 }
 0x560   : > { %8075 = vmatpush3.bf16.msra.mxu1 %v8636_v10  ;;  %v4463_v10 = vrot.slane %v4462_v48, 4 }
 0x561   : > { %8076 = vmatprep.subr.bf16.mxu1 %v11875_v22 }
 0x562   : > { %8095 = vmatpush3.bf16.msra.mxu0 %v8637_v39  ;;  %v4457_v39 = vmax.f32 %v4455_v57, %v4456_v15  ;;  %v8684_v57 = vld [vmem:[%s11749_s7 + $0x428] sm:$0xff]  }
 0x563   : > { %8096 = vmatprep.subr.bf16.mxu0 %v11875_v22 }
 0x564   : > { %8077 = vmatpush3.bf16.msra.mxu1 %v8638_v9  ;;  %v4464_v9 = vmax.f32 %v4462_v48, %v4463_v10 }
 0x565   : > { %8078 = vmatprep.subr.bf16.mxu1 %v11875_v22 }
 0x566   : > { %8097 = vmatpush3.bf16.msra.mxu0 %v8639_v47  ;;  %v4458_v47 = vrot.slane %v4457_v39, 2 }
 0x567   : > { %8098 = vmatprep.subr.bf16.mxu0 %v11875_v22 }
 0x568   : > { %8079 = vmatpush3.bf16.msra.mxu1 %v8640_v0  ;;  %v4465_v0 = vrot.slane %v4464_v9, 2 }
 0x569   : > { %8104 = vmatprep.subr.bf16.mxu1 %v11875_v22 }
 0x56a   : > { %8099 = vmatpush3.bf16.msra.mxu0 %v8641_v43  ;;  %v4459_v43 = vmax.f32 %v4457_v39, %v4458_v47 }
 0x56b   : > { %8081 = vmatmul.mubr.bf16.vlgmr.msra.gmra.mrb[56].mxu1 %v4528_v53  ;;  %8124 = vmatprep.subr.bf16.mxu0 %v11875_v22  ;;  %v4466_v53 = vmax.f32 %v4464_v9, %v4465_v0  ;;  %v8686_v9 = vld [vmem:[%s11749_s7 + $0x430] sm:$0xff]  }
 0x56c   : > { %8105 = vmatpush3.bf16.msra.mxu1 %v8642_v58  ;;  %8120 = vmatprep.mubr.msk.bf16.mxu1 %vm8803_vm1, %v11875_v22 }
 0x56d   : > { %8101 = vmatmul.mubr.bf16.vlgmr.msra.gmra.mrb[68].mxu0 %v4529_v14  ;;  %8106 = vmatprep.subr.bf16.mxu1 %v11875_v22  ;;  %v4467_v63 = vrot.slane %v4466_v53, 1 }
 0x56e   : > { %8125 = vmatpush3.bf16.msra.mxu0 %v8643_v36  ;;  %8140 = vmatprep.mubr.msk.bf16.mxu0 %vm8803_vm1, %v11875_v22 }
 0x56f   : > { %8126 = vmatprep.subr.bf16.mxu0 %v11875_v22  ;;  %v4468_v8 = vmax.f32 %v4466_v53, %v4467_v63  ;;  %v4301_v53 = vcombine.high %v10876_v16, %v10876_v16 }
 0x570   : > { %8107 = vmatpush3.bf16.msra.mxu1 %v8644_v52 }
 0x571   : > { %8108 = vmatprep.subr.bf16.mxu1 %v11875_v22 }
 0x572   : > { %8127 = vmatpush3.bf16.msra.mxu0 %v8645_v25 }
 0x573   : > { %8128 = vmatprep.subr.bf16.mxu0 %v11875_v22 }
 0x574   : > { %8109 = vmatpush3.bf16.msra.mxu1 %v8646_v4  ;;  %v4460_v4 = vrot.slane %v4459_v43, 1 }
 0x575   : > { %8110 = vmatprep.subr.bf16.mxu1 %v11875_v22 }
 0x576   : > { %8129 = vmatpush3.bf16.msra.mxu0 %v8647_v33  ;;  %v4461_v35 = vmax.f32 %v4459_v43, %v4460_v4 }
 0x577   : > { %8130 = vmatprep.subr.bf16.mxu0 %v11875_v22 }
 0x578   : > { %8111 = vmatpush3.bf16.msra.mxu1 %v8648_v13 }
 0x579   : > { %8112 = vmatprep.subr.bf16.mxu1 %v11875_v22 }
 0x57a   : > { %8131 = vmatpush3.bf16.msra.mxu0 %v8649_v59  ;;  %v8672_v59 = vld [vmem:[%s11749_s7 + $0x3b8] sm:$0xff]  }
 0x57b   : > { %8132 = vmatprep.subr.bf16.mxu0 %v11875_v22 }
 0x57c   : > { %8113 = vmatpush3.bf16.msra.mxu1 %v8650_v61  ;;  %v8673_v61 = vld [vmem:[%s11749_s7 + $0x3f8] sm:$0xff]  }
 0x57d   : > { %8114 = vmatprep.subr.bf16.mxu1 %v11875_v22 }
 0x57e   : > { %8133 = vmatpush3.bf16.msra.mxu0 %v8651_v44  ;;  %v4308_v44 = vrot.slane %v10876_v16, %v11872_v20  ;;  %v8690_v16 = vld [vmem:[%s11749_s7 + $0x480] sm:$0xff]  }
 0x57f   : > { %8134 = vmatprep.subr.bf16.mxu0 %v11875_v22 }
 0x580   : > { %8115 = vmatpush3.bf16.msra.mxu1 %v8652_v3  ;;  %v4532_v3 = vpack.c.bf16 %v4461_v35, %v4461_v35  ;;  %v4316_v27 = vcombine.high %v4308_v44, %v4308_v44  ;;  %v4469_v6 = vsel %vm1496_vm6, %v4308_v44, -inf  ;;  %v8696_v44 = vld [vmem:[%s11749_s7 + $0x498] sm:$0xff]  }
 0x581   : > { %8116 = vmatprep.subr.bf16.mxu1 %v11875_v22 }
 0x582   : > { %8135 = vmatpush3.bf16.msra.mxu0 %v8653_v19  ;;  %v4533_v19 = vpack.c.bf16 %v4468_v8, %v4468_v8  ;;  %v4476_v2 = vsel %vm1496_vm6, %v4316_v27, -inf }
 0x583   : > { %8136 = vmatprep.subr.bf16.mxu0 %v11875_v22 }
 0x584   : > { %8117 = vmatpush3.bf16.msra.mxu1 %v8654_v49  ;;  %v8676_v49 = vld [vmem:[%s11749_s7 + $0x408] sm:$0xff]  }
 0x585   : > { %8118 = vmatprep.subr.bf16.mxu1 %v11875_v22 }
 0x586   : > { %8137 = vmatpush3.bf16.msra.mxu0 %v8655_v46  ;;  %v8677_v46 = vld [vmem:[%s11749_s7 + $0x448] sm:$0xff]  }
 0x587   : > { %8138 = vmatprep.subr.bf16.mxu0 %v11875_v22 }
 0x588   : > { %8119 = vmatpush3.bf16.msra.mxu1 %v8656_v21  ;;  %v4470_v21 = vrot.slane %v4469_v6, 4 }
 0x589   : > { %8144 = vmatprep.subr.bf16.mxu1 %v11875_v22 }
 0x58a   : > { %8139 = vmatpush3.bf16.msra.mxu0 %v8657_v26  ;;  %v4477_v26 = vrot.slane %v4476_v2, 4  ;;  %v4471_v12 = vmax.f32 %v4469_v6, %v4470_v21  ;;  %v8701_v21 = vld [vmem:[%s11749_s7 + $0x4e8] sm:$0xff]  }
 0x58b   : > { %8121 = vmatmul.mubr.bf16.vlgmr.msra.gmra.mrb[60].mxu1 %v4530_v17  ;;  %8164 = vmatprep.subr.bf16.mxu0 %v11875_v22 }
 0x58c   : > { %8145 = vmatpush3.bf16.msra.mxu1 %v8658_v7  ;;  %8160 = vmatprep.mubr.msk.bf16.mxu1 %vm8803_vm1, %v11875_v22  ;;  %v8681_v7 = vld [vmem:[%s11749_s7 + $0x458] sm:$0xff]   ;;  %v4478_v17 = vmax.f32 %v4476_v2, %v4477_v26 }
 0x58d   : > { %8141 = vmatmul.mubr.bf16.vlgmr.msra.gmra.mrb[72].mxu0 %v4531_v28  ;;  %8146 = vmatprep.subr.bf16.mxu1 %v11875_v22  ;;  %v4472_v28 = vrot.slane %v4471_v12, 2 }
 0x58e   : > { %8165 = vmatpush3.bf16.msra.mxu0 %v8659_v31  ;;  %8180 = vmatprep.mubr.msk.bf16.mxu0 %vm8803_vm1, %v11875_v22  ;;  %v8682_v31 = vld [vmem:[%s11749_s7 + $0x420] sm:$0xff]  }
 0x58f   : > { %8166 = vmatprep.subr.bf16.mxu0 %v11875_v22 }
 0x590   : > { %8147 = vmatpush3.bf16.msra.mxu1 %v8660_v24  ;;  %v4479_v24 = vrot.slane %v4478_v17, 2 }
 0x591   : > { %8148 = vmatprep.subr.bf16.mxu1 %v11875_v22 }
 0x592   : > { %8167 = vmatpush3.bf16.msra.mxu0 %v8661_v60  ;;  %v4473_v60 = vmax.f32 %v4471_v12, %v4472_v28  ;;  %v4480_v10 = vmax.f32 %v4478_v17, %v4479_v24 }
 0x593   : > { %8168 = vmatprep.subr.bf16.mxu0 %v11875_v22 }
 0x594   : > { %8149 = vmatpush3.bf16.msra.mxu1 %v8662_v42  ;;  %v8685_v42 = vld [vmem:[%s11749_s7 + $0x468] sm:$0xff]   ;;  %v4474_v0 = vrot.slane %v4473_v60, 1 }
 0x595   : > { %8150 = vmatprep.subr.bf16.mxu1 %v11875_v22 }
 0x596   : > { %8169 = vmatpush3.bf16.msra.mxu0 %v8663_v38 }
 0x597   : > { %8170 = vmatprep.subr.bf16.mxu0 %v11875_v22 }
 0x598   : > { %8151 = vmatpush3.bf16.msra.mxu1 %v8664_v55 }
 0x599   : > { %8152 = vmatprep.subr.bf16.mxu1 %v11875_v22 }
 0x59a   : > { %8171 = vmatpush3.bf16.msra.mxu0 %v8665_v30 }
 0x59b   : > { %8172 = vmatprep.subr.bf16.mxu0 %v11875_v22 }
 0x59c   : > { %8153 = vmatpush3.bf16.msra.mxu1 %v8666_v40 }
 0x59d   : > { %8154 = vmatprep.subr.bf16.mxu1 %v11875_v22 }
 0x59e   : > { %8173 = vmatpush3.bf16.msra.mxu0 %v8667_v34  ;;  %v4991_v50 = vpop.f32.mrb[36].mxu1 }
 0x59f   : > { %v7882_v58 = vpop.f32.mrb[37].mxu1  ;;  %8174 = vmatprep.subr.bf16.mxu0 %v11875_v22  ;;  %v6934_v52 = vsel %vm6933_vm0, %v4991_v50, 0.0  ;;  %v8687_v50 = vld [vmem:[%s11749_s7 + $0x470] sm:$0xff]  }
 0x5a0   : > { %8155 = vmatpush3.bf16.msra.mxu1 %v8668_v29  ;;  %v4994_v36 = vpop.f32.mrb[38].mxu1  ;;  %v5079_v14 = vpop.f32.mrb[48].mxu0  ;;  %v4481_v58 = vrot.slane %v4480_v10, 1 }
 0x5a1   : > { %v6935_v11 = vsel %vm6933_vm0, %v5079_v14, 0.0  ;;  %v7883_v25 = vpop.f32.mrb[39].mxu1  ;;  %v7902_v18 = vpop.f32.mrb[49].mxu0  ;;  %8156 = vmatprep.subr.bf16.mxu1 %v11875_v22  ;;  %v8688_v36 = vld [vmem:[%s11749_s7 + $0x438] sm:$0xff]   ;;  %v4475_v14 = vmax.f32 %v4473_v60, %v4474_v0 }
 0x5a2   : > { %v11367_v5 = vadd.f32 %v6935_v11, %v6934_v52  ;;  %8175 = vmatpush3.bf16.msra.mxu0 %v8669_v45  ;;  %v5082_v33 = vpop.f32.mrb[50].mxu0  ;;  %v4482_v52 = vmax.f32 %v4480_v10, %v4481_v58  ;;  %v4315_v11 = vrot.slane %v4301_v53, %v11872_v20  ;;  %v8691_v18 = vld [vmem:[%s11749_s7 + $0x4c0] sm:$0xff]   ;;  %v8704_v10 = vld [vmem:[%s11749_s7 + $0x4b8] sm:$0xff]   ;;  %v8710_v53 = vld [vmem:[%s11749_s7 + $0x510] sm:$0xff]  }
 0x5a3   : > { %v7903_v13 = vpop.f32.mrb[51].mxu0  ;;  %8176 = vmatprep.subr.bf16.mxu0 %v11875_v22  ;;  %v4534_v25 = vpack.c.bf16 %v4475_v14, %v4475_v14  ;;  %v8692_v33 = vld [vmem:[%s11749_s7 + $0x488] sm:$0xff]   ;;  %v8711_v14 = vld [vmem:[%s11749_s7 + $0x550] sm:$0xff]  }
 0x5a4   : > { %8157 = vmatpush3.bf16.msra.mxu1 %v8670_v32  ;;  %v8689_v32 = vld [vmem:[%s11749_s7 + $0x478] sm:$0xff]   ;;  %v4535_v4 = vpack.c.bf16 %v4482_v52, %v4482_v52  ;;  %v8693_v13 = vld [vmem:[%s11749_s7 + $0x4c8] sm:$0xff]  }
 0x5a5   : > { %8158 = vmatprep.subr.bf16.mxu1 %v11875_v22  ;;  %v8712_v52 = vld [vmem:[%s11749_s7 + $0x518] sm:$0xff]  }
 0x5a6   : > { %8177 = vmatpush3.bf16.msra.mxu0 %v8671_v1  ;;  %v4483_v1 = vsel %vm1496_vm6, %v4315_v11, -inf }
 0x5a7   : > { %8178 = vmatprep.subr.bf16.mxu0 %v11875_v22  ;;  %v4484_v35 = vrot.slane %v4483_v1, 4 }
 0x5a8   : > { %8159 = vmatpush3.bf16.msra.mxu1 %v8672_v59  ;;  %v8694_v59 = vld [vmem:[%s11749_s7 + $0x490] sm:$0xff]  }
 0x5a9   : > { %8184 = vmatprep.subr.bf16.mxu1 %v11875_v22 }
 0x5aa   : > { %8179 = vmatpush3.bf16.msra.mxu0 %v8673_v61  ;;  %v8695_v61 = vld [vmem:[%s11749_s7 + $0x4d0] sm:$0xff]  }
 0x5ab   : > { %8161 = vmatmul.mubr.bf16.vlgmr.msra.gmra.mrb[64].mxu1 %v4532_v3  ;;  %8204 = vmatprep.subr.bf16.mxu0 %v11875_v22  ;;  %v8697_v3 = vld [vmem:[%s11749_s7 + $0x4d8] sm:$0xff]  }
 0x5ac   : > { %8185 = vmatpush3.bf16.msra.mxu1 %v8674_v23  ;;  %8200 = vmatprep.mubr.msk.bf16.mxu1 %vm8803_vm1, %v11875_v22  ;;  %v4485_v23 = vmax.f32 %v4483_v1, %v4484_v35  ;;  %v8716_v1 = vld [vmem:[%s11749_s7 + $0x528] sm:$0xff]  }
 0x5ad   : > { %8181 = vmatmul.mubr.bf16.vlgmr.msra.gmra.mrb[76].mxu0 %v4533_v19  ;;  %8186 = vmatprep.subr.bf16.mxu1 %v11875_v22  ;;  %v8698_v19 = vld [vmem:[%s11749_s7 + $0x4a0] sm:$0xff]  }
 0x5ae   : > { %8205 = vmatpush3.bf16.msra.mxu0 %v8675_v37  ;;  %8220 = vmatprep.mubr.msk.bf16.mxu0 %vm8803_vm1, %v11875_v22  ;;  %v4486_v27 = vrot.slane %v4485_v23, 2 }
 0x5af   : > { %8206 = vmatprep.subr.bf16.mxu0 %v11875_v22 }
 0x5b0   : > { %8187 = vmatpush3.bf16.msra.mxu1 %v8676_v49  ;;  %v8699_v49 = vld [vmem:[%s11749_s7 + $0x4e0] sm:$0xff]   ;;  %v4487_v2 = vmax.f32 %v4485_v23, %v4486_v27 }
 0x5b1   : > { %8188 = vmatprep.subr.bf16.mxu1 %v11875_v22 }
 0x5b2   : > { %8207 = vmatpush3.bf16.msra.mxu0 %v8677_v46  ;;  %v8700_v46 = vld [vmem:[%s11749_s7 + $0x4a8] sm:$0xff]  }
 0x5b3   : > { %8208 = vmatprep.subr.bf16.mxu0 %v11875_v22 }
 0x5b4   : > { %8189 = vmatpush3.bf16.msra.mxu1 %v8678_v56 }
 0x5b5   : > { %8190 = vmatprep.subr.bf16.mxu1 %v11875_v22 }
 0x5b6   : > { %8209 = vmatpush3.bf16.msra.mxu0 %v8679_v62 }
 0x5b7   : > { %8210 = vmatprep.subr.bf16.mxu0 %v11875_v22 }
 0x5b8   : > { %8191 = vmatpush3.bf16.msra.mxu1 %v8680_v54 }
 0x5b9   : > { %8192 = vmatprep.subr.bf16.mxu1 %v11875_v22 }
 0x5ba   : > { %8211 = vmatpush3.bf16.msra.mxu0 %v8681_v7 }
 0x5bb   : > { %8212 = vmatprep.subr.bf16.mxu0 %v11875_v22 }
 0x5bc   : > { %8193 = vmatpush3.bf16.msra.mxu1 %v8682_v31  ;;  %v8702_v31 = vld [vmem:[%s11749_s7 + $0x4b0] sm:$0xff]  }
 0x5bd   : > { %8194 = vmatprep.subr.bf16.mxu1 %v11875_v22 }
 0x5be   : > { %v5167_v48 = vpop.f32.mrb[40].mxu1  ;;  %8213 = vmatpush3.bf16.msra.mxu0 %v8683_v41 }
 0x5bf   : > { %v6937_v15 = vsel %vm6933_vm0, %v5167_v48, 0.0  ;;  %v7922_v38 = vpop.f32.mrb[41].mxu1  ;;  %8214 = vmatprep.subr.bf16.mxu0 %v11875_v22 }
 0x5c0   : > { %v6938_v55 = vadd.f32 %v6937_v15, %v11367_v5  ;;  %v5170_v39 = vpop.f32.mrb[42].mxu1  ;;  %v5255_v30 = vpop.f32.mrb[52].mxu0  ;;  %8195 = vmatpush3.bf16.msra.mxu1 %v8684_v57  ;;  %v4317_v5 = vcombine.high %v4315_v11, %v4315_v11  ;;  %v4488_v57 = vrot.slane %v4487_v2, 1 }
 0x5c1   : > { %v6939_v40 = vsel %vm6933_vm0, %v5255_v30, 0.0  ;;  %v7923_v47 = vpop.f32.mrb[43].mxu1  ;;  %v7942_v34 = vpop.f32.mrb[53].mxu0  ;;  %8196 = vmatprep.subr.bf16.mxu1 %v11875_v22  ;;  %v8705_v39 = vld [vmem:[%s11749_s7 + $0x4f8] sm:$0xff]  }
 0x5c2   : > { %v11444_v29 = vadd.f32 %v6939_v40, %v6938_v55  ;;  %v5258_v43 = vpop.f32.mrb[54].mxu0  ;;  %8215 = vmatpush3.bf16.msra.mxu0 %v8685_v42  ;;  %v4490_v63 = vsel %vm1496_vm6, %v4317_v5, -inf  ;;  %v8703_v42 = vld [vmem:[%s11749_s7 + $0x4f0] sm:$0xff]   ;;  %v4489_v55 = vmax.f32 %v4487_v2, %v4488_v57  ;;  %v8706_v40 = vld [vmem:[%s11749_s7 + $0x500] sm:$0xff]  }
 0x5c3   : > { %v7943_v45 = vpop.f32.mrb[55].mxu0  ;;  %8216 = vmatprep.subr.bf16.mxu0 %v11875_v22  ;;  %v4491_v8 = vrot.slane %v4490_v63, 4  ;;  %v8707_v34 = vld [vmem:[%s11749_s7 + $0x540] sm:$0xff]   ;;  %v8708_v43 = vld [vmem:[%s11749_s7 + $0x508] sm:$0xff]  }
 0x5c4   : > { %8197 = vmatpush3.bf16.msra.mxu1 %v8686_v9  ;;  %v4325_v9 = vrot.slane %v10899_v51, %v11872_v20  ;;  %v4536_v47 = vpack.c.bf16 %v4489_v55, %v4489_v55  ;;  %v8709_v45 = vld [vmem:[%s11749_s7 + $0x548] sm:$0xff]   ;;  %v8715_v5 = vld [vmem:[%s11749_s7 + $0x560] sm:$0xff]  }
 0x5c5   : > { %8198 = vmatprep.subr.bf16.mxu1 %v11875_v22  ;;  %v4492_v37 = vmax.f32 %v4490_v63, %v4491_v8 }
 0x5c6   : > { %8217 = vmatpush3.bf16.msra.mxu0 %v8687_v50  ;;  %v4497_v50 = vsel %vm1496_vm6, %v4325_v9, -inf }
 0x5c7   : > { %8218 = vmatprep.subr.bf16.mxu0 %v11875_v22  ;;  %v4493_v6 = vrot.slane %v4492_v37, 2 }
 0x5c8   : > { %8199 = vmatpush3.bf16.msra.mxu1 %v8688_v36  ;;  %v4498_v36 = vrot.slane %v4497_v50, 4 }
 0x5c9   : > { %8224 = vmatprep.subr.bf16.mxu1 %v11875_v22  ;;  %v4494_v54 = vmax.f32 %v4492_v37, %v4493_v6  ;;  %v8718_v37 = vld [vmem:[%s11749_s7 + $0x530] sm:$0xff]  }
 0x5ca   : > { %8219 = vmatpush3.bf16.msra.mxu0 %v8689_v32  ;;  %v4499_v11 = vmax.f32 %v4497_v50, %v4498_v36 }
 0x5cb   : > { %8201 = vmatmul.mubr.bf16.vlgmr.msra.gmra.mrb[68].mxu1 %v4534_v25  ;;  %8244 = vmatprep.subr.bf16.mxu0 %v11875_v22  ;;  %v4495_v38 = vrot.slane %v4494_v54, 1 }
 0x5cc   : > { %8225 = vmatpush3.bf16.msra.mxu1 %v8690_v16  ;;  %8240 = vmatprep.mubr.msk.bf16.mxu1 %vm8803_vm1, %v11875_v22  ;;  %v8713_v16 = vld [vmem:[%s11749_s7 + $0x558] sm:$0xff]  }
 0x5cd   : > { %8221 = vmatmul.mubr.bf16.vlgmr.msra.gmra.mrb[80].mxu0 %v4535_v4  ;;  %8226 = vmatprep.subr.bf16.mxu1 %v11875_v22  ;;  %v4496_v30 = vmax.f32 %v4494_v54, %v4495_v38  ;;  %v4500_v4 = vrot.slane %v4499_v11, 2 }
 0x5ce   : > { %8245 = vmatpush3.bf16.msra.mxu0 %v8691_v18  ;;  %8260 = vmatprep.mubr.msk.bf16.mxu0 %vm8803_vm1, %v11875_v22  ;;  %v8714_v18 = vld [vmem:[%s11749_s7 + $0x520] sm:$0xff]  }
 0x5cf   : > { %8246 = vmatprep.subr.bf16.mxu0 %v11875_v22  ;;  %v4537_v0 = vpack.c.bf16 %v4496_v30, %v4496_v30 }
 0x5d0   : > { %8227 = vmatpush3.bf16.msra.mxu1 %v8692_v33 }
 0x5d1   : > { %8228 = vmatprep.subr.bf16.mxu1 %v11875_v22 }
 0x5d2   : > { %8247 = vmatpush3.bf16.msra.mxu0 %v8693_v13  ;;  %v4501_v13 = vmax.f32 %v4499_v11, %v4500_v4 }
 0x5d3   : > { %8248 = vmatprep.subr.bf16.mxu0 %v11875_v22 }
 0x5d4   : > { %8229 = vmatpush3.bf16.msra.mxu1 %v8694_v59  ;;  %v8717_v59 = vld [vmem:[%s11749_s7 + $0x568] sm:$0xff]   ;;  %v4502_v6 = vrot.slane %v4501_v13, 1 }
 0x5d5   : > { %8230 = vmatprep.subr.bf16.mxu1 %v11875_v22 }
 0x5d6   : > { %8249 = vmatpush3.bf16.msra.mxu0 %v8695_v61  ;;  %v4503_v54 = vmax.f32 %v4501_v13, %v4502_v6 }
 0x5d7   : > { %8250 = vmatprep.subr.bf16.mxu0 %v11875_v22 }
 0x5d8   : > { %8231 = vmatpush3.bf16.msra.mxu1 %v8696_v44 }
 0x5d9   : > { %8232 = vmatprep.subr.bf16.mxu1 %v11875_v22 }
 0x5da   : > { %8251 = vmatpush3.bf16.msra.mxu0 %v8697_v3 }
 0x5db   : > { %8252 = vmatprep.subr.bf16.mxu0 %v11875_v22 }
 0x5dc   : > { %8233 = vmatpush3.bf16.msra.mxu1 %v8698_v19 }
 0x5dd   : > { %8234 = vmatprep.subr.bf16.mxu1 %v11875_v22 }
 0x5de   : > { %v5343_v56 = vpop.f32.mrb[44].mxu1  ;;  %8253 = vmatpush3.bf16.msra.mxu0 %v8699_v49 }
 0x5df   : > { %v6941_v62 = vsel %vm6933_vm0, %v5343_v56, 0.0  ;;  %v7962_v26 = vpop.f32.mrb[45].mxu1  ;;  %8254 = vmatprep.subr.bf16.mxu0 %v11875_v22  ;;  %v8719_v56 = vld [vmem:[%s11749_s7 + $0x570] sm:$0xff]  }
 0x5e0   : > { %v6942_v12 = vadd.f32 %v6941_v62, %v11444_v29  ;;  %v5346_v7 = vpop.f32.mrb[46].mxu1  ;;  %v5431_v17 = vpop.f32.mrb[56].mxu0  ;;  %8235 = vmatpush3.bf16.msra.mxu1 %v8700_v46  ;;  %v4333_v29 = vcombine.high %v4325_v9, %v4325_v9  ;;  %v8720_v26 = vld [vmem:[%s11749_s7 + $0x538] sm:$0xff]  }
 0x5e1   : > { %v6943_v28 = vsel %vm6933_vm0, %v5431_v17, 0.0  ;;  %v7963_v41 = vpop.f32.mrb[47].mxu1  ;;  %v7982_v24 = vpop.f32.mrb[57].mxu0  ;;  %8236 = vmatprep.subr.bf16.mxu1 %v11875_v22  ;;  %v8721_v7 = vld [vmem:[%s11749_s7 + $0x578] sm:$0xff]  }
 0x5e2   : > { %v11522_v60 = vadd.f32 %v6943_v28, %v6942_v12  ;;  %v5434_v48 = vpop.f32.mrb[58].mxu0  ;;  %8255 = vmatpush3.bf16.msra.mxu0 %v8701_v21  ;;  %v4504_v58 = vsel %vm1496_vm6, %v4333_v29, -inf  ;;  %v4318_v12 = vcombine.high %v10899_v51, %v10899_v51  ;;  %v4538_v28 = vpack.c.bf16 %v4503_v54, %v4503_v54  ;;  %v8723_v24 = vld [vmem:[%s11749_s7 + $0x588] sm:$0xff]  }
 0x5e3   : > { %v7983_v15 = vpop.f32.mrb[59].mxu0  ;;  %8256 = vmatprep.subr.bf16.mxu0 %v11875_v22  ;;  %v4505_v32 = vrot.slane %v4504_v58, 4  ;;  %v8725_v48 = vld [vmem:[%s11749_s7 + $0x598] sm:$0xff]  }
 0x5e4   : > { %8237 = vmatpush3.bf16.msra.mxu1 %v8702_v31  ;;  %v8722_v31 = vld [vmem:[%s11749_s7 + $0x580] sm:$0xff]   ;;  %v4332_v41 = vrot.slane %v4318_v12, %v11872_v20  ;;  %v8724_v20 = vld [vmem:[%s11749_s7 + $0x590] sm:$0xff]  }
 0x5e5   : > { %8238 = vmatprep.subr.bf16.mxu1 %v11875_v22  ;;  %v4506_v25 = vmax.f32 %v4504_v58, %v4505_v32  ;;  %v8726_v15 = vld [vmem:[%s11749_s7 + $0x5a0] sm:$0xff]  }
 0x5e6   : > { %8257 = vmatpush3.bf16.msra.mxu0 %v8703_v42  ;;  %v4511_v57 = vsel %vm1496_vm6, %v4332_v41, -inf }
 0x5e7   : > { %8258 = vmatprep.subr.bf16.mxu0 %v11875_v22  ;;  %v4507_v33 = vrot.slane %v4506_v25, 2 }
 0x5e8   : > { %8239 = vmatpush3.bf16.msra.mxu1 %v8704_v10  ;;  %v8727_v10 = vld [vmem:[%s11749_s7 + $0x5a8] sm:$0xff]  }
 0x5e9   : > { %8264 = vmatprep.subr.bf16.mxu1 %v11875_v22  ;;  %v4508_v8 = vmax.f32 %v4506_v25, %v4507_v33 }
 0x5ea   : > { %8259 = vmatpush3.bf16.msra.mxu0 %v8705_v39 }
 0x5eb   : > { %8241 = vmatmul.mubr.bf16.vlgmr.msra.gmra.mrb[72].mxu1 %v4536_v47  ;;  %8284 = vmatprep.subr.bf16.mxu0 %v11875_v22  ;;  %v4509_v62 = vrot.slane %v4508_v8, 1 }
 0x5ec   : > { %8265 = vmatpush3.bf16.msra.mxu1 %v8706_v40  ;;  %8280 = vmatprep.mubr.msk.bf16.mxu1 %vm8803_vm1, %v11875_v22 }
 0x5ed   : > { %8261 = vmatmul.mubr.bf16.vlgmr.msra.gmra.mrb[84].mxu0 %v4537_v0  ;;  %8266 = vmatprep.subr.bf16.mxu1 %v11875_v22  ;;  %v4510_v17 = vmax.f32 %v4508_v8, %v4509_v62  ;;  %v8728_v0 = vld [vmem:[%s11749_s7 + $0x5b0] sm:$0xff]  }
 0x5ee   : > { %8285 = vmatpush3.bf16.msra.mxu0 %v8707_v34  ;;  %8300 = vmatprep.mubr.msk.bf16.mxu0 %vm8803_vm1, %v11875_v22 }
 0x5ef   : > { %8286 = vmatprep.subr.bf16.mxu0 %v11875_v22  ;;  %v4539_v51 = vpack.c.bf16 %v4510_v17, %v4510_v17 }
 0x5f0   : > { %8267 = vmatpush3.bf16.msra.mxu1 %v8708_v43 }
 0x5f1   : > { %8268 = vmatprep.subr.bf16.mxu1 %v11875_v22 }
 0x5f2   : > { %8287 = vmatpush3.bf16.msra.mxu0 %v8709_v45 }
 0x5f3   : > { %8288 = vmatprep.subr.bf16.mxu0 %v11875_v22 }
 0x5f4   : > { %8269 = vmatpush3.bf16.msra.mxu1 %v8710_v53 }
 0x5f5   : > { %8270 = vmatprep.subr.bf16.mxu1 %v11875_v22 }
 0x5f6   : > { %8289 = vmatpush3.bf16.msra.mxu0 %v8711_v14  ;;  %v8729_v14 = vld [vmem:[%s11749_s7 + $0x5b8] sm:$0xff]  }
 0x5f7   : > { %8290 = vmatprep.subr.bf16.mxu0 %v11875_v22 }
 0x5f8   : > { %8271 = vmatpush3.bf16.msra.mxu1 %v8712_v52 }
 0x5f9   : > { %8272 = vmatprep.subr.bf16.mxu1 %v11875_v22 }
 0x5fa   : > { %8291 = vmatpush3.bf16.msra.mxu0 %v8713_v16 }
 0x5fb   : > { %8292 = vmatprep.subr.bf16.mxu0 %v11875_v22 }
 0x5fc   : > { %8273 = vmatpush3.bf16.msra.mxu1 %v8714_v18 }
 0x5fd   : > { %8274 = vmatprep.subr.bf16.mxu1 %v11875_v22 }
 0x5fe   : > { %v5519_v63 = vpop.f32.mrb[48].mxu1  ;;  %8293 = vmatpush3.bf16.msra.mxu0 %v8715_v5 }
 0x5ff   : > { %v6945_v35 = vsel %vm6933_vm0, %v5519_v63, 0.0  ;;  %v8002_v61 = vpop.f32.mrb[49].mxu1  ;;  %8294 = vmatprep.subr.bf16.mxu0 %v11875_v22 }
 0x600   : > { %v6946_v44 = vadd.f32 %v6945_v35, %v11522_v60  ;;  %v5522_v23 = vpop.f32.mrb[50].mxu1  ;;  %v5607_v3 = vpop.f32.mrb[60].mxu0  ;;  %8275 = vmatpush3.bf16.msra.mxu1 %v8716_v1  ;;  %v4512_v60 = vrot.slane %v4511_v57, 4 }
 0x601   : > { %v6947_v19 = vsel %vm6933_vm0, %v5607_v3, 0.0  ;;  %v8003_v27 = vpop.f32.mrb[51].mxu1  ;;  %v8022_v49 = vpop.f32.mrb[61].mxu0  ;;  %8276 = vmatprep.subr.bf16.mxu1 %v11875_v22 }
 0x602   : > { %v6948_v46 = vadd.f32 %v6947_v19, %v6946_v44  ;;  %v5610_v2 = vpop.f32.mrb[62].mxu0  ;;  %8295 = vmatpush3.bf16.msra.mxu0 %v8717_v59  ;;  %v4513_v42 = vmax.f32 %v4511_v57, %v4512_v60  ;;  %v8731_v57 = vld [vmem:[%s11751_s9 + $0x8] sm:$0xff]  }
 0x603   : > { %v8023_v21 = vpop.f32.mrb[63].mxu0  ;;  %8296 = vmatprep.subr.bf16.mxu0 %v11875_v22 }
 0x604   : > { %8277 = vmatpush3.bf16.msra.mxu1 %v8718_v37  ;;  %v4514_v38 = vrot.slane %v4513_v42, 2 }
 0x605   : > { %8278 = vmatprep.subr.bf16.mxu1 %v11875_v22 }
 0x606   : > { %8297 = vmatpush3.bf16.msra.mxu0 %v8719_v56  ;;  %v4515_v55 = vmax.f32 %v4513_v42, %v4514_v38 }
 0x607   : > { %8298 = vmatprep.subr.bf16.mxu0 %v11875_v22 }
 0x608   : > { %8279 = vmatpush3.bf16.msra.mxu1 %v8720_v26  ;;  %v4516_v45 = vrot.slane %v4515_v55, 1 }
 0x609   : > { %8304 = vmatprep.subr.bf16.mxu1 %v11875_v22 }
 0x60a   : > { %8299 = vmatpush3.bf16.msra.mxu0 %v8721_v7  ;;  %v4517_v32 = vmax.f32 %v4515_v55, %v4516_v45 }
 0x60b   : > { %8281 = vmatmul.mubr.bf16.vlgmr.msra.gmra.mrb[76].mxu1 %v4538_v28  ;;  %8324 = vmatprep.subr.bf16.mxu0 %v11875_v22 }
 0x60c   : > { %8305 = vmatpush3.bf16.msra.mxu1 %v8722_v31  ;;  %8320 = vmatprep.mubr.msk.bf16.mxu1 %vm8803_vm1, %v11875_v22  ;;  %v4540_v52 = vpack.c.bf16 %v4517_v32, %v4517_v32 }
 0x60d   : > { %8301 = vmatmul.mubr.bf16.vlgmr.msra.gmra.mrb[88].mxu0 %v4539_v51  ;;  %8306 = vmatprep.subr.bf16.mxu1 %v11875_v22 }
 0x60e   : > { %8328 = vmatprep.mubr.msk.bf16.mxu0 %vm8803_vm1, %v11875_v22 }
 0x610   : > { %8307 = vmatpush3.bf16.msra.mxu1 %v8723_v24  ;;  %v8730_v24 = vld [vmem:[%s11751_s9] sm:$0xff]  }
 0x611   : > { %8308 = vmatprep.subr.bf16.mxu1 %v11875_v22  ;;  %8325 = vmatpush3.bf16.msra.mxu0 %v8730_v24 }
 0x612   : > { %8326 = vmatprep.subr.bf16.mxu0 %v11875_v22 }
 0x614   : > { %8309 = vmatpush3.bf16.msra.mxu1 %v8724_v20 }
 0x615   : > { %8310 = vmatprep.subr.bf16.mxu1 %v11875_v22  ;;  %8327 = vmatpush3.bf16.msra.mxu0 %v8731_v57 }
 0x616   : > { %8332 = vmatprep.subr.bf16.mxu0 %v11875_v22 }
 0x618   : > { %8311 = vmatpush3.bf16.msra.mxu1 %v8725_v48 }
 0x619   : > { %8312 = vmatprep.subr.bf16.mxu1 %v11875_v22 }
 0x61c   : > { %8313 = vmatpush3.bf16.msra.mxu1 %v8726_v15 }
 0x61d   : > { %8314 = vmatprep.subr.bf16.mxu1 %v11875_v22 }
 0x61e   : > { %v5695_v39 = vpop.f32.mrb[52].mxu1 }
 0x61f   : > { %v6949_v30 = vsel %vm6933_vm0, %v5695_v39, 0.0  ;;  %v8042_v9 = vpop.f32.mrb[53].mxu1 }
 0x620   : > { %v6950_v40 = vadd.f32 %v6949_v30, %v6948_v46  ;;  %v5698_v47 = vpop.f32.mrb[54].mxu1  ;;  %v5783_v34 = vpop.f32.mrb[64].mxu0  ;;  %8315 = vmatpush3.bf16.msra.mxu1 %v8727_v10 }
 0x621   : > { %v6951_v29 = vsel %vm6933_vm0, %v5783_v34, 0.0  ;;  %v8043_v43 = vpop.f32.mrb[55].mxu1  ;;  %v8062_v50 = vpop.f32.mrb[65].mxu0  ;;  %8316 = vmatprep.subr.bf16.mxu1 %v11875_v22 }
 0x622   : > { %v6952_v58 = vadd.f32 %v6951_v29, %v6950_v40  ;;  %v5786_v53 = vpop.f32.mrb[66].mxu0 }
 0x623   : > { %v8063_v36 = vpop.f32.mrb[67].mxu0 }
 0x624   : > { %8317 = vmatpush3.bf16.msra.mxu1 %v8728_v0 }
 0x625   : > { %8318 = vmatprep.subr.bf16.mxu1 %v11875_v22 }
 0x628   : > { %8319 = vmatpush3.bf16.msra.mxu1 %v8729_v14 }
 0x62b   : > { %8321 = vmatmul.mubr.bf16.vlgmr.msra.gmra.mrb[80].mxu1 %v4540_v52 }
 0x63e   : > { %v5871_v11 = vpop.f32.mrb[56].mxu1 }
 0x63f   : > { %v6953_v16 = vsel %vm6933_vm0, %v5871_v11, 0.0  ;;  %v8082_v25 = vpop.f32.mrb[57].mxu1 }
 0x640   : > { %v6954_v18 = vadd.f32 %v6953_v16, %v6952_v58  ;;  %v5874_v4 = vpop.f32.mrb[58].mxu1  ;;  %v5959_v5 = vpop.f32.mrb[68].mxu0 }
 0x641   : > { %v6955_v33 = vsel %vm6933_vm0, %v5959_v5, 0.0  ;;  %v8083_v1 = vpop.f32.mrb[59].mxu1  ;;  %v8102_v13 = vpop.f32.mrb[69].mxu0 }
 0x642   : > { %v6956_v63 = vadd.f32 %v6955_v33, %v6954_v18  ;;  %v5962_v59 = vpop.f32.mrb[70].mxu0 }
 0x643   : > { %v8103_v35 = vpop.f32.mrb[71].mxu0 }
 0x65e   : > { %v6047_v61 = vpop.f32.mrb[60].mxu1 }
 0x65f   : > { %v6957_v8 = vsel %vm6933_vm0, %v6047_v61, 0.0  ;;  %v8122_v44 = vpop.f32.mrb[61].mxu1 }
 0x660   : > { %v6958_v23 = vadd.f32 %v6957_v8, %v6956_v63  ;;  %v6050_v3 = vpop.f32.mrb[62].mxu1  ;;  %v6135_v37 = vpop.f32.mrb[72].mxu0  ;;  %v6979_v8 = vld [vmem:[%s11750_s8] sm:$0x1] }
 0x661   : > { %v6959_v19 = vsel %vm6933_vm0, %v6135_v37, 0.0  ;;  %v8123_v27 = vpop.f32.mrb[63].mxu1  ;;  %v8142_v49 = vpop.f32.mrb[73].mxu0 }
 0x662   : > { %v6960_v6 = vadd.f32 %v6959_v19, %v6958_v23  ;;  %v6138_v46 = vpop.f32.mrb[74].mxu0 }
 0x663   : > { %v8143_v2 = vpop.f32.mrb[75].mxu0  ;;  %v8732_v46 = vld [vmem:[%s11753_s11] sm:$0xff]  }
 0x664   : > { %v8733_v2 = vld [vmem:[%s11753_s11 + $0x8] sm:$0xff]  }
 0x67e   : > { %v6223_v56 = vpop.f32.mrb[64].mxu1 }
 0x67f   : > { %v6961_v21 = vsel %vm6933_vm0, %v6223_v56, 0.0  ;;  %v8162_v62 = vpop.f32.mrb[65].mxu1  ;;  %v6989_v56 = vld [vmem:[%s11752_s10] sm:$0x1] }
 0x680   : > { %v6962_v26 = vadd.f32 %v6961_v21, %v6960_v6  ;;  %v6226_v54 = vpop.f32.mrb[66].mxu1  ;;  %v6311_v12 = vpop.f32.mrb[76].mxu0 }
 0x681   : > { %v6963_v7 = vsel %vm6933_vm0, %v6311_v12, 0.0  ;;  %v8163_v17 = vpop.f32.mrb[67].mxu1  ;;  %v8182_v31 = vpop.f32.mrb[77].mxu0 }
 0x682   : > { %v6964_v28 = vadd.f32 %v6963_v7, %v6962_v26  ;;  %v6314_v41 = vpop.f32.mrb[78].mxu0 }
 0x683   : > { %v8183_v51 = vpop.f32.mrb[79].mxu0 }
 0x69e   : > { %v6399_v20 = vpop.f32.mrb[68].mxu1 }
 0x69f   : > { %v6965_v60 = vsel %vm6933_vm0, %v6399_v20, 0.0  ;;  %v8202_v48 = vpop.f32.mrb[69].mxu1 }
 0x6a0   : > { %v6966_v42 = vadd.f32 %v6965_v60, %v6964_v28  ;;  %v6402_v15 = vpop.f32.mrb[70].mxu1  ;;  %v6487_v38 = vpop.f32.mrb[80].mxu0 }
 0x6a1   : > { %v6967_v10 = vsel %vm6933_vm0, %v6487_v38, 0.0  ;;  %v8203_v55 = vpop.f32.mrb[71].mxu1  ;;  %v8222_v39 = vpop.f32.mrb[81].mxu0 }
 0x6a2   : > { %v6968_v30 = vadd.f32 %v6967_v10, %v6966_v42  ;;  %v6490_v9 = vpop.f32.mrb[82].mxu0 }
 0x6a3   : > { %v8223_v40 = vpop.f32.mrb[83].mxu0 }
 0x6be   : > { %v6575_v47 = vpop.f32.mrb[72].mxu1 }
 0x6bf   : > { %v6969_v34 = vsel %vm6933_vm0, %v6575_v47, 0.0  ;;  %v8242_v0 = vpop.f32.mrb[73].mxu1 }
 0x6c0   : > { %v6970_v29 = vadd.f32 %v6969_v34, %v6968_v30  ;;  %v6578_v43 = vpop.f32.mrb[74].mxu1  ;;  %v6663_v50 = vpop.f32.mrb[84].mxu0 }
 0x6c1   : > { %v6971_v45 = vsel %vm6933_vm0, %v6663_v50, 0.0  ;;  %v8243_v58 = vpop.f32.mrb[75].mxu1  ;;  %v8262_v53 = vpop.f32.mrb[85].mxu0 }
 0x6c2   : > { %v6972_v36 = vadd.f32 %v6971_v45, %v6970_v29  ;;  %v6666_v14 = vpop.f32.mrb[86].mxu0 }
 0x6c3   : > { %v8263_v32 = vpop.f32.mrb[87].mxu0 }
 0x6de   : > { %v6751_v52 = vpop.f32.mrb[76].mxu1 }
 0x6df   : > { %v6973_v11 = vsel %vm6933_vm0, %v6751_v52, 0.0  ;;  %v8282_v16 = vpop.f32.mrb[77].mxu1 }
 0x6e0   : > { %v6974_v25 = vadd.f32 %v6973_v11, %v6972_v36  ;;  %v6754_v18 = vpop.f32.mrb[78].mxu1  ;;  %v6839_v4 = vpop.f32.mrb[88].mxu0 }
 0x6e1   : > { %v6975_v5 = vsel %vm6933_vm0, %v6839_v4, 0.0  ;;  %v8283_v33 = vpop.f32.mrb[79].mxu1  ;;  %v8302_v1 = vpop.f32.mrb[89].mxu0 }
 0x6e2   : > { %v6976_v13 = vadd.f32 %v6975_v5, %v6974_v25  ;;  %v6842_v63 = vpop.f32.mrb[90].mxu0 }
 0x6e3   : > { %v8303_v59 = vpop.f32.mrb[91].mxu0 }
 0x6fe   : > { %v6927_v35 = vpop.f32.mrb[80].mxu1 }
 0x6ff   : > { %v6977_v61 = vsel %vm6933_vm0, %v6927_v35, 0.0  ;;  %v8322_v44 = vpop.f32.mrb[81].mxu1 }
 0x700   : > { %v6978_v23 = vadd.f32 %v6977_v61, %v6976_v13  ;;  %v6930_v3 = vpop.f32.mrb[82].mxu1 }
 0x701   : > { %v8323_v37 = vpop.f32.mrb[83].mxu1 }
 0x702   : > { %v6980_v19 = vadd.f32 %v6979_v8, %v6978_v23 }
 0x704   : > { %vm6981_vm4 = vcmp.gt.f32.partialorder %v6980_v19, 0.0  ;;  %v6982_v27 = vmul.f32 0.01, %v6980_v19 }
 0x706   : > { %v6983_v49 = vsel %vm6981_vm4, %v6980_v19, %v6982_v27 }
 0x707   : > { %v6984_v6 = vpack.c.bf16 %v6983_v49, %v6983_v49 }
 0x709   : > { %8329 = vmatmul.mubr.msk.bf16.vlgmr.msra.gmra.mrb[92].mxu0 %vm7002_vm5, %v6984_v6 }
 0x70a   : > { %8336 = vmatprep.mubr.msk.bf16.mxu0 %vm8803_vm1, %v11875_v22  ;;  %8333 = vmatpush3.bf16.msra.mxu0 %v8732_v46 }
 0x70b   : > { %8334 = vmatprep.subr.bf16.mxu0 %v11875_v22  ;;  %v7054_v22 = vld [vmem:[%s11754_s12] sm:$0x1] }
 0x70e   : > { %8335 = vmatpush3.bf16.msra.mxu0 %v8733_v2 }
 0x7dc   : > { %v7040_v21 = vpop.f32.mrb[92].mxu0 }
 0x7dd   : > { %v7041_v62 = vadd.f32 %v7040_v21, %v6989_v56  ;;  %v8330_v26 = vpop.f32.mrb[93].mxu0 }
 0x7de   : > { %v7043_v54 = vpop.f32.mrb[94].mxu0 }
 0x7df   : > { %vm7046_vm6 = vcmp.gt.f32.partialorder %v7041_v62, 0.0  ;;  %v7047_v12 = vmul.f32 0.01, %v7041_v62  ;;  %v8331_v7 = vpop.f32.mrb[95].mxu0 }
 0x7e1   : > { %v7048_v17 = vsel %vm7046_vm6, %v7041_v62, %v7047_v12 }
 0x7e2   : > { %v7049_v31 = vpack.c.bf16 %v7048_v17, %v7048_v17 }
 0x7e4   : > { %8337 = vmatmul.mubr.msk.bf16.vlgmr.msra.gmra.mrb[96].mxu0 %vm7002_vm5, %v7049_v31 }
 0x8b7   : > { %v7104_v28 = vpop.f32.mrb[96].mxu0 }
 0x8b8   : > { %v7105_v41 = vadd.f32 %v7104_v28, %v7054_v22  ;;  %v8338_v51 = vpop.f32.mrb[97].mxu0 }
 0x8b9   : > { %v7107_v24 = vpop.f32.mrb[98].mxu0 }
 0x8ba   : > { %7110 = vst [vmem:[%s432_s23] sm:$0x1] %v7105_v41  ;;  %v8339_v57 = vpop.f32.mrb[99].mxu0 }
 0x8bb   : > { %8748 = shalt.err (!%p8745_p3)
}
 0x8bc   : > { %s8749_s20 = scalar_lea.hbm %s11700_s16, 16  ;;  %s8753_s15 = scalar_lea.hbm %s11755_s13, 32 }
 0x8bd   : > { %p8750_p4 = scmp.ne.s32.totalorder %s11700_s16, %s8749_s20  ;;  %p8754_p9 = scmp.lt.u32.totalorder %s11700_s16, %s11755_s13 }
 0x8be   : > { %p8755_p10 = scmp.lt.u32.totalorder %s8753_s15, %s8749_s20  ;;  %p8757_p12 = scmp.lt.u32.totalorder %s8749_s20, %s11700_s16 }
 0x8bf   : > { %p8751_p7 = pnand %p8750_p4, %p8913_p5 }
 0x8c0   : > { %p8756_p11 = por %p8755_p10, %p8754_p9 }
 0x8c1   : > { %p8752_p8 = pneg %p8751_p7 }
 0x8c2   : > { %p8758_p13 = por %p8757_p12, %p8756_p11 }
 0x8c4   : > { %p8759_p0 = pnand %p8758_p13, %p8752_p8 }
 0x8c6   : > { %8762 = shalt.err (!%p8759_p0)
}
 0x8c7   : > { %8342 = dma.vmem_to_hbm [thread:$0]  (%p8913_p5), %s11702_s24, 16, %s11700_s16, %s7112_s21  }
 0x8c8 PF: > { %p8348_p1 = scmp.ge.s32.totalorder %s8797_s28, 2  ;;  %s7136_s29 = sand.u32 1, %s8785_s25  }
 0x8c9   : > { %s7137_s30 = scalar_lea.sflag [#allocation3], %s7136_s29 }
 0x8ca   : > { %p8345_p2 = pnand %p8348_p1, %p8917_p6 }
 0x8cc   : > { %8780 = dma.done.wait (!%p8345_p2), %s7137_s30, 16  }
 0x8cd   : > { %8782 = vsyncadd (!%p8345_p2), %s7137_s30, 4294967280  ;;  %s11876_s20 = sld [smem:[#allocation5_spill]]  ;;  %p23_p3 = scmp.ge.s32.totalorder %s8900_s14, 4  }
 0x8ce   : > { %s11877_s25 = smov %s8789_s26  ;;  %s11878_s26 = smov %s8793_s27 }
 0x8cf   : > { %s11880_s28 = smov %s8900_s14  ;;  %25 = sbr.rel (!%p23_p3) target bundleno = 5 (0x5), region = 107 }
 0x8d3   : > { %s11879_s27 = smov %s11876_s20 }
 0x8d6   :  { %7141 = vsyncpa [#allocation3], 1 }
 0x8d7   :  { %7143 = vsyncpa [#allocation3 + $0x1], 1 }

</bundles_post_ra>
